<compile_context>
chip_gen: v5e
topology: v5e:2x2
jax: 0.10.0
libtpu: 0.0.40
codegen_flags: <defaults>
</compile_context>

<pallas_src>
import functools

import jax
import jax.numpy as jnp
import numpy as np
from jax import lax
from jax.experimental import pallas as pl
from jax.experimental.pallas import tpu as pltpu

HEADS = 4
DIM_HEAD = 32
HIDDEN = HEADS * DIM_HEAD  # 128
SCALE = DIM_HEAD ** (-0.5)


# --------------------------------------------------------------------------- #
# Shared in-kernel pieces
# --------------------------------------------------------------------------- #
def _flash_step(q_blk, k_blk, v_blk, m_sc, l_sc, acc_sc, exp_dtype):
    """One online-softmax update for a (q-tile, kv-tile) pair.

    q_blk : (HIDDEN, TQ) bf16 value, already scaled by DIM_HEAD**-0.5
    k_blk : (HIDDEN, TK) bf16 value
    v_blk : (HIDDEN, TK) bf16 value
    m_sc, l_sc : (HEADS, TQ) f32 scratch refs (running max / denominator)
    acc_sc     : (HIDDEN, TQ) f32 scratch ref (running unnormalized output)
    """
    tk = k_blk.shape[1]
    # Ones block used to fold the softmax row-sum into the P.V matmul
    # (8 rows keeps the augmented operand sublane-aligned; row DIM_HEAD is read).
    ones_blk = jnp.ones((8, tk), jnp.bfloat16)

    m_all = m_sc[...]                       # (HEADS, TQ) one full load
    l_all = l_sc[...]
    m_rows = []
    l_rows = []
    for h in range(HEADS):
        sl = slice(h * DIM_HEAD, (h + 1) * DIM_HEAD)
        q_h = q_blk[sl, :]                  # (D, TQ) bf16
        k_h = k_blk[sl, :]                  # (D, TK) bf16
        # sim[j, i] = sum_d k[d, j] * q[d, i]  ->  (TK, TQ)
        # (trans-LHS MXU matmul; keeps everything channel-major so no extra
        # transposes are needed for the PV matmul or the output store).
        sim = lax.dot_general(k_h, q_h, (((0,), (0,)), ((), ())),
                              preferred_element_type=jnp.float32)

        m_prev = m_all[h:h + 1, :]                                   # (1, TQ)
        m_new = jnp.maximum(m_prev, jnp.max(sim, axis=0, keepdims=True))
        alpha = jnp.exp(m_prev - m_new)                              # (1, TQ) f32
        # exp in bf16 on v6e/v7x (bf16 EUP), f32 on v5e; MXU input is bf16 either way.
        p = jnp.exp((sim - m_new).astype(exp_dtype)).astype(jnp.bfloat16)

        # Fold the row-sum into the P.V matmul: rows 0:D are the numerator,
        # row D is the softmax denominator increment.
        v_aug = jnp.concatenate([v_blk[sl, :], ones_blk], axis=0)    # (D+8, TK) bf16
        pv = jnp.dot(v_aug, p, preferred_element_type=jnp.float32)   # (D+8, TQ) f32

        acc_sc[sl, :] = alpha * acc_sc[sl, :] + pv[0:DIM_HEAD, :]
        l_rows.append(alpha * l_all[h:h + 1, :] + pv[DIM_HEAD:DIM_HEAD + 1, :])
        m_rows.append(m_new)

    # Single stacked store per kv step instead of 2*HEADS masked 1-sublane stores.
    m_sc[...] = jnp.concatenate(m_rows, axis=0)
    l_sc[...] = jnp.concatenate(l_rows, axis=0)


def _finalize(wout_ref, bout_ref, o_ref, l_sc, acc_sc):
    """Normalize the accumulator and apply the 1x1 output projection + bias."""
    inv_l = pl.reciprocal(l_sc[...], approx=True)                    # (HEADS, TQ)
    rows = []
    for h in range(HEADS):
        sl = slice(h * DIM_HEAD, (h + 1) * DIM_HEAD)
        rows.append(acc_sc[sl, :] * inv_l[h:h + 1, :])
    out = jnp.concatenate(rows, axis=0).astype(jnp.bfloat16)         # (HIDDEN, TQ)
    y = jnp.dot(wout_ref[...], out, preferred_element_type=jnp.float32)  # (C, TQ)
    o_ref[0] = y + bout_ref[...]                                     # bias bcast over N


# --------------------------------------------------------------------------- #
# Kernels
# --------------------------------------------------------------------------- #
def attention_kernel_fused(xq_ref, xkv_ref, wqkv_ref, wout_ref, bout_ref, o_ref,
                           q_sc, m_sc, l_sc, acc_sc, *, exp_dtype):
    # xq_ref   : (1, C, TQ)   x tile for the query positions (channel-major)
    # xkv_ref  : (1, C, TK)   x tile for the key/value positions
    # wqkv_ref : (3*HIDDEN, C) to_qkv 1x1-conv weight (f32, no bias)
    # wout_ref : (C, HIDDEN)  to_out 1x1-conv weight (bf16)
    # bout_ref : (C, 1)       to_out bias (f32)
    # o_ref    : (1, C, TQ)   output tile (f32)
    ki = pl.program_id(2)
    nk = pl.num_programs(2)

    # ---- per-(batch, q-tile) init on first kv step: project Q, reset state ----
    @pl.when(ki == 0)
    def _():
        q = jnp.dot(wqkv_ref[0:HIDDEN, :], xq_ref[0],
                    preferred_element_type=jnp.float32) * SCALE
        q_sc[...] = q.astype(jnp.bfloat16)
        m_sc[...] = jnp.full(m_sc.shape, -jnp.inf, m_sc.dtype)
        l_sc[...] = jnp.zeros(l_sc.shape, l_sc.dtype)
        acc_sc[...] = jnp.zeros(acc_sc.shape, acc_sc.dtype)

    # ---- project K, V for this kv tile (C << HIDDEN so this is cheap) ----
    xkv = xkv_ref[0]                                                 # (C, TK) f32
    k_blk = jnp.dot(wqkv_ref[HIDDEN:2 * HIDDEN, :], xkv,
                    preferred_element_type=jnp.float32).astype(jnp.bfloat16)
    v_blk = jnp.dot(wqkv_ref[2 * HIDDEN:3 * HIDDEN, :], xkv,
                    preferred_element_type=jnp.float32).astype(jnp.bfloat16)

    _flash_step(q_sc[...], k_blk, v_blk, m_sc, l_sc, acc_sc, exp_dtype)

    @pl.when(ki == nk - 1)
    def _():
        _finalize(wout_ref, bout_ref, o_ref, l_sc, acc_sc)


def attention_kernel_hoisted(q_ref, k_ref, v_ref, wout_ref, bout_ref, o_ref,
                             m_sc, l_sc, acc_sc, *, exp_dtype):
    # q_ref : (1, HIDDEN, TQ) bf16, already scaled; resident across kv steps.
    # k_ref / v_ref : (1, HIDDEN, TK) bf16.
    ki = pl.program_id(2)
    nk = pl.num_programs(2)

    @pl.when(ki == 0)
    def _():
        m_sc[...] = jnp.full(m_sc.shape, -jnp.inf, m_sc.dtype)
        l_sc[...] = jnp.zeros(l_sc.shape, l_sc.dtype)
        acc_sc[...] = jnp.zeros(acc_sc.shape, acc_sc.dtype)

    _flash_step(q_ref[0], k_ref[0], v_ref[0], m_sc, l_sc, acc_sc, exp_dtype)

    @pl.when(ki == nk - 1)
    def _():
        _finalize(wout_ref, bout_ref, o_ref, l_sc, acc_sc)


# --------------------------------------------------------------------------- #
# Host-side helpers
# --------------------------------------------------------------------------- #
def _device_kind():
    try:
        return jax.devices()[0].device_kind.lower()
    except Exception:
        return ""


def _default_exp_dtype():
    # bf16 EUP exists on v6e / v7x; keep f32 exp on v5e and older (no bf16 EUP).
    kind = _device_kind()
    if any(tag in kind for tag in ("v6", "v7", "7x")):
        return jnp.bfloat16
    return jnp.float32


def _vmem_capacity_bytes():
    try:
        return int(pltpu.get_tpu_info().vmem_capacity_bytes)
    except Exception:
        return 64 << 20  # conservative: v7x physical VMEM


def _pick_tile(n, pref):
    """Largest lane-aligned tile <= pref dividing n; full extent otherwise."""
    pref = max(128, (pref // 128) * 128)
    if n <= pref:
        return n
    for t in range(pref, 127, -128):
        if n % t == 0:
            return t
    return n  # no 128-aligned divisor: block must equal the full dim


def attention_forward(x_nchw, w_qkv, w_out, b_out, *, tq=512, tk=512, fuse_qkv=None):
    """x_nchw: (B, C, H, W) f32.  w_qkv: (3*HIDDEN, C, 1, 1),
    w_out: (C, HIDDEN, 1, 1), b_out: (C,).  Returns (B, C, H, W) f32."""
    b, c, h, w = x_nchw.shape
    n = h * w

    # Channel-major, flattened spatial: free reshape (no HBM transpose).
    x_bcn = x_nchw.reshape(b, c, n)
    wqkv = w_qkv.reshape(3 * HIDDEN, c)                       # (3H, C) f32
    wout = w_out.reshape(c, HIDDEN).astype(jnp.bfloat16)      # (C, H) bf16 for the MXU
    bout = b_out.reshape(c, 1)                                # (C, 1) f32

    if fuse_qkv is None:
        # In-kernel projection only pays off when x (C channels) is much smaller
        # than the projected K/V (HIDDEN channels); otherwise hoist the qkv
        # projection so K/V are not re-projected once per q tile.
        fuse_qkv = c < HIDDEN

    tq = _pick_tile(n, tq)
    tk = _pick_tile(n, tk)
    # Keep the parallel grid extent (B * n//tq) >= 2 so both v7x TCs get work.
    while b * (n // tq) < 2 and tq % 256 == 0:
        tq //= 2
    assert n % tq == 0 and n % tk == 0

    exp_dtype = _default_exp_dtype()

    # Scoped-VMEM budget from the actual buffers (+ slack), capped per generation.
    f32b, bf16b = 4, 2
    est = (
        2 * (f32b * c * tq + f32b * c * tk)                      # fused x tiles (dbuf)
        + 2 * (bf16b * HIDDEN * tq + 2 * bf16b * HIDDEN * tk)    # hoisted q/k/v tiles (dbuf)
        + 2 * f32b * c * tq                                      # output tile (dbuf)
        + 2 * (f32b * 3 * HIDDEN * c + bf16b * c * HIDDEN + f32b * c)  # weights / bias (dbuf)
        + bf16b * HIDDEN * tq + f32b * HIDDEN * tq + 2 * f32b * HEADS * tq  # scratch
        + 2 * bf16b * HIDDEN * tk                                # k/v projection temporaries
        + f32b * tq * tk + 2 * bf16b * tq * tk                   # sim / p live temporaries
        + (8 << 20)                                              # compiler slack / spills
    )
    vmem_limit = int(min(max(est, 16 << 20), int(_vmem_capacity_bytes() * 0.6)))

    grid = (b, n // tq, n // tk)
    compiler_params = pltpu.CompilerParams(
        dimension_semantics=("parallel", "parallel", "arbitrary"),
        vmem_limit_bytes=vmem_limit,
    )
    out_shape = jax.ShapeDtypeStruct((b, c, n), jnp.float32)
    out_spec = pl.BlockSpec((1, c, tq), lambda bi, qi, ki: (bi, 0, qi))
    wout_spec = pl.BlockSpec((c, HIDDEN), lambda bi, qi, ki: (0, 0))
    bout_spec = pl.BlockSpec((c, 1), lambda bi, qi, ki: (0, 0))
    stat_scratch = [pltpu.VMEM((HEADS, tq), jnp.float32),   # running max
                    pltpu.VMEM((HEADS, tq), jnp.float32),   # running denom
                    pltpu.VMEM((HIDDEN, tq), jnp.float32)]  # running numerator

    if fuse_qkv:
        kernel = functools.partial(attention_kernel_fused, exp_dtype=exp_dtype)
        y_bcn = pl.pallas_call(
            kernel,
            out_shape=out_shape,
            grid_spec=pltpu.PrefetchScalarGridSpec(
                num_scalar_prefetch=0,
                grid=grid,
                in_specs=[
                    pl.BlockSpec((1, c, tq), lambda bi, qi, ki: (bi, 0, qi)),   # x (q tile)
                    pl.BlockSpec((1, c, tk), lambda bi, qi, ki: (bi, 0, ki)),   # x (kv tile)
                    pl.BlockSpec((3 * HIDDEN, c), lambda bi, qi, ki: (0, 0)),   # W_qkv
                    wout_spec, bout_spec,
                ],
                out_specs=out_spec,
                scratch_shapes=[pltpu.VMEM((HIDDEN, tq), jnp.bfloat16)] + stat_scratch,
            ),
            compiler_params=compiler_params,
        )(x_bcn, x_bcn, wqkv, wout, bout)
    else:
        # Hoist the qkv projection: one XLA matmul, kernel consumes bf16 q/k/v.
        qkv = jnp.einsum('oc,bcn->bon', wqkv, x_bcn)                 # (B, 3H, N) f32
        q, k, v = jnp.split(qkv, 3, axis=1)
        q = (q * SCALE).astype(jnp.bfloat16)
        k = k.astype(jnp.bfloat16)
        v = v.astype(jnp.bfloat16)
        kernel = functools.partial(attention_kernel_hoisted, exp_dtype=exp_dtype)
        y_bcn = pl.pallas_call(
            kernel,
            out_shape=out_shape,
            grid_spec=pltpu.PrefetchScalarGridSpec(
                num_scalar_prefetch=0,
                grid=grid,
                in_specs=[
                    pl.BlockSpec((1, HIDDEN, tq), lambda bi, qi, ki: (bi, 0, qi)),  # q
                    pl.BlockSpec((1, HIDDEN, tk), lambda bi, qi, ki: (bi, 0, ki)),  # k
                    pl.BlockSpec((1, HIDDEN, tk), lambda bi, qi, ki: (bi, 0, ki)),  # v
                    wout_spec, bout_spec,
                ],
                out_specs=out_spec,
                scratch_shapes=stat_scratch,
            ),
            compiler_params=compiler_params,
        )(q, k, v, wout, bout)

    return y_bcn.reshape(b, c, h, w)


# --------------------------------------------------------------------------- #
# Pure-JAX reference (matches the PyTorch forward exactly)
# --------------------------------------------------------------------------- #
def attention_reference(x_nchw, w_qkv, w_out, b_out):
    b, c, h, w = x_nchw.shape
    n = h * w
    x = x_nchw.reshape(b, c, n)                                       # (B, C, N)
    qkv = jnp.einsum('oc,bcn->bon', w_qkv.reshape(3 * HIDDEN, c), x)  # (B, 3H, N)
    q, k, v = jnp.split(qkv, 3, axis=1)
    def to_heads(t):
        return t.reshape(b, HEADS, DIM_HEAD, n)                       # (B, h, d, N)
    q, k, v = map(to_heads, (q, k, v))
    q = q * SCALE
    sim = jnp.einsum('bhdi,bhdj->bhij', q, k)
    sim = sim - jnp.max(sim, axis=-1, keepdims=True)
    attn = jax.nn.softmax(sim, axis=-1)
    out = jnp.einsum('bhij,bhdj->bhid', attn, v)                      # (B, h, N, d)
    out = jnp.transpose(out, (0, 1, 3, 2)).reshape(b, HIDDEN, h, w)   # (B, (h d), H, W)
    y = jnp.einsum('oc,bchw->bohw', w_out.reshape(c, HIDDEN), out)
    return y + b_out.reshape(1, c, 1, 1)


if __name__ == "__main__":
    key = jax.random.PRNGKey(0)
    k_x, k_qkv, k_out, k_b = jax.random.split(key, 4)

    B, C, H, W = 2, 4, 16, 16  # dim=4, heads=4, dim_head=32 -> hidden=128, N=256
    x = jax.random.normal(k_x, (B, C, H, W), dtype=jnp.float32)
    w_qkv = jax.random.normal(k_qkv, (3 * HIDDEN, C, 1, 1), dtype=jnp.float32) * 0.02
    w_out = jax.random.normal(k_out, (C, HIDDEN, 1, 1), dtype=jnp.float32) * 0.02
    b_out = jax.random.normal(k_b, (C,), dtype=jnp.float32) * 0.02

    y_ref = attention_reference(x, w_qkv, w_out, b_out)

    # Fused path (C=4 << HIDDEN -> in-kernel qkv projection).
    y = attention_forward(x, w_qkv, w_out, b_out)
    jax.block_until_ready(y)
    # bf16 Q/K/V/P on the MXU (f32 accumulation), bf16 exp on v6e/v7x, and the
    # approx reciprocal => looser tolerance than pure-f32 (still far tighter
    # than model accuracy).
    np.testing.assert_allclose(np.asarray(y), np.asarray(y_ref), rtol=2e-2, atol=2e-3)

    # Hoisted-projection path (what realistic diffusion channel counts use).
    y2 = attention_forward(x, w_qkv, w_out, b_out, fuse_qkv=False)
    jax.block_until_ready(y2)
    np.testing.assert_allclose(np.asarray(y2), np.asarray(y_ref), rtol=2e-2, atol=2e-3)

    print("KERNEL_OK")
</pallas_src>

<mosaic_0001>
module attributes {stable_mosaic.version = 11 : i64} {
  func.func @attention_kernel_fused(%arg0: i32, %arg1: i32, %arg2: i32, %arg3: memref<1x4x256xf32, #tpu.memory_space<vmem>>, %arg4: memref<1x4x256xf32, #tpu.memory_space<vmem>>, %arg5: memref<384x4xf32, #tpu.memory_space<vmem>>, %arg6: memref<4x128xbf16, #tpu.memory_space<vmem>>, %arg7: memref<4x1xf32, #tpu.memory_space<vmem>>, %arg8: memref<1x4x256xf32, #tpu.memory_space<vmem>>, %arg9: memref<128x256xbf16, #tpu.memory_space<vmem>>, %arg10: memref<4x256xf32, #tpu.memory_space<vmem>>, %arg11: memref<4x256xf32, #tpu.memory_space<vmem>>, %arg12: memref<128x256xf32, #tpu.memory_space<vmem>>) attributes {dimension_semantics = [#tpu.dimension_semantics<parallel>, #tpu.dimension_semantics<parallel>, #tpu.dimension_semantics<arbitrary>], iteration_bounds = array<i64: 2, 1, 1>, scalar_prefetch = 0 : i64, scratch_operands = 4 : i64, tpu.core_type = #tpu.core_type<tc>, window_params = [{transform_indices = @transform_0, window_bounds = array<i64: 1, 4, 256>}, {transform_indices = @transform_1, window_bounds = array<i64: 1, 4, 256>}, {pipeline_mode = #tpu.pipeline_mode<synchronous>, transform_indices = @transform_2, window_bounds = array<i64: 384, 4>}, {pipeline_mode = #tpu.pipeline_mode<synchronous>, transform_indices = @transform_3, window_bounds = array<i64: 4, 128>}, {pipeline_mode = #tpu.pipeline_mode<synchronous>, transform_indices = @transform_4, window_bounds = array<i64: 4, 1>}, {transform_indices = @transform_5, window_bounds = array<i64: 1, 4, 256>}]} {
    %c0_i32 = arith.constant 0 : i32
    %0 = arith.cmpi eq, %arg2, %c0_i32 : i32
    %1 = arith.extui %0 : i1 to i32
    %c0_i32_0 = arith.constant 0 : i32
    %2 = arith.cmpi ne, %1, %c0_i32_0 : i32
    scf.if %2 {
      %c0_44 = arith.constant 0 : index
      %c0_45 = arith.constant 0 : index
      %126 = vector.load %arg5[%c0_44, %c0_45] : memref<384x4xf32, #tpu.memory_space<vmem>>, vector<128x4xf32>
      %c0_46 = arith.constant 0 : index
      %c0_47 = arith.constant 0 : index
      %c0_48 = arith.constant 0 : index
      %127 = vector.load %arg3[%c0_46, %c0_47, %c0_48] : memref<1x4x256xf32, #tpu.memory_space<vmem>>, vector<1x4x256xf32>
      %128 = vector.shape_cast %127 : vector<1x4x256xf32> to vector<4x256xf32>
      %cst_49 = arith.constant dense<0.000000e+00> : vector<128x256xf32>
      %129 = tpu.matmul %126, %128, %cst_49 {dimension_numbers = #tpu.dot_dimension_numbers<[1], [0], [0], [1], [0, 0, 1, 1], [], []>} : vector<128x4xf32>, vector<4x256xf32>, vector<128x256xf32> -> vector<128x256xf32>
      %cst_50 = arith.constant 0.176776692 : f32
      %130 = vector.broadcast %cst_50 : f32 to vector<128x256xf32>
      %131 = arith.mulf %129, %130 : vector<128x256xf32>
      %132 = arith.truncf %131 : vector<128x256xf32> to vector<128x256xbf16>
      %c0_51 = arith.constant 0 : index
      %c0_52 = arith.constant 0 : index
      %133 = vector.load %arg9[%c0_51, %c0_52] : memref<128x256xbf16, #tpu.memory_space<vmem>>, vector<128x256xbf16>
      tpu.vector_store %arg9[%c0_51, %c0_52], %132 {strides = array<i32>} : memref<128x256xbf16, #tpu.memory_space<vmem>>, vector<128x256xbf16>,
      %cst_53 = arith.constant 0xFF800000 : f32
      %134 = vector.broadcast %cst_53 : f32 to vector<4x256xf32>
      %c0_54 = arith.constant 0 : index
      %c0_55 = arith.constant 0 : index
      %135 = vector.load %arg10[%c0_54, %c0_55] : memref<4x256xf32, #tpu.memory_space<vmem>>, vector<4x256xf32>
      tpu.vector_store %arg10[%c0_54, %c0_55], %134 {strides = array<i32>} : memref<4x256xf32, #tpu.memory_space<vmem>>, vector<4x256xf32>,
      %cst_56 = arith.constant 0.000000e+00 : f32
      %136 = vector.broadcast %cst_56 : f32 to vector<4x256xf32>
      %c0_57 = arith.constant 0 : index
      %c0_58 = arith.constant 0 : index
      %137 = vector.load %arg11[%c0_57, %c0_58] : memref<4x256xf32, #tpu.memory_space<vmem>>, vector<4x256xf32>
      tpu.vector_store %arg11[%c0_57, %c0_58], %136 {strides = array<i32>} : memref<4x256xf32, #tpu.memory_space<vmem>>, vector<4x256xf32>,
      %cst_59 = arith.constant 0.000000e+00 : f32
      %138 = vector.broadcast %cst_59 : f32 to vector<128x256xf32>
      %c0_60 = arith.constant 0 : index
      %c0_61 = arith.constant 0 : index
      %139 = vector.load %arg12[%c0_60, %c0_61] : memref<128x256xf32, #tpu.memory_space<vmem>>, vector<128x256xf32>
      tpu.vector_store %arg12[%c0_60, %c0_61], %138 {strides = array<i32>} : memref<128x256xf32, #tpu.memory_space<vmem>>, vector<128x256xf32>,
    } else {
    }
    %c0 = arith.constant 0 : index
    %c0_1 = arith.constant 0 : index
    %c0_2 = arith.constant 0 : index
    %3 = vector.load %arg4[%c0, %c0_1, %c0_2] : memref<1x4x256xf32, #tpu.memory_space<vmem>>, vector<1x4x256xf32>
    %4 = vector.shape_cast %3 : vector<1x4x256xf32> to vector<4x256xf32>
    %c128 = arith.constant 128 : index
    %c0_3 = arith.constant 0 : index
    %5 = vector.load %arg5[%c128, %c0_3] : memref<384x4xf32, #tpu.memory_space<vmem>>, vector<128x4xf32>
    %cst = arith.constant dense<0.000000e+00> : vector<128x256xf32>
    %6 = tpu.matmul %5, %4, %cst {dimension_numbers = #tpu.dot_dimension_numbers<[1], [0], [0], [1], [0, 0, 1, 1], [], []>} : vector<128x4xf32>, vector<4x256xf32>, vector<128x256xf32> -> vector<128x256xf32>
    %7 = arith.truncf %6 : vector<128x256xf32> to vector<128x256xbf16>
    %c256 = arith.constant 256 : index
    %c0_4 = arith.constant 0 : index
    %8 = vector.load %arg5[%c256, %c0_4] : memref<384x4xf32, #tpu.memory_space<vmem>>, vector<128x4xf32>
    %cst_5 = arith.constant dense<0.000000e+00> : vector<128x256xf32>
    %9 = tpu.matmul %8, %4, %cst_5 {dimension_numbers = #tpu.dot_dimension_numbers<[1], [0], [0], [1], [0, 0, 1, 1], [], []>} : vector<128x4xf32>, vector<4x256xf32>, vector<128x256xf32> -> vector<128x256xf32>
    %10 = arith.truncf %9 : vector<128x256xf32> to vector<128x256xbf16>
    %c0_6 = arith.constant 0 : index
    %c0_7 = arith.constant 0 : index
    %11 = vector.load %arg9[%c0_6, %c0_7] : memref<128x256xbf16, #tpu.memory_space<vmem>>, vector<128x256xbf16>
    %cst_8 = arith.constant 1.000000e+00 : bf16
    %12 = vector.broadcast %cst_8 : bf16 to vector<8x256xbf16>
    %c0_9 = arith.constant 0 : index
    %c0_10 = arith.constant 0 : index
    %13 = vector.load %arg10[%c0_9, %c0_10] : memref<4x256xf32, #tpu.memory_space<vmem>>, vector<4x256xf32>
    %c0_11 = arith.constant 0 : index
    %c0_12 = arith.constant 0 : index
    %14 = vector.load %arg11[%c0_11, %c0_12] : memref<4x256xf32, #tpu.memory_space<vmem>>, vector<4x256xf32>
    %15 = vector.extract_strided_slice %11 {offsets = [0, 0], sizes = [32, 256], strides = [1, 1]} : vector<128x256xbf16> to vector<32x256xbf16>
    %16 = vector.extract_strided_slice %7 {offsets = [0, 0], sizes = [32, 256], strides = [1, 1]} : vector<128x256xbf16> to vector<32x256xbf16>
    %cst_13 = arith.constant dense<0.000000e+00> : vector<256x256xf32>
    %17 = tpu.matmul %16, %15, %cst_13 {dimension_numbers = #tpu.dot_dimension_numbers<[0], [0], [1], [1], [0, 1, 1, 1], [], []>} : vector<32x256xbf16>, vector<32x256xbf16>, vector<256x256xf32> -> vector<256x256xf32>
    %18 = vector.extract_strided_slice %13 {offsets = [0, 0], sizes = [1, 256], strides = [1, 1]} : vector<4x256xf32> to vector<1x256xf32>
    %cst_14 = arith.constant dense<0xFF800000> : vector<256xf32>
    %19 = vector.multi_reduction <maximumf>, %17, %cst_14 [0] : vector<256x256xf32> to vector<256xf32>
    %20 = vector.shape_cast %19 : vector<256xf32> to vector<1x256xf32>
    %21 = arith.maximumf %18, %20 : vector<1x256xf32>
    %22 = arith.subf %18, %21 : vector<1x256xf32>
    %23 = math.exp %22 : vector<1x256xf32>
    %24 = vector.broadcast %21 : vector<1x256xf32> to vector<256x256xf32>
    %25 = arith.subf %17, %24 : vector<256x256xf32>
    %26 = math.exp %25 : vector<256x256xf32>
    %27 = arith.truncf %26 : vector<256x256xf32> to vector<256x256xbf16>
    %28 = vector.extract_strided_slice %10 {offsets = [0, 0], sizes = [32, 256], strides = [1, 1]} : vector<128x256xbf16> to vector<32x256xbf16>
    %29 = tpu.concatenate %28, %12 in 0 : vector<32x256xbf16>, vector<8x256xbf16> -> vector<40x256xbf16>
    %cst_15 = arith.constant dense<0.000000e+00> : vector<40x256xf32>
    %30 = tpu.matmul %29, %27, %cst_15 {dimension_numbers = #tpu.dot_dimension_numbers<[1], [0], [0], [1], [0, 0, 1, 1], [], []>} : vector<40x256xbf16>, vector<256x256xbf16>, vector<40x256xf32> -> vector<40x256xf32>
    %c0_16 = arith.constant 0 : index
    %c0_17 = arith.constant 0 : index
    %31 = vector.load %arg12[%c0_16, %c0_17] : memref<128x256xf32, #tpu.memory_space<vmem>>, vector<32x256xf32>
    %32 = vector.broadcast %23 : vector<1x256xf32> to vector<32x256xf32>
    %33 = arith.mulf %32, %31 : vector<32x256xf32>
    %34 = vector.extract_strided_slice %30 {offsets = [0, 0], sizes = [32, 256], strides = [1, 1]} : vector<40x256xf32> to vector<32x256xf32>
    %35 = arith.addf %33, %34 : vector<32x256xf32>
    %c0_18 = arith.constant 0 : index
    %c0_19 = arith.constant 0 : index
    %36 = vector.load %arg12[%c0_18, %c0_19] : memref<128x256xf32, #tpu.memory_space<vmem>>, vector<32x256xf32>
    tpu.vector_store %arg12[%c0_18, %c0_19], %35 {strides = array<i32>} : memref<128x256xf32, #tpu.memory_space<vmem>>, vector<32x256xf32>,
    %37 = vector.extract_strided_slice %14 {offsets = [0, 0], sizes = [1, 256], strides = [1, 1]} : vector<4x256xf32> to vector<1x256xf32>
    %38 = arith.mulf %23, %37 : vector<1x256xf32>
    %39 = vector.extract_strided_slice %30 {offsets = [32, 0], sizes = [1, 256], strides = [1, 1]} : vector<40x256xf32> to vector<1x256xf32>
    %40 = arith.addf %38, %39 : vector<1x256xf32>
    %41 = vector.extract_strided_slice %11 {offsets = [32, 0], sizes = [32, 256], strides = [1, 1]} : vector<128x256xbf16> to vector<32x256xbf16>
    %42 = vector.extract_strided_slice %7 {offsets = [32, 0], sizes = [32, 256], strides = [1, 1]} : vector<128x256xbf16> to vector<32x256xbf16>
    %cst_20 = arith.constant dense<0.000000e+00> : vector<256x256xf32>
    %43 = tpu.matmul %42, %41, %cst_20 {dimension_numbers = #tpu.dot_dimension_numbers<[0], [0], [1], [1], [0, 1, 1, 1], [], []>} : vector<32x256xbf16>, vector<32x256xbf16>, vector<256x256xf32> -> vector<256x256xf32>
    %44 = vector.extract_strided_slice %13 {offsets = [1, 0], sizes = [1, 256], strides = [1, 1]} : vector<4x256xf32> to vector<1x256xf32>
    %cst_21 = arith.constant dense<0xFF800000> : vector<256xf32>
    %45 = vector.multi_reduction <maximumf>, %43, %cst_21 [0] : vector<256x256xf32> to vector<256xf32>
    %46 = vector.shape_cast %45 : vector<256xf32> to vector<1x256xf32>
    %47 = arith.maximumf %44, %46 : vector<1x256xf32>
    %48 = arith.subf %44, %47 : vector<1x256xf32>
    %49 = math.exp %48 : vector<1x256xf32>
    %50 = vector.broadcast %47 : vector<1x256xf32> to vector<256x256xf32>
    %51 = arith.subf %43, %50 : vector<256x256xf32>
    %52 = math.exp %51 : vector<256x256xf32>
    %53 = arith.truncf %52 : vector<256x256xf32> to vector<256x256xbf16>
    %54 = vector.extract_strided_slice %10 {offsets = [32, 0], sizes = [32, 256], strides = [1, 1]} : vector<128x256xbf16> to vector<32x256xbf16>
    %55 = tpu.concatenate %54, %12 in 0 : vector<32x256xbf16>, vector<8x256xbf16> -> vector<40x256xbf16>
    %cst_22 = arith.constant dense<0.000000e+00> : vector<40x256xf32>
    %56 = tpu.matmul %55, %53, %cst_22 {dimension_numbers = #tpu.dot_dimension_numbers<[1], [0], [0], [1], [0, 0, 1, 1], [], []>} : vector<40x256xbf16>, vector<256x256xbf16>, vector<40x256xf32> -> vector<40x256xf32>
    %c32 = arith.constant 32 : index
    %c0_23 = arith.constant 0 : index
    %57 = vector.load %arg12[%c32, %c0_23] : memref<128x256xf32, #tpu.memory_space<vmem>>, vector<32x256xf32>
    %58 = vector.broadcast %49 : vector<1x256xf32> to vector<32x256xf32>
    %59 = arith.mulf %58, %57 : vector<32x256xf32>
    %60 = vector.extract_strided_slice %56 {offsets = [0, 0], sizes = [32, 256], strides = [1, 1]} : vector<40x256xf32> to vector<32x256xf32>
    %61 = arith.addf %59, %60 : vector<32x256xf32>
    %c32_24 = arith.constant 32 : index
    %c0_25 = arith.constant 0 : index
    %62 = vector.load %arg12[%c32_24, %c0_25] : memref<128x256xf32, #tpu.memory_space<vmem>>, vector<32x256xf32>
    tpu.vector_store %arg12[%c32_24, %c0_25], %61 {strides = array<i32>} : memref<128x256xf32, #tpu.memory_space<vmem>>, vector<32x256xf32>,
    %63 = vector.extract_strided_slice %14 {offsets = [1, 0], sizes = [1, 256], strides = [1, 1]} : vector<4x256xf32> to vector<1x256xf32>
    %64 = arith.mulf %49, %63 : vector<1x256xf32>
    %65 = vector.extract_strided_slice %56 {offsets = [32, 0], sizes = [1, 256], strides = [1, 1]} : vector<40x256xf32> to vector<1x256xf32>
    %66 = arith.addf %64, %65 : vector<1x256xf32>
    %67 = vector.extract_strided_slice %11 {offsets = [64, 0], sizes = [32, 256], strides = [1, 1]} : vector<128x256xbf16> to vector<32x256xbf16>
    %68 = vector.extract_strided_slice %7 {offsets = [64, 0], sizes = [32, 256], strides = [1, 1]} : vector<128x256xbf16> to vector<32x256xbf16>
    %cst_26 = arith.constant dense<0.000000e+00> : vector<256x256xf32>
    %69 = tpu.matmul %68, %67, %cst_26 {dimension_numbers = #tpu.dot_dimension_numbers<[0], [0], [1], [1], [0, 1, 1, 1], [], []>} : vector<32x256xbf16>, vector<32x256xbf16>, vector<256x256xf32> -> vector<256x256xf32>
    %70 = vector.extract_strided_slice %13 {offsets = [2, 0], sizes = [1, 256], strides = [1, 1]} : vector<4x256xf32> to vector<1x256xf32>
    %cst_27 = arith.constant dense<0xFF800000> : vector<256xf32>
    %71 = vector.multi_reduction <maximumf>, %69, %cst_27 [0] : vector<256x256xf32> to vector<256xf32>
    %72 = vector.shape_cast %71 : vector<256xf32> to vector<1x256xf32>
    %73 = arith.maximumf %70, %72 : vector<1x256xf32>
    %74 = arith.subf %70, %73 : vector<1x256xf32>
    %75 = math.exp %74 : vector<1x256xf32>
    %76 = vector.broadcast %73 : vector<1x256xf32> to vector<256x256xf32>
    %77 = arith.subf %69, %76 : vector<256x256xf32>
    %78 = math.exp %77 : vector<256x256xf32>
    %79 = arith.truncf %78 : vector<256x256xf32> to vector<256x256xbf16>
    %80 = vector.extract_strided_slice %10 {offsets = [64, 0], sizes = [32, 256], strides = [1, 1]} : vector<128x256xbf16> to vector<32x256xbf16>
    %81 = tpu.concatenate %80, %12 in 0 : vector<32x256xbf16>, vector<8x256xbf16> -> vector<40x256xbf16>
    %cst_28 = arith.constant dense<0.000000e+00> : vector<40x256xf32>
    %82 = tpu.matmul %81, %79, %cst_28 {dimension_numbers = #tpu.dot_dimension_numbers<[1], [0], [0], [1], [0, 0, 1, 1], [], []>} : vector<40x256xbf16>, vector<256x256xbf16>, vector<40x256xf32> -> vector<40x256xf32>
    %c64 = arith.constant 64 : index
    %c0_29 = arith.constant 0 : index
    %83 = vector.load %arg12[%c64, %c0_29] : memref<128x256xf32, #tpu.memory_space<vmem>>, vector<32x256xf32>
    %84 = vector.broadcast %75 : vector<1x256xf32> to vector<32x256xf32>
    %85 = arith.mulf %84, %83 : vector<32x256xf32>
    %86 = vector.extract_strided_slice %82 {offsets = [0, 0], sizes = [32, 256], strides = [1, 1]} : vector<40x256xf32> to vector<32x256xf32>
    %87 = arith.addf %85, %86 : vector<32x256xf32>
    %c64_30 = arith.constant 64 : index
    %c0_31 = arith.constant 0 : index
    %88 = vector.load %arg12[%c64_30, %c0_31] : memref<128x256xf32, #tpu.memory_space<vmem>>, vector<32x256xf32>
    tpu.vector_store %arg12[%c64_30, %c0_31], %87 {strides = array<i32>} : memref<128x256xf32, #tpu.memory_space<vmem>>, vector<32x256xf32>,
    %89 = vector.extract_strided_slice %14 {offsets = [2, 0], sizes = [1, 256], strides = [1, 1]} : vector<4x256xf32> to vector<1x256xf32>
    %90 = arith.mulf %75, %89 : vector<1x256xf32>
    %91 = vector.extract_strided_slice %82 {offsets = [32, 0], sizes = [1, 256], strides = [1, 1]} : vector<40x256xf32> to vector<1x256xf32>
    %92 = arith.addf %90, %91 : vector<1x256xf32>
    %93 = vector.extract_strided_slice %11 {offsets = [96, 0], sizes = [32, 256], strides = [1, 1]} : vector<128x256xbf16> to vector<32x256xbf16>
    %94 = vector.extract_strided_slice %7 {offsets = [96, 0], sizes = [32, 256], strides = [1, 1]} : vector<128x256xbf16> to vector<32x256xbf16>
    %cst_32 = arith.constant dense<0.000000e+00> : vector<256x256xf32>
    %95 = tpu.matmul %94, %93, %cst_32 {dimension_numbers = #tpu.dot_dimension_numbers<[0], [0], [1], [1], [0, 1, 1, 1], [], []>} : vector<32x256xbf16>, vector<32x256xbf16>, vector<256x256xf32> -> vector<256x256xf32>
    %96 = vector.extract_strided_slice %13 {offsets = [3, 0], sizes = [1, 256], strides = [1, 1]} : vector<4x256xf32> to vector<1x256xf32>
    %cst_33 = arith.constant dense<0xFF800000> : vector<256xf32>
    %97 = vector.multi_reduction <maximumf>, %95, %cst_33 [0] : vector<256x256xf32> to vector<256xf32>
    %98 = vector.shape_cast %97 : vector<256xf32> to vector<1x256xf32>
    %99 = arith.maximumf %96, %98 : vector<1x256xf32>
    %100 = arith.subf %96, %99 : vector<1x256xf32>
    %101 = math.exp %100 : vector<1x256xf32>
    %102 = vector.broadcast %99 : vector<1x256xf32> to vector<256x256xf32>
    %103 = arith.subf %95, %102 : vector<256x256xf32>
    %104 = math.exp %103 : vector<256x256xf32>
    %105 = arith.truncf %104 : vector<256x256xf32> to vector<256x256xbf16>
    %106 = vector.extract_strided_slice %10 {offsets = [96, 0], sizes = [32, 256], strides = [1, 1]} : vector<128x256xbf16> to vector<32x256xbf16>
    %107 = tpu.concatenate %106, %12 in 0 : vector<32x256xbf16>, vector<8x256xbf16> -> vector<40x256xbf16>
    %cst_34 = arith.constant dense<0.000000e+00> : vector<40x256xf32>
    %108 = tpu.matmul %107, %105, %cst_34 {dimension_numbers = #tpu.dot_dimension_numbers<[1], [0], [0], [1], [0, 0, 1, 1], [], []>} : vector<40x256xbf16>, vector<256x256xbf16>, vector<40x256xf32> -> vector<40x256xf32>
    %c96 = arith.constant 96 : index
    %c0_35 = arith.constant 0 : index
    %109 = vector.load %arg12[%c96, %c0_35] : memref<128x256xf32, #tpu.memory_space<vmem>>, vector<32x256xf32>
    %110 = vector.broadcast %101 : vector<1x256xf32> to vector<32x256xf32>
    %111 = arith.mulf %110, %109 : vector<32x256xf32>
    %112 = vector.extract_strided_slice %108 {offsets = [0, 0], sizes = [32, 256], strides = [1, 1]} : vector<40x256xf32> to vector<32x256xf32>
    %113 = arith.addf %111, %112 : vector<32x256xf32>
    %c96_36 = arith.constant 96 : index
    %c0_37 = arith.constant 0 : index
    %114 = vector.load %arg12[%c96_36, %c0_37] : memref<128x256xf32, #tpu.memory_space<vmem>>, vector<32x256xf32>
    tpu.vector_store %arg12[%c96_36, %c0_37], %113 {strides = array<i32>} : memref<128x256xf32, #tpu.memory_space<vmem>>, vector<32x256xf32>,
    %115 = vector.extract_strided_slice %14 {offsets = [3, 0], sizes = [1, 256], strides = [1, 1]} : vector<4x256xf32> to vector<1x256xf32>
    %116 = arith.mulf %101, %115 : vector<1x256xf32>
    %117 = vector.extract_strided_slice %108 {offsets = [32, 0], sizes = [1, 256], strides = [1, 1]} : vector<40x256xf32> to vector<1x256xf32>
    %118 = arith.addf %116, %117 : vector<1x256xf32>
    %119 = tpu.concatenate %21, %47, %73, %99 in 0 : vector<1x256xf32>, vector<1x256xf32>, vector<1x256xf32>, vector<1x256xf32> -> vector<4x256xf32>
    %c0_38 = arith.constant 0 : index
    %c0_39 = arith.constant 0 : index
    %120 = vector.load %arg10[%c0_38, %c0_39] : memref<4x256xf32, #tpu.memory_space<vmem>>, vector<4x256xf32>
    tpu.vector_store %arg10[%c0_38, %c0_39], %119 {strides = array<i32>} : memref<4x256xf32, #tpu.memory_space<vmem>>, vector<4x256xf32>,
    %121 = tpu.concatenate %40, %66, %92, %118 in 0 : vector<1x256xf32>, vector<1x256xf32>, vector<1x256xf32>, vector<1x256xf32> -> vector<4x256xf32>
    %c0_40 = arith.constant 0 : index
    %c0_41 = arith.constant 0 : index
    %122 = vector.load %arg11[%c0_40, %c0_41] : memref<4x256xf32, #tpu.memory_space<vmem>>, vector<4x256xf32>
    tpu.vector_store %arg11[%c0_40, %c0_41], %121 {strides = array<i32>} : memref<4x256xf32, #tpu.memory_space<vmem>>, vector<4x256xf32>,
    %c0_i32_42 = arith.constant 0 : i32
    %123 = arith.cmpi eq, %arg2, %c0_i32_42 : i32
    %124 = arith.extui %123 : i1 to i32
    %c0_i32_43 = arith.constant 0 : i32
    %125 = arith.cmpi ne, %124, %c0_i32_43 : i32
    scf.if %125 {
      %c0_44 = arith.constant 0 : index
      %c0_45 = arith.constant 0 : index
      %126 = vector.load %arg11[%c0_44, %c0_45] : memref<4x256xf32, #tpu.memory_space<vmem>>, vector<4x256xf32>
      %127 = tpu.reciprocal %126 {approx = true} : vector<4x256xf32> -> vector<4x256xf32>
      %c0_46 = arith.constant 0 : index
      %c0_47 = arith.constant 0 : index
      %128 = vector.load %arg12[%c0_46, %c0_47] : memref<128x256xf32, #tpu.memory_space<vmem>>, vector<32x256xf32>
      %129 = vector.extract_strided_slice %127 {offsets = [0, 0], sizes = [1, 256], strides = [1, 1]} : vector<4x256xf32> to vector<1x256xf32>
      %130 = vector.broadcast %129 : vector<1x256xf32> to vector<32x256xf32>
      %131 = arith.mulf %128, %130 : vector<32x256xf32>
      %c32_48 = arith.constant 32 : index
      %c0_49 = arith.constant 0 : index
      %132 = vector.load %arg12[%c32_48, %c0_49] : memref<128x256xf32, #tpu.memory_space<vmem>>, vector<32x256xf32>
      %133 = vector.extract_strided_slice %127 {offsets = [1, 0], sizes = [1, 256], strides = [1, 1]} : vector<4x256xf32> to vector<1x256xf32>
      %134 = vector.broadcast %133 : vector<1x256xf32> to vector<32x256xf32>
      %135 = arith.mulf %132, %134 : vector<32x256xf32>
      %c64_50 = arith.constant 64 : index
      %c0_51 = arith.constant 0 : index
      %136 = vector.load %arg12[%c64_50, %c0_51] : memref<128x256xf32, #tpu.memory_space<vmem>>, vector<32x256xf32>
      %137 = vector.extract_strided_slice %127 {offsets = [2, 0], sizes = [1, 256], strides = [1, 1]} : vector<4x256xf32> to vector<1x256xf32>
      %138 = vector.broadcast %137 : vector<1x256xf32> to vector<32x256xf32>
      %139 = arith.mulf %136, %138 : vector<32x256xf32>
      %c96_52 = arith.constant 96 : index
      %c0_53 = arith.constant 0 : index
      %140 = vector.load %arg12[%c96_52, %c0_53] : memref<128x256xf32, #tpu.memory_space<vmem>>, vector<32x256xf32>
      %141 = vector.extract_strided_slice %127 {offsets = [3, 0], sizes = [1, 256], strides = [1, 1]} : vector<4x256xf32> to vector<1x256xf32>
      %142 = vector.broadcast %141 : vector<1x256xf32> to vector<32x256xf32>
      %143 = arith.mulf %140, %142 : vector<32x256xf32>
      %144 = tpu.concatenate %131, %135, %139, %143 in 0 : vector<32x256xf32>, vector<32x256xf32>, vector<32x256xf32>, vector<32x256xf32> -> vector<128x256xf32>
      %145 = arith.truncf %144 : vector<128x256xf32> to vector<128x256xbf16>
      %c0_54 = arith.constant 0 : index
      %c0_55 = arith.constant 0 : index
      %146 = vector.load %arg6[%c0_54, %c0_55] : memref<4x128xbf16, #tpu.memory_space<vmem>>, vector<4x128xbf16>
      %cst_56 = arith.constant dense<0.000000e+00> : vector<4x256xf32>
      %147 = tpu.matmul %146, %145, %cst_56 {dimension_numbers = #tpu.dot_dimension_numbers<[1], [0], [0], [1], [0, 0, 1, 1], [], []>} : vector<4x128xbf16>, vector<128x256xbf16>, vector<4x256xf32> -> vector<4x256xf32>
      %c0_57 = arith.constant 0 : index
      %c0_58 = arith.constant 0 : index
      %148 = vector.load %arg7[%c0_57, %c0_58] : memref<4x1xf32, #tpu.memory_space<vmem>>, vector<4x1xf32>
      %149 = vector.broadcast %148 : vector<4x1xf32> to vector<4x256xf32>
      %150 = arith.addf %147, %149 : vector<4x256xf32>
      %c0_59 = arith.constant 0 : index
      %c0_60 = arith.constant 0 : index
      %c0_61 = arith.constant 0 : index
      %151 = vector.load %arg8[%c0_59, %c0_60, %c0_61] : memref<1x4x256xf32, #tpu.memory_space<vmem>>, vector<1x4x256xf32>
      %152 = vector.shape_cast %151 : vector<1x4x256xf32> to vector<4x256xf32>
      %153 = vector.shape_cast %150 : vector<4x256xf32> to vector<1x4x256xf32>
      tpu.vector_store %arg8[%c0_59, %c0_60, %c0_61], %153 {strides = array<i32>} : memref<1x4x256xf32, #tpu.memory_space<vmem>>, vector<1x4x256xf32>,
    } else {
    }
    return
  }
  func.func @transform_0(%arg0: i32, %arg1: i32, %arg2: i32) -> (i32, i32, i32) {
    %c0_i32 = arith.constant 0 : i32
    %c0_i32_0 = arith.constant 0 : i32
    return %arg0, %c0_i32, %arg1 : i32, i32, i32
  }
  func.func @transform_1(%arg0: i32, %arg1: i32, %arg2: i32) -> (i32, i32, i32) {
    %c0_i32 = arith.constant 0 : i32
    %c0_i32_0 = arith.constant 0 : i32
    return %arg0, %c0_i32, %arg2 : i32, i32, i32
  }
  func.func @transform_2(%arg0: i32, %arg1: i32, %arg2: i32) -> (i32, i32) {
    %c0_i32 = arith.constant 0 : i32
    %c0_i32_0 = arith.constant 0 : i32
    %c0_i32_1 = arith.constant 0 : i32
    return %c0_i32, %c0_i32_0 : i32, i32
  }
  func.func @transform_3(%arg0: i32, %arg1: i32, %arg2: i32) -> (i32, i32) {
    %c0_i32 = arith.constant 0 : i32
    %c0_i32_0 = arith.constant 0 : i32
    %c0_i32_1 = arith.constant 0 : i32
    return %c0_i32, %c0_i32_0 : i32, i32
  }
  func.func @transform_4(%arg0: i32, %arg1: i32, %arg2: i32) -> (i32, i32) {
    %c0_i32 = arith.constant 0 : i32
    %c0_i32_0 = arith.constant 0 : i32
    %c0_i32_1 = arith.constant 0 : i32
    return %c0_i32, %c0_i32_0 : i32, i32
  }
  func.func @transform_5(%arg0: i32, %arg1: i32, %arg2: i32) -> (i32, i32, i32) {
    %c0_i32 = arith.constant 0 : i32
    %c0_i32_0 = arith.constant 0 : i32
    return %arg0, %c0_i32, %arg1 : i32, i32, i32
  }
}

</mosaic_0001>

<bundles_post_ra>
// kernel: tpu_custom_call.1
= control target key start
LH: loop header
LB: loop body
LE: loop exit
PB: predicated region body
PF: predicated region fallthrough
CT: control target
= control target key end

     0   :  { %10 = vsyncpa [#allocation7], 0  ;;  %s7673_s0 = inlined_call_operand.vmem [shape: f32[2,4,256], index: 0, kind: input, shape index: {}]   ;;  %s7674_s1 = inlined_call_operand.vmem [shape: f32[2,4,256], index: 1, kind: input, shape index: {}]   ;;  %s7675_s2 = inlined_call_operand.vmem [shape: f32[384,4], index: 2, kind: input, shape index: {}]   ;;  %s7676_s3 = inlined_call_operand.vmem [shape: bf16[4,128], index: 3, kind: input, shape index: {}]   ;;  %s7677_s4 = inlined_call_operand.vmem [shape: f32[4,1], index: 4, kind: input, shape index: {}]   ;;  %s7678_s5 = inlined_call_operand.hbm [shape: f32[2,4,256], index: 5, kind: output, shape index: {}]  }
   0x1   :  { %12 = vsyncpa [#allocation7 + $0x1], 0  ;;  %s5452_s18 = smov 0   ;;  %s5454_s19 = smov 0  }
   0x2   :  { %s5456_s20 = smov 0   ;;  %s5458_s21 = smov 0  }
   0x3   :  { %s5460_s22 = smov 0   ;;  %s5462_s23 = smov 0  }
   0x4 LB: > { %s4429_s24 = sadd.s32 4294967295, %s5418_s23   ;;  %s4430_s25 = sadd.s32 4294967294, %s5418_s23   ;;  %s5418_s23 = sphi %s5462_s23, %s18_s23   ;;  %s5414_s22 = sphi %s5460_s22, %s8066_s22   ;;  %s5410_s21 = sphi %s5458_s21, %s8065_s21   ;;  %s5406_s20 = sphi %s5456_s20, %s8064_s20   ;;  %s5402_s19 = sphi %s5454_s19, %s8063_s19   ;;  %s5398_s18 = sphi %s5452_s18, %s8062_s18  }
   0x5   : > { %s37_s26 = sadd.s32 1, %s5414_s22  ;;  %s165_s27 = sadd.s32 1, %s5406_s20 }
   0x6   : > { %p39_p0 = scmp.ge.s32.totalorder %s37_s26, 2  ;;  %p175_p1 = scmp.ne.s32.totalorder %s5406_s20, %s5402_s19 }
   0x7   : > { %p176_p2 = scmp.eq.s32.totalorder %s4429_s24, 1  ;;  %p181_p3 = scmp.ne.s32.totalorder %s5402_s19, %s5398_s18 }
   0x8   : > { %s8068_s26 = smov (%p39_p0, %s37_s26), 0  ;;  %p182_p5 = scmp.eq.s32.totalorder %s4430_s25, 1 }
   0x9   : > { %p5492_p4 = por %p176_p2, %p175_p1  ;;  %s160_s29 = ssub.s32 %s5414_s22, %s8068_s26 }
   0xa   : > { %p4433_p6 = scmp.ge.s32.totalorder %s5418_s23, 1  ;;  %p163_p7 = scmp.eq.s32.totalorder %s160_s29, 0 }
   0xb   : > { %p5499_p8 = por %p182_p5, %p181_p3  ;;  %p235_p9 = scmp.lt.s32.totalorder %s5418_s23, 3 }
   0xc   : > { %s5505_s6 = scalar_select %p163_p7, %s5406_s20, %s165_s27  }
   0xd   : > { %p236_p10 = pnand %p4433_p6, %p235_p9 }
   0xf   : > { %239 = sbr.rel (%p236_p10) target bundleno = 2991 (0xbaf), region = 40 }
  0x14   : > { %p277_p11 = scmp.lt.s32.totalorder %s5410_s21, 1  ;;  %vm373_vm0 = vcmask 1043456   ;;  %v303_v2 = vld [vmem:[%s7675_s2] sm:$0xff]  ;;  %vm324_vm1 = vcmask 31744   ;;  %v312_v3 = vld [vmem:[%s7675_s2 + $0x48] sm:$0xff]  ;;  %v313_v7 = vld [vmem:[%s7675_s2 + $0x50] sm:$0xff] }
  0x15   : > { %v304_v6 = vld [vmem:[%s7675_s2 + $0x8] sm:$0xff]  ;;  %v305_v8 = vld [vmem:[%s7675_s2 + $0x10] sm:$0xff]  ;;  %v314_v9 = vld [vmem:[%s7675_s2 + $0x58] sm:$0xff]  ;;  %vm1126_vm2 = vcmask 261120   ;;  %vm4117_vm3 = vcmask 1040384   ;;  %vm4120_vm4 = vcmask 1041408  }
  0x16   : > { %s278_s7 = scalar_select %p277_p11, %s5410_s21, 1  ;;  %v306_v12 = vld [vmem:[%s7675_s2 + $0x18] sm:$0xff]  ;;  %v315_v13 = vld [vmem:[%s7675_s2 + $0x60] sm:$0xff]  ;;  %v316_v15 = vld [vmem:[%s7675_s2 + $0x68] sm:$0xff]  ;;  %vm4123_vm5 = vcmask 1042432  }
  0x17   : > { %v307_v14 = vld [vmem:[%s7675_s2 + $0x20] sm:$0xff]  ;;  %v308_v16 = vld [vmem:[%s7675_s2 + $0x28] sm:$0xff]  ;;  %v317_v17 = vld [vmem:[%s7675_s2 + $0x70] sm:$0xff]  ;;  %s273_s10 = sand.u32 1, %s5402_s19   ;;  %s4756_s12 = sshll.u32 %s5410_s21, 3 }
  0x18   : > { %s4738_s8 = sshll.u32 %s278_s7, 3  ;;  %v309_v18 = vld [vmem:[%s7675_s2 + $0x30] sm:$0xff]  ;;  %v318_v19 = vld [vmem:[%s7675_s2 + $0x78] sm:$0xff]  ;;  %v607_v21 = vld [vmem:[%s7675_s2 + $0x80] sm:$0xff]  ;;  %s4327_s15 = scalar_lea.hbm %s7678_s5, %s4756_s12 }
  0x19   : > { %s284_s11 = scalar_lea.vmem %s7673_s0, %s4738_s8  ;;  %s294_s14 = scalar_lea.vmem %s7674_s1, %s4738_s8  ;;  %v310_v20 = vld [vmem:[%s7675_s2 + $0x38] sm:$0xff]  ;;  %v311_v22 = vld [vmem:[%s7675_s2 + $0x40] sm:$0xff]  ;;  %v608_v23 = vld [vmem:[%s7675_s2 + $0x88] sm:$0xff] }
  0x1a   : > { %v319_v0 = vld [vmem:[%s284_s11] sm:$0xff]  ;;  %v609_v24 = vld [vmem:[%s7675_s2 + $0x90] sm:$0xff]  ;;  %v610_v25 = vld [vmem:[%s7675_s2 + $0x98] sm:$0xff]  ;;  %s4434_s11 = sshll.u32 %s273_s10, 3  ;;  %s4331_s24 = sshll.u32 %s4327_s15, 4  ;;  %s4332_s24 = int_to_ptr.hbm [resolvable:$true] %s4331_s24 }
  0x1b   : > { %321 = vst [vmem:[#allocation1] ss:$2 sm:$0xff] %v319_v0  ;;  %v606_v1 = vld [vmem:[%s294_s14] sm:$0xff]  ;;  %s275_s16 = scalar_lea.vmem [#allocation6], %s4434_s11  ;;  %s4314_s21 = scalar_lea.sflag [#allocation7], %s273_s10 }
  0x1c   : > { %s4329_s17 = sshll.u32 %s275_s16, 4  ;;  %s5354_s25 = sshra.s32 %s4332_s24, 4  ;;  %s4330_s17 = int_to_ptr.vmem [resolvable:$true] %s4329_s17  ;;  %s5355_s25 = int_to_ptr.hbm [resolvable:$true] %s5354_s25 }
  0x1d   : > { %s5356_s27 = scalar_lea.hbm %s5355_s25, 8  ;;  %s5360_s8 = scalar_lea.hbm %s7678_s5, 16 }
  0x1e   : > { %p5357_p12 = scmp.ne.s32.totalorder %s5355_s25, %s5356_s27  ;;  %p5361_p1 = scmp.lt.s32.totalorder %s5355_s25, %s7678_s5 }
  0x1f   : > { %p5362_p2 = scmp.lt.s32.totalorder %s5360_s8, %s5356_s27 }
  0x20   : > { %p5358_p13 = pnand %p5357_p12, %p5492_p4 }
  0x21   : > { %p5363_p3 = por %p5362_p2, %p5361_p1 }
  0x22   : > { %v322_v4 = vld.sshfl [vmem:[#allocation1] sm:$0xff pattern:$0x75316420]  ;;  %v323_v5 = vld.sshfl [vmem:[#allocation1 + $0x8] sm:$0xff pattern:$0x75316420]  ;;  %p5359_p0 = pneg %p5358_p13 }
  0x23   : > { %4439 = vmatpush.msk.msra.mxu0 %vm373_vm0, %v322_v4  ;;  %4757 = vmatpush.msk.msra.mxu2 %vm373_vm0, %v322_v4  ;;  %624 = vst [vmem:[#allocation1] ss:$2 sm:$0xff] %v606_v1 }
  0x24   : > { %4456 = vmatpush.msk.msra.mxu1 %vm373_vm0, %v323_v5  ;;  %4758 = vmatpush.msk.msra.mxu3 %vm373_vm0, %v323_v5  ;;  %p5364_p5 = pnand %p5363_p3, %p5359_p0 }
  0x25   : > { %4440 = vmatmul.msk.f32.vlgmr.msra.gmra.mxu0 %vm324_vm1, %v303_v2  ;;  %4449 = vmatmul.msk.f32.vlgmr.msra.gmra.mxu2 %vm324_vm1, %v312_v3 }
  0x26   : > { %4457 = vmatmul.msk.f32.vlgmr.msra.gmra.mxu1 %vm324_vm1, %v303_v2  ;;  %4466 = vmatmul.msk.f32.vlgmr.msra.gmra.mxu3 %vm324_vm1, %v312_v3 }
  0x2a   : > { %v625_v10 = vld.sshfl [vmem:[#allocation1] sm:$0xff pattern:$0x75316420]  ;;  %v626_v11 = vld.sshfl [vmem:[#allocation1 + $0x8] sm:$0xff pattern:$0x75316420] }
  0x2b   : > { %4473 = vmatpush.msk.msrb.mxu2 %vm373_vm0, %v625_v10  ;;  %4490 = vmatpush.msk.msrb.mxu3 %vm373_vm0, %v626_v11  ;;  %843 = vst [vmem:[#allocation1] ss:$2 sm:$0xff] %v606_v1 }
  0x2d   : > { %4441 = vmatmul.msk.f32.gmra.mxu0 %vm324_vm1, %v304_v6  ;;  %4450 = vmatmul.msk.f32.gmra.mxu2 %vm324_vm1, %v313_v7 }
  0x2e   : > { %4458 = vmatmul.msk.f32.gmra.mxu1 %vm324_vm1, %v304_v6  ;;  %4467 = vmatmul.msk.f32.gmra.mxu3 %vm324_vm1, %v313_v7 }
  0x35   : > { %4442 = vmatmul.msk.f32.gmra.mxu0 %vm324_vm1, %v305_v8  ;;  %4451 = vmatmul.msk.f32.gmra.mxu2 %vm324_vm1, %v314_v9 }
  0x36   : > { %4459 = vmatmul.msk.f32.gmra.mxu1 %vm324_vm1, %v305_v8  ;;  %4468 = vmatmul.msk.f32.gmra.mxu3 %vm324_vm1, %v314_v9 }
  0x3d   : > { %4443 = vmatmul.msk.f32.gmra.mxu0 %vm324_vm1, %v306_v12  ;;  %4452 = vmatmul.msk.f32.gmra.mxu2 %vm324_vm1, %v315_v13 }
  0x3e   : > { %4460 = vmatmul.msk.f32.gmra.mxu1 %vm324_vm1, %v306_v12  ;;  %4469 = vmatmul.msk.f32.gmra.mxu3 %vm324_vm1, %v315_v13 }
  0x45   : > { %4444 = vmatmul.msk.f32.gmra.mxu0 %vm324_vm1, %v307_v14  ;;  %4453 = vmatmul.msk.f32.gmra.mxu2 %vm324_vm1, %v316_v15 }
  0x46   : > { %4461 = vmatmul.msk.f32.gmra.mxu1 %vm324_vm1, %v307_v14  ;;  %4470 = vmatmul.msk.f32.gmra.mxu3 %vm324_vm1, %v316_v15 }
  0x4d   : > { %4445 = vmatmul.msk.f32.gmra.mxu0 %vm324_vm1, %v308_v16  ;;  %4454 = vmatmul.msk.f32.gmra.mxu2 %vm324_vm1, %v317_v17 }
  0x4e   : > { %4462 = vmatmul.msk.f32.gmra.mxu1 %vm324_vm1, %v308_v16  ;;  %4471 = vmatmul.msk.f32.gmra.mxu3 %vm324_vm1, %v317_v17 }
  0x55   : > { %4446 = vmatmul.msk.f32.gmra.mxu0 %vm324_vm1, %v309_v18  ;;  %4455 = vmatmul.msk.f32.gmra.mxu2 %vm324_vm1, %v318_v19 }
  0x56   : > { %4463 = vmatmul.msk.f32.gmra.mxu1 %vm324_vm1, %v309_v18  ;;  %4472 = vmatmul.msk.f32.gmra.mxu3 %vm324_vm1, %v318_v19 }
  0x5d   : > { %4447 = vmatmul.msk.f32.gmra.mxu0 %vm324_vm1, %v310_v20  ;;  %4474 = vmatmul.msk.f32.vlgmr.msrb.gmra.mxu2 %vm324_vm1, %v607_v21 }
  0x5e   : > { %4464 = vmatmul.msk.f32.gmra.mxu1 %vm324_vm1, %v310_v20  ;;  %4491 = vmatmul.msk.f32.vlgmr.msrb.gmra.mxu3 %vm324_vm1, %v607_v21 }
  0x65   : > { %4448 = vmatmul.msk.f32.gmra.mxu0 %vm324_vm1, %v311_v22  ;;  %4475 = vmatmul.msk.f32.gmra.mxu2 %vm324_vm1, %v608_v23 }
  0x66   : > { %4465 = vmatmul.msk.f32.gmra.mxu1 %vm324_vm1, %v311_v22  ;;  %4492 = vmatmul.msk.f32.gmra.mxu3 %vm324_vm1, %v608_v23 }
  0x6d   : > { %4476 = vmatmul.msk.f32.gmra.mxu2 %vm324_vm1, %v609_v24 }
  0x6e   : > { %4493 = vmatmul.msk.f32.gmra.mxu3 %vm324_vm1, %v609_v24 }
  0x75   : > { %4477 = vmatmul.msk.f32.gmra.mxu2 %vm324_vm1, %v610_v25 }
  0x76   : > { %4494 = vmatmul.msk.f32.gmra.mxu3 %vm324_vm1, %v610_v25 }
  0xa2   : > { %v395_v26 = vpop.f32.mrf.mxu0 }
  0xa3   : > { %v508_v27 = vmul.f32 0.17677669, %v395_v26  ;;  %v460_v28 = vpop.f32.mrf.mxu1 }
  0xa4   : > { %v509_v29 = vmul.f32 0.17677669, %v460_v28 }
  0xa6   : > { %v540_v30 = vpack.c.bf16 %v509_v29, %v508_v27 }
  0xa8   : > { %556 = vst [vmem:[#allocation2] sm:$0xff] %v540_v30  ;;  %v422_v31 = vpop.f32.mrf.mxu2 }
  0xa9   : > { %v526_v32 = vmul.f32 0.17677669, %v422_v31  ;;  %v487_v33 = vpop.f32.mrf.mxu3 }
  0xaa   : > { %v527_v34 = vmul.f32 0.17677669, %v487_v33  ;;  %v398_v35 = vpop.f32.mrf.mxu0 }
  0xab   : > { %v510_v36 = vmul.f32 0.17677669, %v398_v35  ;;  %v463_v37 = vpop.f32.mrf.mxu1 }
  0xac   : > { %v549_v38 = vpack.c.bf16 %v527_v34, %v526_v32  ;;  %v511_v39 = vmul.f32 0.17677669, %v463_v37 }
  0xae   : > { %565 = vst [vmem:[#allocation2 + $0x48] sm:$0xff] %v549_v38  ;;  %v541_v40 = vpack.c.bf16 %v511_v39, %v510_v36  ;;  %v611_v38 = vld [vmem:[%s7675_s2 + $0xa0] sm:$0xff] }
  0xaf   : > { %4478 = vmatmul.msk.f32.gmra.mxu2 %vm324_vm1, %v611_v38  ;;  %4495 = vmatmul.msk.f32.gmra.mxu3 %vm324_vm1, %v611_v38 }
  0xb0   : > { %557 = vst [vmem:[#allocation2 + $0x8] sm:$0xff] %v541_v40  ;;  %v425_v41 = vpop.f32.mrf.mxu2 }
  0xb1   : > { %v528_v42 = vmul.f32 0.17677669, %v425_v41  ;;  %v490_v43 = vpop.f32.mrf.mxu3 }
  0xb2   : > { %v529_v44 = vmul.f32 0.17677669, %v490_v43  ;;  %v401_v45 = vpop.f32.mrf.mxu0 }
  0xb3   : > { %v512_v46 = vmul.f32 0.17677669, %v401_v45  ;;  %v466_v47 = vpop.f32.mrf.mxu1  ;;  %v612_v45 = vld [vmem:[%s7675_s2 + $0xa8] sm:$0xff] }
  0xb4   : > { %v550_v48 = vpack.c.bf16 %v529_v44, %v528_v42  ;;  %v513_v49 = vmul.f32 0.17677669, %v466_v47 }
  0xb6   : > { %566 = vst [vmem:[#allocation2 + $0x50] sm:$0xff] %v550_v48  ;;  %v542_v50 = vpack.c.bf16 %v513_v49, %v512_v46 }
  0xb7   : > { %4479 = vmatmul.msk.f32.gmra.mxu2 %vm324_vm1, %v612_v45  ;;  %4496 = vmatmul.msk.f32.gmra.mxu3 %vm324_vm1, %v612_v45 }
  0xb8   : > { %558 = vst [vmem:[#allocation2 + $0x10] sm:$0xff] %v542_v50  ;;  %v428_v51 = vpop.f32.mrf.mxu2 }
  0xb9   : > { %v530_v52 = vmul.f32 0.17677669, %v428_v51  ;;  %v493_v53 = vpop.f32.mrf.mxu3 }
  0xba   : > { %v531_v54 = vmul.f32 0.17677669, %v493_v53  ;;  %v404_v55 = vpop.f32.mrf.mxu0 }
  0xbb   : > { %v514_v56 = vmul.f32 0.17677669, %v404_v55  ;;  %v469_v57 = vpop.f32.mrf.mxu1 }
  0xbc   : > { %v551_v58 = vpack.c.bf16 %v531_v54, %v530_v52  ;;  %v515_v59 = vmul.f32 0.17677669, %v469_v57 }
  0xbe   : > { %567 = vst [vmem:[#allocation2 + $0x58] sm:$0xff] %v551_v58  ;;  %v543_v60 = vpack.c.bf16 %v515_v59, %v514_v56  ;;  %v613_v56 = vld [vmem:[%s7675_s2 + $0xb0] sm:$0xff]  ;;  %v614_v59 = vld [vmem:[%s7675_s2 + $0xb8] sm:$0xff] }
  0xbf   : > { %4480 = vmatmul.msk.f32.gmra.mxu2 %vm324_vm1, %v613_v56  ;;  %4497 = vmatmul.msk.f32.gmra.mxu3 %vm324_vm1, %v613_v56 }
  0xc0   : > { %559 = vst [vmem:[#allocation2 + $0x18] sm:$0xff] %v543_v60  ;;  %v431_v61 = vpop.f32.mrf.mxu2 }
  0xc1   : > { %v532_v62 = vmul.f32 0.17677669, %v431_v61  ;;  %v496_v63 = vpop.f32.mrf.mxu3 }
  0xc2   : > { %v533_v0 = vmul.f32 0.17677669, %v496_v63  ;;  %v407_v1 = vpop.f32.mrf.mxu0 }
  0xc3   : > { %v516_v2 = vmul.f32 0.17677669, %v407_v1  ;;  %v472_v3 = vpop.f32.mrf.mxu1 }
  0xc4   : > { %v552_v4 = vpack.c.bf16 %v533_v0, %v532_v62  ;;  %v517_v5 = vmul.f32 0.17677669, %v472_v3 }
  0xc6   : > { %568 = vst [vmem:[#allocation2 + $0x60] sm:$0xff] %v552_v4  ;;  %v544_v6 = vpack.c.bf16 %v517_v5, %v516_v2 }
  0xc7   : > { %4481 = vmatmul.msk.f32.gmra.mxu2 %vm324_vm1, %v614_v59  ;;  %4498 = vmatmul.msk.f32.gmra.mxu3 %vm324_vm1, %v614_v59 }
  0xc8   : > { %560 = vst [vmem:[#allocation2 + $0x20] sm:$0xff] %v544_v6  ;;  %v434_v7 = vpop.f32.mrf.mxu2  ;;  %v615_v6 = vld [vmem:[%s7675_s2 + $0xc0] sm:$0xff] }
  0xc9   : > { %v534_v8 = vmul.f32 0.17677669, %v434_v7  ;;  %v499_v9 = vpop.f32.mrf.mxu3  ;;  %v4551_v7 = vld [vmem:[#allocation2 + $0x10] sm:$0xf] }
  0xca   : > { %v535_v10 = vmul.f32 0.17677669, %v499_v9  ;;  %v410_v11 = vpop.f32.mrf.mxu0  ;;  %v4742_v9 = vld [vmem:[#allocation2 + $0x14] sm:$0xf] }
  0xcb   : > { %v518_v12 = vmul.f32 0.17677669, %v410_v11  ;;  %v475_v13 = vpop.f32.mrf.mxu1  ;;  %v4553_v11 = vld [vmem:[#allocation2 + $0x18] sm:$0xf0] }
  0xcc   : > { %v553_v14 = vpack.c.bf16 %v535_v10, %v534_v8  ;;  %v519_v15 = vmul.f32 0.17677669, %v475_v13  ;;  %v4743_v8 = vld [vmem:[#allocation2 + $0x14] sm:$0xf0]  ;;  %v616_v13 = vld [vmem:[%s7675_s2 + $0xc8] sm:$0xff] }
  0xcd   : > { %v4552_v10 = vor.u32 %v4743_v8, %v4551_v7 }
  0xce   : > { %569 = vst [vmem:[#allocation2 + $0x68] sm:$0xff] %v553_v14  ;;  %v545_v16 = vpack.c.bf16 %v519_v15, %v518_v12  ;;  %v4556_v12 = vor.u32 %v4742_v9, %v4553_v11  ;;  %v4543_v14 = vld [vmem:[#allocation2] sm:$0xf]  ;;  %v4741_v15 = vld [vmem:[#allocation2 + $0x4] sm:$0xf0] }
  0xcf   : > { %4482 = vmatmul.msk.f32.gmra.mxu2 %vm324_vm1, %v615_v6  ;;  %4499 = vmatmul.msk.f32.gmra.mxu3 %vm324_vm1, %v615_v6 }
  0xd0   : > { %561 = vst [vmem:[#allocation2 + $0x28] sm:$0xff] %v545_v16  ;;  %v437_v17 = vpop.f32.mrf.mxu2  ;;  %1181 = vmatpush.bf16.msra.mxu2 %v4552_v10  ;;  %1270 = vmatpush.bf16.msra.mxu3 %v4556_v12  ;;  %v4740_v16 = vld [vmem:[#allocation2 + $0x4] sm:$0xf] }
  0xd1   : > { %v536_v18 = vmul.f32 0.17677669, %v437_v17  ;;  %v502_v19 = vpop.f32.mrf.mxu3  ;;  %v4544_v17 = vor.u32 %v4741_v15, %v4543_v14 }
  0xd2   : > { %v537_v20 = vmul.f32 0.17677669, %v502_v19  ;;  %v413_v21 = vpop.f32.mrf.mxu0 }
  0xd3   : > { %v520_v22 = vmul.f32 0.17677669, %v413_v21  ;;  %v478_v23 = vpop.f32.mrf.mxu1  ;;  %v618_v21 = vld [vmem:[%s7675_s2 + $0xd8] sm:$0xff] }
  0xd4   : > { %v554_v24 = vpack.c.bf16 %v537_v20, %v536_v18  ;;  %v521_v25 = vmul.f32 0.17677669, %v478_v23  ;;  %v4545_v18 = vld [vmem:[#allocation2 + $0x8] sm:$0xf0]  ;;  %1182 = vmatpush.bf16.msra.mxu2 %v4544_v17  ;;  %v620_v23 = vld [vmem:[%s7675_s2 + $0xe8] sm:$0xff] }
  0xd5   : > { %v4548_v19 = vor.u32 %v4740_v16, %v4545_v18  ;;  %v617_v20 = vld [vmem:[%s7675_s2 + $0xd0] sm:$0xff] }
  0xd6   : > { %570 = vst [vmem:[#allocation2 + $0x70] sm:$0xff] %v554_v24  ;;  %v546_v26 = vpack.c.bf16 %v521_v25, %v520_v22  ;;  %v619_v22 = vld [vmem:[%s7675_s2 + $0xe0] sm:$0xff]  ;;  %v621_v24 = vld [vmem:[%s7675_s2 + $0xf0] sm:$0xff]  ;;  %v622_v25 = vld [vmem:[%s7675_s2 + $0xf8] sm:$0xff] }
  0xd7   : > { %4483 = vmatmul.msk.f32.gmra.mxu2 %vm324_vm1, %v616_v13  ;;  %4500 = vmatmul.msk.f32.gmra.mxu3 %vm324_vm1, %v616_v13 }
  0xd8   : > { %562 = vst [vmem:[#allocation2 + $0x30] sm:$0xff] %v546_v26  ;;  %v440_v27 = vpop.f32.mrf.mxu2  ;;  %1271 = vmatpush.bf16.msra.mxu3 %v4548_v19 }
  0xd9   : > { %v538_v28 = vmul.f32 0.17677669, %v440_v27  ;;  %v505_v29 = vpop.f32.mrf.mxu3 }
  0xda   : > { %v539_v30 = vmul.f32 0.17677669, %v505_v29  ;;  %v416_v31 = vpop.f32.mrf.mxu0 }
  0xdb   : > { %v522_v32 = vmul.f32 0.17677669, %v416_v31  ;;  %v481_v33 = vpop.f32.mrf.mxu1 }
  0xdc   : > { %v555_v34 = vpack.c.bf16 %v539_v30, %v538_v28  ;;  %v523_v35 = vmul.f32 0.17677669, %v481_v33 }
  0xde   : > { %571 = vst [vmem:[#allocation2 + $0x78] sm:$0xff] %v555_v34  ;;  %v547_v36 = vpack.c.bf16 %v523_v35, %v522_v32 }
  0xdf   : > { %4484 = vmatmul.msk.f32.gmra.mxu2 %vm324_vm1, %v617_v20  ;;  %4501 = vmatmul.msk.f32.gmra.mxu3 %vm324_vm1, %v617_v20 }
  0xe0   : > { %563 = vst [vmem:[#allocation2 + $0x38] sm:$0xff] %v547_v36  ;;  %v698_v37 = vpop.f32.mrf.mxu2 }
  0xe1   : > { %v763_v39 = vpop.f32.mrf.mxu3 }
  0xe2   : > { %v419_v40 = vpop.f32.mrf.mxu0  ;;  %v811_v46 = vpack.c.bf16 %v763_v39, %v698_v37 }
  0xe3   : > { %v524_v41 = vmul.f32 0.17677669, %v419_v40  ;;  %v484_v42 = vpop.f32.mrf.mxu1 }
  0xe4   : > { %v525_v43 = vmul.f32 0.17677669, %v484_v42  ;;  %v1066_v50 = vunpack.c.l.b16 %v811_v46  ;;  %v1067_v51 = vunpack.c.h.b16 %v811_v46 }
  0xe6   : > { %v548_v44 = vpack.c.bf16 %v525_v43, %v524_v41 }
  0xe7   : > { %4485 = vmatmul.msk.f32.gmra.mxu2 %vm324_vm1, %v618_v21  ;;  %4502 = vmatmul.msk.f32.gmra.mxu3 %vm324_vm1, %v618_v21 }
  0xe8   : > { %564 = vst [vmem:[#allocation2 + $0x40] sm:$0xff] %v548_v44  ;;  %v701_v47 = vpop.f32.mrf.mxu2 }
  0xe9   : > { %v766_v48 = vpop.f32.mrf.mxu3 }
  0xea   : > { %v812_v49 = vpack.c.bf16 %v766_v48, %v701_v47 }
  0xec   : > { %v1068_v52 = vunpack.c.l.b16 %v812_v49  ;;  %v1069_v53 = vunpack.c.h.b16 %v812_v49 }
  0xee   : > { %v1074_v54 = vpack.c.b16 %v1068_v52, %v1066_v50  ;;  %v1075_v55 = vpack.c.b16 %v1069_v53, %v1067_v51 }
  0xef   : > { %4486 = vmatmul.msk.f32.gmra.mxu2 %vm324_vm1, %v619_v22  ;;  %4503 = vmatmul.msk.f32.gmra.mxu3 %vm324_vm1, %v619_v22 }
  0xf0   : > { %1082 = vxpose.binary.xlu0.c.b16.start [1/4] (short) %v1075_v55, %v1074_v54, 128  ;;  %v704_v57 = vpop.f32.mrf.mxu2 }
  0xf1   : > { %v769_v58 = vpop.f32.mrf.mxu3 }
  0xf2   : > { %v813_v60 = vpack.c.bf16 %v769_v58, %v704_v57 }
  0xf4   : > { %v1070_v0 = vunpack.c.l.b16 %v813_v60  ;;  %v1071_v1 = vunpack.c.h.b16 %v813_v60 }
  0xf7   : > { %4487 = vmatmul.msk.f32.gmra.mxu2 %vm324_vm1, %v620_v23  ;;  %4504 = vmatmul.msk.f32.gmra.mxu3 %vm324_vm1, %v620_v23 }
  0xf8   : > { %v707_v61 = vpop.f32.mrf.mxu2 }
  0xf9   : > { %v772_v62 = vpop.f32.mrf.mxu3 }
  0xfa   : > { %v814_v63 = vpack.c.bf16 %v772_v62, %v707_v61 }
  0xfc   : > { %v1072_v2 = vunpack.c.l.b16 %v814_v63  ;;  %v1073_v3 = vunpack.c.h.b16 %v814_v63 }
  0xfe   : > { %v1076_v4 = vpack.c.b16 %v1072_v2, %v1070_v0  ;;  %v1077_v5 = vpack.c.b16 %v1073_v3, %v1071_v1 }
  0xff   : > { %4488 = vmatmul.msk.f32.gmra.mxu2 %vm324_vm1, %v621_v24  ;;  %4505 = vmatmul.msk.f32.gmra.mxu3 %vm324_vm1, %v621_v24 }
 0x100   : > { %1083 = vxpose.binary.xlu0.c.b16.end [2/4] (short) %v1077_v5, %v1076_v4, 128 }
 0x107   : > { %4489 = vmatmul.msk.f32.gmra.mxu2 %vm324_vm1, %v622_v25  ;;  %4506 = vmatmul.msk.f32.gmra.mxu3 %vm324_vm1, %v622_v25 }
 0x132   : > { %v710_v26 = vpop.f32.mrf.mxu2  ;;  %v775_v27 = vpop.f32.mrf.mxu3 }
 0x133   : > { %v815_v29 = vpack.c.bf16 %v775_v27, %v710_v26 }
 0x135   : > { %v1829_v33 = vunpack.c.l.b16 %v815_v29  ;;  %v1830_v34 = vunpack.c.h.b16 %v815_v29 }
 0x13a   : > { %v713_v30 = vpop.f32.mrf.mxu2  ;;  %v778_v31 = vpop.f32.mrf.mxu3 }
 0x13b   : > { %v816_v32 = vpack.c.bf16 %v778_v31, %v713_v30 }
 0x13d   : > { %v1831_v35 = vunpack.c.l.b16 %v816_v32  ;;  %v1832_v36 = vunpack.c.h.b16 %v816_v32 }
 0x13f   : > { %v1837_v38 = vpack.c.b16 %v1831_v35, %v1829_v33  ;;  %v1838_v39 = vpack.c.b16 %v1832_v36, %v1830_v34 }
 0x141   : > { %1845 = vxpose.binary.xlu1.c.b16.start [1/4] (short) %v1838_v39, %v1837_v38, 128 }
 0x142   : > { %v716_v40 = vpop.f32.mrf.mxu2  ;;  %v781_v41 = vpop.f32.mrf.mxu3 }
 0x143   : > { %v817_v43 = vpack.c.bf16 %v781_v41, %v716_v40 }
 0x145   : > { %v1833_v47 = vunpack.c.l.b16 %v817_v43  ;;  %v1834_v48 = vunpack.c.h.b16 %v817_v43 }
 0x14a   : > { %v719_v44 = vpop.f32.mrf.mxu2  ;;  %v784_v45 = vpop.f32.mrf.mxu3 }
 0x14b   : > { %v818_v46 = vpack.c.bf16 %v784_v45, %v719_v44 }
 0x14d   : > { %v1835_v49 = vunpack.c.l.b16 %v818_v46  ;;  %v1836_v50 = vunpack.c.h.b16 %v818_v46 }
 0x14f   : > { %v1839_v52 = vpack.c.b16 %v1835_v49, %v1833_v47  ;;  %v1840_v53 = vpack.c.b16 %v1836_v50, %v1834_v48 }
 0x151   : > { %1846 = vxpose.binary.xlu1.c.b16.end [2/4] (short) %v1840_v53, %v1839_v52, 128 }
 0x152   : > { %v722_v54 = vpop.f32.mrf.mxu2  ;;  %v787_v55 = vpop.f32.mrf.mxu3 }
 0x153   : > { %v819_v57 = vpack.c.bf16 %v787_v55, %v722_v54 }
 0x155   : > { %v2593_v61 = vunpack.c.l.b16 %v819_v57  ;;  %v2594_v62 = vunpack.c.h.b16 %v819_v57 }
 0x15a   : > { %v725_v58 = vpop.f32.mrf.mxu2  ;;  %v790_v59 = vpop.f32.mrf.mxu3 }
 0x15b   : > { %v820_v60 = vpack.c.bf16 %v790_v59, %v725_v58 }
 0x15d   : > { %v2595_v63 = vunpack.c.l.b16 %v820_v60  ;;  %v2596_v0 = vunpack.c.h.b16 %v820_v60 }
 0x15f   : > { %v2601_v2 = vpack.c.b16 %v2595_v63, %v2593_v61  ;;  %v2602_v3 = vpack.c.b16 %v2596_v0, %v2594_v62 }
 0x161   : > { %2609 = vxpose.binary.xlu2.c.b16.start [1/4] (short) %v2602_v3, %v2601_v2, 128 }
 0x162   : > { %v728_v4 = vpop.f32.mrf.mxu2  ;;  %v793_v5 = vpop.f32.mrf.mxu3 }
 0x163   : > { %v821_v7 = vpack.c.bf16 %v793_v5, %v728_v4 }
 0x165   : > { %v2597_v11 = vunpack.c.l.b16 %v821_v7  ;;  %v2598_v12 = vunpack.c.h.b16 %v821_v7 }
 0x16a   : > { %v731_v8 = vpop.f32.mrf.mxu2  ;;  %v796_v9 = vpop.f32.mrf.mxu3 }
 0x16b   : > { %v822_v10 = vpack.c.bf16 %v796_v9, %v731_v8 }
 0x16d   : > { %v2599_v13 = vunpack.c.l.b16 %v822_v10  ;;  %v2600_v14 = vunpack.c.h.b16 %v822_v10 }
 0x16f   : > { %v2603_v16 = vpack.c.b16 %v2599_v13, %v2597_v11  ;;  %v2604_v17 = vpack.c.b16 %v2600_v14, %v2598_v12 }
 0x171   : > { %2610 = vxpose.binary.xlu2.c.b16.end [2/4] (short) %v2604_v17, %v2603_v16, 128 }
 0x172   : > { %v734_v18 = vpop.f32.mrf.mxu2  ;;  %v799_v19 = vpop.f32.mrf.mxu3 }
 0x173   : > { %v823_v21 = vpack.c.bf16 %v799_v19, %v734_v18 }
 0x175   : > { %v3357_v25 = vunpack.c.l.b16 %v823_v21  ;;  %v3358_v26 = vunpack.c.h.b16 %v823_v21  ;;  %v845_v21 = vld.sshfl [vmem:[#allocation1 + $0x8] sm:$0xff pattern:$0x75316420] }
 0x176   : > { %4524 = vmatpush.msk.msrb.mxu1 %vm373_vm0, %v845_v21 }
 0x17a   : > { %v737_v22 = vpop.f32.mrf.mxu2  ;;  %v802_v23 = vpop.f32.mrf.mxu3 }
 0x17b   : > { %v824_v24 = vpack.c.bf16 %v802_v23, %v737_v22  ;;  %v827_v22 = vld [vmem:[%s7675_s2 + $0x100] sm:$0xff] }
 0x17c   : > { %4525 = vmatmul.msk.f32.vlgmr.msrb.gmra.mxu1 %vm324_vm1, %v827_v22 }
 0x17d   : > { %v3359_v27 = vunpack.c.l.b16 %v824_v24 }
 0x17f   : > { %v3365_v30 = vpack.c.b16 %v3359_v27, %v3357_v25  ;;  %v828_v25 = vld [vmem:[%s7675_s2 + $0x108] sm:$0xff] }
 0x182   : > { %v740_v32 = vpop.f32.mrf.mxu2  ;;  %v805_v33 = vpop.f32.mrf.mxu3 }
 0x183   : > { %v825_v34 = vpack.c.bf16 %v805_v33, %v740_v32 }
 0x184   : > { %4526 = vmatmul.msk.f32.gmra.mxu1 %vm324_vm1, %v828_v25 }
 0x185   : > { %v3361_v39 = vunpack.c.l.b16 %v825_v34  ;;  %v3362_v40 = vunpack.c.h.b16 %v825_v34 }
 0x18a   : > { %v743_v36 = vpop.f32.mrf.mxu2  ;;  %v808_v38 = vpop.f32.mrf.mxu3 }
 0x18b   : > { %v826_v41 = vpack.c.bf16 %v808_v38, %v743_v36 }
 0x18d   : > { %v3364_v43 = vunpack.c.h.b16 %v826_v41 }
 0x18f   : > { %v3368_v45 = vpack.c.b16 %v3364_v43, %v3362_v40 }
 0x19c   : > { %v1090_v28 = vpop.trf.xlu0 }
 0x19d   : > { %4557 = vmatmul.msk.bf16.vlgmr.msra.gmra.mxu2 %vm1126_vm2, %v1090_v28  ;;  %4573 = vmatmul.msk.bf16.vlgmr.msra.gmra.mxu3 %vm1126_vm2, %v1090_v28  ;;  %v3360_v28 = vunpack.c.h.b16 %v824_v24 }
 0x19f   : > { %v3366_v31 = vpack.c.b16 %v3360_v28, %v3358_v26  ;;  %v829_v28 = vld [vmem:[%s7675_s2 + $0x110] sm:$0xff] }
 0x1a0   : > { %4527 = vmatmul.msk.f32.gmra.mxu1 %vm324_vm1, %v829_v28 }
 0x1a1   : > { %3373 = vxpose.binary.xlu0.c.b16.start [1/4] (short) %v3366_v31, %v3365_v30, 128  ;;  %v830_v31 = vld [vmem:[%s7675_s2 + $0x118] sm:$0xff] }
 0x1a4   : > { %v5683_v37 = vpop.trf.xlu0 }
 0x1a8   : > { %4528 = vmatmul.msk.f32.gmra.mxu1 %vm324_vm1, %v830_v31 }
 0x1ac   : > { %v1092_v42 = vpop.trf.xlu0 }
 0x1ad   : > { %4558 = vmatmul.msk.bf16.gmra.mxu2 %vm1126_vm2, %v1092_v42  ;;  %4574 = vmatmul.msk.bf16.gmra.mxu3 %vm1126_vm2, %v1092_v42  ;;  %v3363_v42 = vunpack.c.l.b16 %v826_v41  ;;  %v832_v41 = vld [vmem:[%s7675_s2 + $0x128] sm:$0xff] }
 0x1af   : > { %v3367_v44 = vpack.c.b16 %v3363_v42, %v3361_v39  ;;  %v831_v39 = vld [vmem:[%s7675_s2 + $0x120] sm:$0xff] }
 0x1b0   : > { %4529 = vmatmul.msk.f32.gmra.mxu1 %vm324_vm1, %v831_v39 }
 0x1b1   : > { %3374 = vxpose.binary.xlu0.c.b16.end [2/4] (short) %v3368_v45, %v3367_v44, 128  ;;  %v833_v44 = vld [vmem:[%s7675_s2 + $0x130] sm:$0xff] }
 0x1b4   : > { %v5687_v51 = vpop.trf.xlu0 }
 0x1b8   : > { %4530 = vmatmul.msk.f32.gmra.mxu1 %vm324_vm1, %v832_v41 }
 0x1bc   : > { %v1094_v56 = vpop.trf.xlu0 }
 0x1bd   : > { %4559 = vmatmul.msk.bf16.gmra.mxu2 %vm1126_vm2, %v1094_v56  ;;  %4575 = vmatmul.msk.bf16.gmra.mxu3 %vm1126_vm2, %v1094_v56 }
 0x1c0   : > { %4531 = vmatmul.msk.f32.gmra.mxu1 %vm324_vm1, %v833_v44 }
 0x1c4   : > { %v5691_v1 = vpop.trf.xlu0 }
 0x1cc   : > { %v1096_v6 = vpop.trf.xlu0 }
 0x1cd   : > { %4560 = vmatmul.msk.bf16.gmra.mxu2 %vm1126_vm2, %v1096_v6  ;;  %4576 = vmatmul.msk.bf16.gmra.mxu3 %vm1126_vm2, %v1096_v6 }
 0x1d4   : > { %v5695_v15 = vpop.trf.xlu0 }
 0x1dc   : > { %v1098_v20 = vpop.trf.xlu0 }
 0x1dd   : > { %4561 = vmatmul.msk.bf16.gmra.mxu2 %vm1126_vm2, %v1098_v20  ;;  %4577 = vmatmul.msk.bf16.gmra.mxu3 %vm1126_vm2, %v1098_v20  ;;  %v844_v20 = vld.sshfl [vmem:[#allocation1] sm:$0xff pattern:$0x75316420] }
 0x1de   : > { %4507 = vmatpush.msk.msrb.mxu0 %vm373_vm0, %v844_v20 }
 0x1df   : > { %4508 = vmatmul.msk.f32.vlgmr.msrb.gmra.mxu0 %vm324_vm1, %v827_v22 }
 0x1e4   : > { %v1099_v29 = vpop.trf.xlu0 }
 0x1e7   : > { %4509 = vmatmul.msk.f32.gmra.mxu0 %vm324_vm1, %v828_v25 }
 0x1ec   : > { %v1100_v35 = vpop.trf.xlu0 }
 0x1ed   : > { %4562 = vmatmul.msk.bf16.gmra.mxu2 %vm1126_vm2, %v1100_v35  ;;  %4578 = vmatmul.msk.bf16.gmra.mxu3 %vm1126_vm2, %v1100_v35 }
 0x1ef   : > { %4510 = vmatmul.msk.f32.gmra.mxu0 %vm324_vm1, %v829_v28 }
 0x1f4   : > { %v1101_v46 = vpop.trf.xlu0 }
 0x1f7   : > { %4511 = vmatmul.msk.f32.gmra.mxu0 %vm324_vm1, %v830_v31  ;;  %v836_v31 = vld [vmem:[%s7675_s2 + $0x148] sm:$0xff] }
 0x1fc   : > { %v1102_v47 = vpop.trf.xlu0 }
 0x1fd   : > { %4563 = vmatmul.msk.bf16.gmra.mxu2 %vm1126_vm2, %v1102_v47  ;;  %4579 = vmatmul.msk.bf16.gmra.mxu3 %vm1126_vm2, %v1102_v47  ;;  %v834_v47 = vld [vmem:[%s7675_s2 + $0x138] sm:$0xff] }
 0x1fe   : > { %4532 = vmatmul.msk.f32.gmra.mxu1 %vm324_vm1, %v834_v47 }
 0x1ff   : > { %4512 = vmatmul.msk.f32.gmra.mxu0 %vm324_vm1, %v831_v39 }
 0x204   : > { %v1103_v48 = vpop.trf.xlu0 }
 0x207   : > { %4513 = vmatmul.msk.f32.gmra.mxu0 %vm324_vm1, %v832_v41 }
 0x20c   : > { %v1104_v49 = vpop.trf.xlu0 }
 0x20d   : > { %4564 = vmatmul.msk.bf16.gmra.mxu2 %vm1126_vm2, %v1104_v49  ;;  %4580 = vmatmul.msk.bf16.gmra.mxu3 %vm1126_vm2, %v1104_v49  ;;  %v835_v49 = vld [vmem:[%s7675_s2 + $0x140] sm:$0xff] }
 0x20e   : > { %4533 = vmatmul.msk.f32.gmra.mxu1 %vm324_vm1, %v835_v49 }
 0x20f   : > { %4514 = vmatmul.msk.f32.gmra.mxu0 %vm324_vm1, %v833_v44 }
 0x214   : > { %v1105_v13 = vpop.trf.xlu0 }
 0x216   : > { %4534 = vmatmul.msk.f32.gmra.mxu1 %vm324_vm1, %v836_v31 }
 0x217   : > { %4515 = vmatmul.msk.f32.gmra.mxu0 %vm324_vm1, %v834_v47 }
 0x21d   : > { %4565 = vmatmul.msk.bf16.gmra.mxu2 %vm1126_vm2, %v5683_v37  ;;  %4581 = vmatmul.msk.bf16.gmra.mxu3 %vm1126_vm2, %v5683_v37 }
 0x21f   : > { %4516 = vmatmul.msk.f32.gmra.mxu0 %vm324_vm1, %v835_v49 }
 0x220   : > { %v5709_v50 = vpop.f32.mrf.mxu2  ;;  %v5711_v52 = vpop.f32.mrf.mxu3 }
 0x221   : > { %7787 = vst [vmem:[#allocation9_spill] sm:$0xff] %v5711_v52 }
 0x227   : > { %4517 = vmatmul.msk.f32.gmra.mxu0 %vm324_vm1, %v836_v31 }
 0x228   : > { %v5713_v53 = vpop.f32.mrf.mxu2  ;;  %v5715_v54 = vpop.f32.mrf.mxu3 }
 0x229   : > { %7788 = vst [vmem:[#allocation10_spill] sm:$0xff] %v5715_v54 }
 0x22d   : > { %4566 = vmatmul.msk.bf16.gmra.mxu2 %vm1126_vm2, %v5687_v51  ;;  %4582 = vmatmul.msk.bf16.gmra.mxu3 %vm1126_vm2, %v5687_v51 }
 0x230   : > { %v5721_v55 = vpop.f32.mrf.mxu2  ;;  %v5723_v56 = vpop.f32.mrf.mxu3 }
 0x231   : > { %7789 = vst [vmem:[#allocation11_spill] sm:$0xff] %v5723_v56  ;;  %v1390_v41 = vmax.f32 %v5711_v52, %v5723_v56  ;;  %v1353_v31 = vmax.f32 %v5709_v50, %v5721_v55 }
 0x238   : > { %v5725_v57 = vpop.f32.mrf.mxu2  ;;  %v5727_v37 = vpop.f32.mrf.mxu3 }
 0x239   : > { %7790 = vst [vmem:[#allocation12_spill] sm:$0xff] %v5727_v37  ;;  %v1391_v28 = vmax.f32 %v5715_v54, %v5727_v37  ;;  %v1354_v37 = vmax.f32 %v5713_v53, %v5725_v57 }
 0x23d   : > { %4567 = vmatmul.msk.bf16.gmra.mxu2 %vm1126_vm2, %v5691_v1  ;;  %4583 = vmatmul.msk.bf16.gmra.mxu3 %vm1126_vm2, %v5691_v1 }
 0x240   : > { %v5733_v58 = vpop.f32.mrf.mxu2  ;;  %v5735_v59 = vpop.f32.mrf.mxu3 }
 0x241   : > { %7791 = vst [vmem:[#allocation13_spill] sm:$0xff] %v5735_v59  ;;  %v1392_v47 = vmax.f32 %v1390_v41, %v5735_v59 }
 0x248   : > { %v5737_v60 = vpop.f32.mrf.mxu2  ;;  %v5739_v51 = vpop.f32.mrf.mxu3 }
 0x249   : > { %7792 = vst [vmem:[#allocation14_spill] sm:$0xff] %v5739_v51  ;;  %v1393_v44 = vmax.f32 %v1391_v28, %v5739_v51  ;;  %v1356_v52 = vmax.f32 %v1354_v37, %v5737_v60 }
 0x24d   : > { %4568 = vmatmul.msk.bf16.gmra.mxu2 %vm1126_vm2, %v5695_v15  ;;  %4584 = vmatmul.msk.bf16.gmra.mxu3 %vm1126_vm2, %v5695_v15 }
 0x250   : > { %v5745_v61 = vpop.f32.mrf.mxu2  ;;  %v5747_v62 = vpop.f32.mrf.mxu3 }
 0x251   : > { %7793 = vst [vmem:[#allocation15_spill] sm:$0xff] %v5747_v62 }
 0x258   : > { %v5749_v63 = vpop.f32.mrf.mxu2  ;;  %v5751_v0 = vpop.f32.mrf.mxu3 }
 0x259   : > { %7794 = vst [vmem:[#allocation16_spill] sm:$0xff] %v5751_v0  ;;  %v1395_v49 = vmax.f32 %v1393_v44, %v5751_v0  ;;  %v1355_v44 = vmax.f32 %v1353_v31, %v5733_v58  ;;  %v1358_v56 = vmax.f32 %v1356_v52, %v5749_v63 }
 0x25d   : > { %4569 = vmatmul.msk.bf16.gmra.mxu2 %vm1126_vm2, %v1099_v29  ;;  %4585 = vmatmul.msk.bf16.gmra.mxu3 %vm1126_vm2, %v1099_v29 }
 0x260   : > { %v5755_v1 = vpop.f32.mrf.mxu2  ;;  %v5757_v2 = vpop.f32.mrf.mxu3 }
 0x268   : > { %v5759_v3 = vpop.f32.mrf.mxu2  ;;  %v5761_v4 = vpop.f32.mrf.mxu3 }
 0x269   : > { %7795 = vst [vmem:[#allocation17_spill] sm:$0xff] %v5761_v4  ;;  %v1360_v0 = vmax.f32 %v1358_v56, %v5759_v3 }
 0x26d   : > { %4570 = vmatmul.msk.bf16.gmra.mxu2 %vm1126_vm2, %v1101_v46  ;;  %4586 = vmatmul.msk.bf16.gmra.mxu3 %vm1126_vm2, %v1101_v46 }
 0x270   : > { %v5765_v5 = vpop.f32.mrf.mxu2  ;;  %v5767_v6 = vpop.f32.mrf.mxu3 }
 0x278   : > { %v5769_v7 = vpop.f32.mrf.mxu2  ;;  %v5771_v8 = vpop.f32.mrf.mxu3 }
 0x279   : > { %v1362_v31 = vmax.f32 %v1360_v0, %v5769_v7 }
 0x27d   : > { %4571 = vmatmul.msk.bf16.gmra.mxu2 %vm1126_vm2, %v1103_v48  ;;  %4587 = vmatmul.msk.bf16.gmra.mxu3 %vm1126_vm2, %v1103_v48 }
 0x280   : > { %v5775_v9 = vpop.f32.mrf.mxu2  ;;  %v5777_v10 = vpop.f32.mrf.mxu3 }
 0x288   : > { %v5779_v11 = vpop.f32.mrf.mxu2  ;;  %v5781_v12 = vpop.f32.mrf.mxu3 }
 0x28d   : > { %4572 = vmatmul.msk.bf16.gmra.mxu2 %vm1126_vm2, %v1105_v13  ;;  %4588 = vmatmul.msk.bf16.gmra.mxu3 %vm1126_vm2, %v1105_v13 }
 0x290   : > { %v5785_v14 = vpop.f32.mrf.mxu2  ;;  %v5787_v15 = vpop.f32.mrf.mxu3 }
 0x298   : > { %v5789_v16 = vpop.f32.mrf.mxu2  ;;  %v5791_v17 = vpop.f32.mrf.mxu3 }
 0x2a0   : > { %v5793_v18 = vpop.f32.mrf.mxu2  ;;  %v5795_v19 = vpop.f32.mrf.mxu3 }
 0x2a1   : > { %7796 = vst [vmem:[#allocation18_spill] sm:$0xff] %v5795_v19 }
 0x2a8   : > { %v5804_v23 = vpop.f32.mrf.mxu2  ;;  %v5806_v24 = vpop.f32.mrf.mxu3 }
 0x2a9   : > { %7797 = vst [vmem:[#allocation19_spill] sm:$0xff] %v5806_v24 }
 0x2b0   : > { %v5813_v26 = vpop.f32.mrf.mxu2  ;;  %v5815_v27 = vpop.f32.mrf.mxu3 }
 0x2b1   : > { %7798 = vst [vmem:[#allocation20_spill] sm:$0xff] %v5815_v27 }
 0x2b8   : > { %v5822_v29 = vpop.f32.mrf.mxu2  ;;  %v5824_v30 = vpop.f32.mrf.mxu3 }
 0x2b9   : > { %7799 = vst [vmem:[#allocation21_spill] sm:$0xff] %v5824_v30 }
 0x2c0   : > { %v5831_v32 = vpop.f32.mrf.mxu2  ;;  %v5833_v33 = vpop.f32.mrf.mxu3 }
 0x2c1   : > { %7800 = vst [vmem:[#allocation22_spill] sm:$0xff] %v5833_v33 }
 0x2c8   : > { %v5835_v34 = vpop.f32.mrf.mxu2  ;;  %v5837_v35 = vpop.f32.mrf.mxu3 }
 0x2c9   : > { %7801 = vst [vmem:[#allocation23_spill] sm:$0xff] %v5837_v35 }
 0x2d0   : > { %v5839_v36 = vpop.f32.mrf.mxu2  ;;  %v5841_v38 = vpop.f32.mrf.mxu3 }
 0x2d1   : > { %7802 = vst [vmem:[#allocation24_spill] sm:$0xff] %v5841_v38 }
 0x2d8   : > { %v5848_v40 = vpop.f32.mrf.mxu3  ;;  %v5853_v42 = vpop.f32.mrf.mxu2 }
 0x2d9   : > { %7803 = vst [vmem:[#allocation25_spill] sm:$0xff] %v5848_v40 }
 0x2e0   : > { %v5857_v43 = vpop.f32.mrf.mxu3  ;;  %v5864_v45 = vpop.f32.mrf.mxu2 }
 0x2e1   : > { %7804 = vst [vmem:[#allocation26_spill] sm:$0xff] %v5857_v43 }
 0x2e8   : > { %v5866_v46 = vpop.f32.mrf.mxu3  ;;  %v5873_v48 = vpop.f32.mrf.mxu2 }
 0x2e9   : > { %7805 = vst [vmem:[#allocation27_spill] sm:$0xff] %v5866_v46 }
 0x2f0   : > { %v5878_v13 = vpop.f32.mrf.mxu3  ;;  %v5882_v20 = vpop.f32.mrf.mxu2 }
 0x2f1   : > { %7806 = vst [vmem:[#allocation28_spill] sm:$0xff] %v5878_v13 }
 0x2f2   : > { %7807 = vst [vmem:[#allocation29_spill] sm:$0xff] %v5882_v20  ;;  %v1397_v20 = vmax.f32 %v1395_v49, %v5761_v4  ;;  %v1357_v49 = vmax.f32 %v1355_v44, %v5745_v61  ;;  %v1364_v44 = vmax.f32 %v1362_v31, %v5779_v11 }
 0x2f4   : > { %v1399_v41 = vmax.f32 %v1397_v20, %v5771_v8  ;;  %v1359_v20 = vmax.f32 %v1357_v49, %v5755_v1  ;;  %v1366_v49 = vmax.f32 %v1364_v44, %v5789_v16 }
 0x2f6   : > { %v1401_v59 = vmax.f32 %v1399_v41, %v5781_v12  ;;  %v1361_v41 = vmax.f32 %v1359_v20, %v5765_v5 }
 0x2f8   : > { %v5884_v21 = vpop.f32.mrf.mxu3  ;;  %v5886_v22 = vpop.f32.mrf.mxu2 }
 0x2f9   : > { %7808 = vst [vmem:[#allocation30_spill] sm:$0xff] %v5884_v21 }
 0x300   : > { %v5888_v25 = vpop.f32.mrf.mxu3  ;;  %v5895_v39 = vpop.f32.mrf.mxu2 }
 0x301   : > { %7809 = vst [vmem:[#allocation31_spill] sm:$0xff] %v5895_v39  ;;  %v1394_v39 = vmax.f32 %v1392_v47, %v5747_v62 }
 0x303   : > { %v1396_v28 = vmax.f32 %v1394_v39, %v5757_v2  ;;  %v1403_v39 = vmax.f32 %v1401_v59, %v5791_v17  ;;  %v1363_v59 = vmax.f32 %v1361_v41, %v5775_v9 }
 0x305   : > { %v1398_v51 = vmax.f32 %v1396_v28, %v5767_v6  ;;  %v1405_v28 = vmax.f32 %v1403_v39, %v5806_v24  ;;  %v1365_v39 = vmax.f32 %v1363_v59, %v5785_v14  ;;  %v1368_v24 = vmax.f32 %v1366_v49, %v5804_v23 }
 0x307   : > { %v1400_v37 = vmax.f32 %v1398_v51, %v5777_v10  ;;  %v1407_v51 = vmax.f32 %v1405_v28, %v5824_v30  ;;  %v1370_v28 = vmax.f32 %v1368_v24, %v5822_v29 }
 0x308   : > { %v5904_v54 = vpop.f32.mrf.mxu3  ;;  %v5919_v47 = vpop.f32.mrf.mxu2 }
 0x309   : > { %v1402_v52 = vmax.f32 %v1400_v37, %v5787_v15  ;;  %v1409_v37 = vmax.f32 %v1407_v51, %v5837_v35  ;;  %v1372_v51 = vmax.f32 %v1370_v28, %v5835_v34 }
 0x30b   : > { %v1404_v56 = vmax.f32 %v1402_v52, %v5795_v19  ;;  %v1411_v31 = vmax.f32 %v1409_v37, %v5848_v40  ;;  %v1367_v52 = vmax.f32 %v1365_v39, %v5793_v18  ;;  %v1374_v39 = vmax.f32 %v1372_v51, %v5853_v42  ;;  %v7810_v51 = vld [vmem:[#allocation29_spill] sm:$0xff] }
 0x30d   : > { %v1406_v0 = vmax.f32 %v1404_v56, %v5815_v27  ;;  %v1413_v44 = vmax.f32 %v1411_v31, %v5866_v46  ;;  %v1369_v56 = vmax.f32 %v1367_v52, %v5813_v26  ;;  %v1376_v52 = vmax.f32 %v1374_v39, %v5873_v48 }
 0x30f   : > { %v1408_v20 = vmax.f32 %v1406_v0, %v5833_v33  ;;  %v1415_v49 = vmax.f32 %v1413_v44, %v5884_v21  ;;  %v1371_v37 = vmax.f32 %v1369_v56, %v5831_v32  ;;  %v1378_v19 = vmax.f32 %v1376_v52, %v5886_v22 }
 0x310   : > { %v5929_v62 = vpop.f32.mrf.mxu3  ;;  %v5943_v4 = vpop.f32.mrf.mxu2 }
 0x311   : > { %v1410_v41 = vmax.f32 %v1408_v20, %v5841_v38  ;;  %v1417_v20 = vmax.f32 %v1415_v49, %v5904_v54  ;;  %v1373_v31 = vmax.f32 %v1371_v37, %v5839_v36  ;;  %v1380_v49 = vmax.f32 %v1378_v19, %v5919_v47  ;;  %v7811_v37 = vld [vmem:[#allocation31_spill] sm:$0xff] }
 0x313   : > { %v1412_v59 = vmax.f32 %v1410_v41, %v5857_v43  ;;  %v1375_v44 = vmax.f32 %v1373_v31, %v5864_v45 }
 0x315   : > { %v1414_v24 = vmax.f32 %v1412_v59, %v5878_v13  ;;  %v1377_v59 = vmax.f32 %v1375_v44, %v7810_v51 }
 0x317   : > { %v1416_v28 = vmax.f32 %v1414_v24, %v5888_v25  ;;  %v1379_v35 = vmax.f32 %v1377_v59, %v7811_v37 }
 0x318   : > { %v5953_v0 = vpop.f32.mrf.mxu3  ;;  %v5966_v30 = vpop.f32.mrf.mxu2 }
 0x319   : > { %v1419_v41 = vmax.f32 %v1417_v20, %v5953_v0  ;;  %v1418_v56 = vmax.f32 %v1416_v28, %v5929_v62  ;;  %v1382_v39 = vmax.f32 %v1380_v49, %v5966_v30  ;;  %v1381_v24 = vmax.f32 %v1379_v35, %v5943_v4 }
 0x31b   : > { %v1420_v27 = vmax.f32 %v1418_v56, %v1419_v41  ;;  %v1383_v33 = vmax.f32 %v1381_v24, %v1382_v39 }
 0x31d   : > { %v1421_v20 = vrot.slane %v1420_v27, 4  ;;  %v1384_v40 = vrot.slane %v1383_v33, 4 }
 0x31f   : > { %v1422_v31 = vmax.f32 %v1420_v27, %v1421_v20  ;;  %v1385_v38 = vmax.f32 %v1383_v33, %v1384_v40  ;;  %v837_v27 = vld [vmem:[%s7675_s2 + $0x150] sm:$0xff] }
 0x320   : > { %4518 = vmatmul.msk.f32.gmra.mxu0 %vm324_vm1, %v837_v27  ;;  %4535 = vmatmul.msk.f32.gmra.mxu1 %vm324_vm1, %v837_v27 }
 0x321   : > { %v1423_v52 = vrot.slane %v1422_v31, 2  ;;  %v1386_v46 = vrot.slane %v1385_v38, 2 }
 0x323   : > { %v1424_v28 = vmax.f32 %v1422_v31, %v1423_v52  ;;  %v1387_v21 = vmax.f32 %v1385_v38, %v1386_v46 }
 0x325   : > { %v1425_v43 = vrot.slane %v1424_v28, 1  ;;  %v1388_v13 = vrot.slane %v1387_v21, 1 }
 0x327   : > { %v1426_v44 = vmax.f32 %v1424_v28, %v1425_v43  ;;  %v1389_v41 = vmax.f32 %v1387_v21, %v1388_v13  ;;  %v838_v13 = vld [vmem:[%s7675_s2 + $0x158] sm:$0xff] }
 0x328   : > { %4519 = vmatmul.msk.f32.gmra.mxu0 %vm324_vm1, %v838_v13  ;;  %4536 = vmatmul.msk.f32.gmra.mxu1 %vm324_vm1, %v838_v13 }
 0x329   : > { %v1429_v19 = vrot.slane %v1426_v44, 4 }
 0x32b   : > { %v5974_v56 = vsel %vm373_vm0, %v1389_v41, %v1429_v19 }
 0x32c   : > { %v1437_v59 = vperm.slane %v5974_v56, 0 }
 0x32e   : > { %v5977_v35 = vperm.slane %v1437_v59, 0 }
 0x330   : > { %v1471_v33 = vsub.f32 %v5785_v14, %v5977_v35  ;;  %v1473_v38 = vsub.f32 %v5789_v16, %v5977_v35  ;;  %v1467_v40 = vsub.f32 %v5775_v9, %v5977_v35  ;;  %v1469_v43 = vsub.f32 %v5779_v11, %v5977_v35 }
 0x331   : > { %v1463_v14 = vsub.f32 %v5765_v5, %v5977_v35  ;;  %v1465_v39 = vsub.f32 %v5769_v7, %v5977_v35  ;;  %v1459_v9 = vsub.f32 %v5755_v1, %v5977_v35  ;;  %v1461_v24 = vsub.f32 %v5759_v3, %v5977_v35  ;;  %v839_v7 = vld [vmem:[%s7675_s2 + $0x160] sm:$0xff] }
 0x332   : > { %v1563_v46 = vmul.f32 1.442695, %v1471_v33  ;;  %v1567_v21 = vmul.f32 1.442695, %v1473_v38  ;;  %v1555_v49 = vmul.f32 1.442695, %v1467_v40  ;;  %v1455_v31 = vsub.f32 %v5745_v61, %v5977_v35  ;;  %4520 = vmatmul.msk.f32.gmra.mxu0 %vm324_vm1, %v839_v7  ;;  %4537 = vmatmul.msk.f32.gmra.mxu1 %vm324_vm1, %v839_v7 }
 0x333   : > { %v1559_v16 = vmul.f32 1.442695, %v1469_v43  ;;  %v1547_v11 = vmul.f32 1.442695, %v1463_v14  ;;  %v1551_v5 = vmul.f32 1.442695, %v1465_v39  ;;  %v1457_v1 = vsub.f32 %v5749_v63, %v5977_v35  ;;  %v6026_v14 = vpop.f32.mrf.mxu1 }
 0x334   : > { %4818 = vpow2.f32 %v1563_v46  ;;  %v1539_v52 = vmul.f32 1.442695, %v1459_v9  ;;  %v1543_v44 = vmul.f32 1.442695, %v1461_v24  ;;  %v1451_v59 = vsub.f32 %v5733_v58, %v5977_v35  ;;  %v840_v40 = vld [vmem:[%s7675_s2 + $0x168] sm:$0xff] }
 0x335   : > { %4820 = vpow2.f32 %v1567_v21  ;;  %v1531_v27 = vmul.f32 1.442695, %v1455_v31  ;;  %v1438_v61 = vperm.slane %v5974_v56, 4  ;;  %v1453_v63 = vsub.f32 %v5737_v60, %v5977_v35  ;;  %v6024_v21 = vpop.f32.mrf.mxu0 }
 0x336   : > { %4822 = vpow2.f32 %v1555_v49  ;;  %v1535_v33 = vmul.f32 1.442695, %v1457_v1  ;;  %v1447_v58 = vsub.f32 %v5721_v55, %v5977_v35  ;;  %v1523_v13 = vmul.f32 1.442695, %v1451_v59 }
 0x337   : > { %4824 = vpow2.f32 %v1559_v16  ;;  %v6028_v60 = vperm.slane %v1438_v61, 0  ;;  %v1449_v49 = vsub.f32 %v5725_v57, %v5977_v35  ;;  %v1527_v39 = vmul.f32 1.442695, %v1453_v63 }
 0x338   : > { %4826 = vpow2.f32 %v1547_v11  ;;  %v1443_v11 = vsub.f32 %v5709_v50, %v5977_v35  ;;  %v1445_v24 = vsub.f32 %v5713_v53, %v5977_v35  ;;  %v1505_v63 = vsub.f32 %v5966_v30, %v5977_v35  ;;  %v842_v30 = vld [vmem:[%s7675_s2 + $0x178] sm:$0xff] }
 0x339   : > { %4828 = vpow2.f32 %v1551_v5  ;;  %v1515_v5 = vmul.f32 1.442695, %v1447_v58  ;;  %v1472_v57 = vsub.f32 %v5787_v15, %v6028_v60  ;;  %v1519_v7 = vmul.f32 1.442695, %v1449_v49 }
 0x33a   : > { %v4819_v20 = vpop.eup %4818  ;;  %4830 = vpow2.f32 %v1539_v52  ;;  %4521 = vmatmul.msk.f32.gmra.mxu0 %vm324_vm1, %v840_v40  ;;  %4538 = vmatmul.msk.f32.gmra.mxu1 %vm324_vm1, %v840_v40  ;;  %v1474_v31 = vsub.f32 %v5791_v17, %v6028_v60  ;;  %v841_v52 = vld [vmem:[%s7675_s2 + $0x170] sm:$0xff]  ;;  %v1464_v53 = vsub.f32 %v5767_v6, %v6028_v60  ;;  %v1507_v1 = vmul.f32 1.442695, %v1443_v11 }
 0x33b   : > { %v4821_v28 = vpop.eup %4820  ;;  %4832 = vpow2.f32 %v1543_v44  ;;  %v1468_v44 = vsub.f32 %v5777_v10, %v6028_v60  ;;  %v1511_v15 = vmul.f32 1.442695, %v1445_v24  ;;  %v1565_v17 = vmul.f32 1.442695, %v1472_v57  ;;  %v7812_v24 = vld [vmem:[#allocation17_spill] sm:$0xff] }
 0x33c   : > { %v4823_v3 = vpop.eup %4822  ;;  %v1649_v19 = vpack.c.bf16 %v4821_v28, %v4819_v20  ;;  %4834 = vpow2.f32 %v1531_v27  ;;  %v1470_v6 = vsub.f32 %v5781_v12, %v6028_v60  ;;  %v983_v27 = vpop.f32.mrf.mxu1  ;;  %v1501_v40 = vsub.f32 %v5919_v47, %v5977_v35 }
 0x33d   : > { %v4825_v41 = vpop.eup %4824  ;;  %4836 = vpow2.f32 %v1535_v33  ;;  %v918_v59 = vpop.f32.mrf.mxu0  ;;  %v1549_v33 = vmul.f32 1.442695, %v1464_v53  ;;  %v1460_v49 = vsub.f32 %v5757_v2, %v6028_v60  ;;  %v1495_v47 = vsub.f32 %v7810_v51, %v5977_v35 }
 0x33e   : > { %1687 = vmatpush.bf16.msra.mxu0 %v1649_v19  ;;  %v4827_v38 = vpop.eup %4826  ;;  %v1647_v43 = vpack.c.bf16 %v4825_v41, %v4823_v3  ;;  %4838 = vpow2.f32 %v1523_v13  ;;  %v1503_v3 = vsub.f32 %v5943_v4, %v5977_v35  ;;  %v1569_v41 = vmul.f32 1.442695, %v1474_v31 }
 0x33f   : > { %v4829_v46 = vpop.eup %4828  ;;  %4840 = vpow2.f32 %v1527_v39  ;;  %v1499_v4 = vsub.f32 %v7811_v37, %v5977_v35  ;;  %v1561_v58 = vmul.f32 1.442695, %v1470_v6  ;;  %v1631_v39 = vmul.f32 1.442695, %v1505_v63 }
 0x340   : > { %v4831_v16 = vpop.eup %4830  ;;  %v1645_v55 = vpack.c.bf16 %v4829_v46, %v4827_v38  ;;  %4842 = vpow2.f32 %v1515_v5  ;;  %v1557_v38 = vmul.f32 1.442695, %v1468_v44  ;;  %v1627_v12 = vmul.f32 1.442695, %v1503_v3 }
 0x341   : > { %v4833_v9 = vpop.eup %4832  ;;  %4844 = vpow2.f32 %v1519_v7  ;;  %v1466_v46 = vsub.f32 %v5771_v8, %v6028_v60  ;;  %v1619_v8 = vmul.f32 1.442695, %v1499_v4  ;;  %v6074_v11 = vpack.c.bf16 %v6026_v14, %v6024_v21 }
 0x342   : > { %1688 = vmatpush.bf16.msra.mxu0 %v1647_v43  ;;  %v4835_v20 = vpop.eup %4834  ;;  %v1643_v50 = vpack.c.bf16 %v4833_v9, %v4831_v16  ;;  %4539 = vmatmul.msk.f32.gmra.mxu1 %vm324_vm1, %v841_v52  ;;  %4846 = vpow2.f32 %v1507_v1  ;;  %v1497_v16 = vsub.f32 %v5886_v22, %v5977_v35  ;;  %v1623_v9 = vmul.f32 1.442695, %v1501_v40 }
 0x343   : > { %v4837_v28 = vpop.eup %4836  ;;  %4522 = vmatmul.msk.f32.gmra.mxu0 %vm324_vm1, %v841_v52  ;;  %4848 = vpow2.f32 %v1511_v15  ;;  %v6078_v2 = vpack.c.bf16 %v983_v27, %v918_v59  ;;  %v1462_v22 = vsub.f32 %v7812_v24, %v6028_v60  ;;  %v1553_v5 = vmul.f32 1.442695, %v1466_v46  ;;  %v7815_v27 = vld [vmem:[#allocation13_spill] sm:$0xff] }
 0x344   : > { %v4839_v19 = vpop.eup %4838  ;;  %v1641_v10 = vpack.c.bf16 %v4837_v28, %v4835_v20  ;;  %4850 = vpow2.f32 %v1565_v17  ;;  %v7813_v20 = vld [vmem:[#allocation15_spill] sm:$0xff]  ;;  %v1541_v52 = vmul.f32 1.442695, %v1460_v49  ;;  %v1491_v14 = vsub.f32 %v5864_v45, %v5977_v35  ;;  %v6090_v1 = vpop.f32.mrf.mxu1  ;;  %v7814_v45 = vld [vmem:[#allocation16_spill] sm:$0xff] }
 0x345   : > { %v4841_v61 = vpop.eup %4840  ;;  %4852 = vpow2.f32 %v1569_v41  ;;  %v1456_v31 = vsub.f32 %v7813_v20, %v6028_v60  ;;  %v1611_v28 = vmul.f32 1.442695, %v1495_v47  ;;  %v6088_v53 = vpop.f32.mrf.mxu0  ;;  %v1615_v15 = vmul.f32 1.442695, %v1497_v16 }
 0x346   : > { %1689 = vmatpush.bf16.msra.mxu0 %v1645_v55  ;;  %v4843_v43 = vpop.eup %4842  ;;  %v1639_v13 = vpack.c.bf16 %v4841_v61, %v4839_v19  ;;  %4854 = vpow2.f32 %v1549_v33  ;;  %v1671_v3 = vunpack.c.l.b16 %v6074_v11  ;;  %v1673_v17 = vunpack.c.l.b16 %v6078_v2 }
 0x347   : > { %v4845_v37 = vpop.eup %4844  ;;  %4856 = vpow2.f32 %v1557_v38  ;;  %v1458_v6 = vsub.f32 %v7814_v45, %v6028_v60  ;;  %v1533_v61 = vmul.f32 1.442695, %v1456_v31  ;;  %v1487_v4 = vsub.f32 %v5839_v36, %v5977_v35 }
 0x348   : > { %v4847_v55 = vpop.eup %4846  ;;  %4858 = vpow2.f32 %v1627_v12  ;;  %v1637_v57 = vpack.c.bf16 %v4845_v37, %v4843_v43  ;;  %v1603_v38 = vmul.f32 1.442695, %v1491_v14  ;;  %v1489_v12 = vsub.f32 %v5853_v42, %v5977_v35  ;;  %v7819_v14 = vld [vmem:[#allocation9_spill] sm:$0xff] }
 0x349   : > { %v4849_v51 = vpop.eup %4848  ;;  %4860 = vpow2.f32 %v1561_v58  ;;  %v6104_v46 = vpack.c.b16 %v1673_v17, %v1671_v3  ;;  %v1537_v37 = vmul.f32 1.442695, %v1458_v6  ;;  %v1485_v24 = vsub.f32 %v5835_v34, %v5977_v35 }
 0x34a   : > { %1690 = vmatpush.bf16.msra.mxu0 %v1643_v50  ;;  %4540 = vmatmul.msk.f32.gmra.mxu1 %vm324_vm1, %v842_v30  ;;  %v4851_v7 = vpop.eup %4850  ;;  %4862 = vpow2.f32 %v1631_v39  ;;  %v1493_v50 = vsub.f32 %v5873_v48, %v5977_v35  ;;  %v1545_v48 = vmul.f32 1.442695, %v1462_v22  ;;  %v1635_v41 = vpack.c.bf16 %v4849_v51, %v4847_v55  ;;  %v7817_v39 = vld [vmem:[#allocation11_spill] sm:$0xff] }
 0x34b   : > { %4523 = vmatmul.msk.f32.gmra.mxu0 %vm324_vm1, %v842_v30  ;;  %v4853_v21 = vpop.eup %4852  ;;  %4864 = vpow2.f32 %v1619_v8  ;;  %v7816_v30 = vld [vmem:[#allocation14_spill] sm:$0xff]  ;;  %v1448_v47 = vsub.f32 %v7817_v39, %v6028_v60  ;;  %v1483_v55 = vsub.f32 %v5831_v32, %v5977_v35  ;;  %v1599_v22 = vmul.f32 1.442695, %v1489_v12 }
 0x34c   : > { %v6092_v44 = vpop.eup %4854  ;;  %4866 = vpow2.f32 %v1623_v9  ;;  %v1650_v63 = vpack.c.bf16 %v4853_v21, %v4851_v7  ;;  %v1607_v43 = vmul.f32 1.442695, %v1493_v50  ;;  %v1595_v9 = vmul.f32 1.442695, %v1487_v4  ;;  %v989_v21 = vpop.f32.mrf.mxu1 }
 0x34d   : > { %v4857_v19 = vpop.eup %4856  ;;  %4868 = vpow2.f32 %v1553_v5  ;;  %v1444_v50 = vsub.f32 %v7819_v14, %v6028_v60  ;;  %v1479_v3 = vsub.f32 %v5813_v26, %v5977_v35  ;;  %v1481_v17 = vsub.f32 %v5822_v29, %v5977_v35 }
 0x34e   : > { %1691 = vmatpush.bf16.msra.mxu0 %v1641_v10  ;;  %v4859_v59 = vpop.eup %4858  ;;  %v1452_v10 = vsub.f32 %v7815_v27, %v6028_v60  ;;  %4870 = vpow2.f32 %v1541_v52  ;;  %v924_v52 = vpop.f32.mrf.mxu0  ;;  %v1591_v6 = vmul.f32 1.442695, %v1485_v24 }
 0x34f   : > { %v4861_v33 = vpop.eup %4860  ;;  %4872 = vpow2.f32 %v1611_v28  ;;  %v1517_v28 = vmul.f32 1.442695, %v1448_v47  ;;  %v1583_v12 = vmul.f32 1.442695, %v1481_v17  ;;  %v1500_v47 = vsub.f32 %v5888_v25, %v6028_v60  ;;  %v7824_v17 = vld [vmem:[#allocation26_spill] sm:$0xff] }
 0x350   : > { %v4863_v40 = vpop.eup %4862  ;;  %4874 = vpow2.f32 %v1615_v15  ;;  %v1525_v16 = vmul.f32 1.442695, %v1452_v10  ;;  %v1648_v42 = vpack.c.bf16 %v4861_v33, %v4857_v19  ;;  %v1587_v19 = vmul.f32 1.442695, %v1483_v55 }
 0x351   : > { %v4865_v58 = vpop.eup %4864  ;;  %4876 = vpow2.f32 %v1545_v48  ;;  %v1665_v49 = vpack.c.bf16 %v4863_v40, %v4859_v59  ;;  %v6126_v48 = vpack.c.bf16 %v6090_v1, %v6088_v53  ;;  %v7820_v59 = vld [vmem:[#allocation10_spill] sm:$0xff]  ;;  %v1475_v53 = vsub.f32 %v5793_v18, %v5977_v35 }
 0x352   : > { %1692 = vmatpush.bf16.msra.mxu0 %v1639_v13  ;;  %v1454_v13 = vsub.f32 %v7816_v30, %v6028_v60  ;;  %v4867_v36 = vpop.eup %4866  ;;  %4878 = vpow2.f32 %v1533_v61  ;;  %v1446_v26 = vsub.f32 %v7820_v59, %v6028_v60  ;;  %v1506_v61 = vsub.f32 %v5953_v0, %v6028_v60 }
 0x353   : > { %v4869_v8 = vpop.eup %4868  ;;  %4880 = vpow2.f32 %v1603_v38  ;;  %1710 = vmatpush.bf16.msra.mxu1 %v1665_v49  ;;  %v1663_v31 = vpack.c.bf16 %v4867_v36, %v4865_v58  ;;  %v1477_v1 = vsub.f32 %v5804_v23, %v5977_v35  ;;  %v1579_v38 = vmul.f32 1.442695, %v1479_v3 }
 0x354   : > { %v4871_v51 = vpop.eup %4870  ;;  %4882 = vpow2.f32 %v1607_v43  ;;  %v1529_v20 = vmul.f32 1.442695, %v1454_v13  ;;  %v1646_v34 = vpack.c.bf16 %v4869_v8, %v6092_v44  ;;  %v1675_v43 = vunpack.c.l.b16 %v6126_v48 }
 0x355   : > { %v4873_v5 = vpop.eup %4872  ;;  %4884 = vpow2.f32 %v1537_v37  ;;  %v1504_v30 = vsub.f32 %v5929_v62, %v6028_v60  ;;  %v1513_v13 = vmul.f32 1.442695, %v1446_v26  ;;  %v1633_v23 = vmul.f32 1.442695, %v1506_v61  ;;  %v7825_v26 = vld [vmem:[#allocation27_spill] sm:$0xff] }
 0x356   : > { %1693 = vmatpush.bf16.msra.mxu0 %v1637_v57  ;;  %v7818_v57 = vld [vmem:[#allocation12_spill] sm:$0xff]  ;;  %v4875_v32 = vpop.eup %4874  ;;  %4886 = vpow2.f32 %v1525_v16  ;;  %v1571_v36 = vmul.f32 1.442695, %v1475_v53  ;;  %v1575_v16 = vmul.f32 1.442695, %v1477_v1  ;;  %v1502_v8 = vsub.f32 %v5904_v54, %v6028_v60  ;;  %v927_v54 = vpop.f32.mrf.mxu0 }
 0x357   : > { %v1450_v7 = vsub.f32 %v7818_v57, %v6028_v60  ;;  %v4877_v15 = vpop.eup %4876  ;;  %4888 = vpow2.f32 %v1595_v9  ;;  %1711 = vmatpush.bf16.msra.mxu1 %v1663_v31  ;;  %v1661_v29 = vpack.c.bf16 %v4875_v32, %v4873_v5  ;;  %v1629_v55 = vmul.f32 1.442695, %v1504_v30  ;;  %v7821_v5 = vld [vmem:[#allocation28_spill] sm:$0xff] }
 0x358   : > { %v4879_v45 = vpop.eup %4878  ;;  %4890 = vpow2.f32 %v1599_v22  ;;  %v1644_v33 = vpack.c.bf16 %v4877_v15, %v4871_v51  ;;  %v1496_v57 = vsub.f32 %v7821_v5, %v6028_v60  ;;  %v1621_v31 = vmul.f32 1.442695, %v1500_v47 }
 0x359   : > { %v4881_v44 = vpop.eup %4880  ;;  %v1521_v27 = vmul.f32 1.442695, %v1450_v7  ;;  %4892 = vpow2.f32 %v1529_v20  ;;  %v7822_v7 = vld [vmem:[#allocation30_spill] sm:$0xff]  ;;  %v1625_v32 = vmul.f32 1.442695, %v1502_v8 }
 0x35a   : > { %1694 = vmatpush.bf16.msra.mxu0 %v1635_v41  ;;  %v6128_v41 = vpack.c.bf16 %v989_v21, %v924_v52  ;;  %v4883_v10 = vpop.eup %4882  ;;  %4894 = vpow2.f32 %v1517_v28  ;;  %v1498_v20 = vsub.f32 %v7822_v7, %v6028_v60  ;;  %v992_v52 = vpop.f32.mrf.mxu1  ;;  %v7833_v7 = vld [vmem:[#allocation21_spill] sm:$0xff] }
 0x35b   : > { %v4885_v4 = vpop.eup %4884  ;;  %4896 = vpow2.f32 %v1587_v19  ;;  %1712 = vmatpush.bf16.msra.mxu1 %v1661_v29  ;;  %v1659_v18 = vpack.c.bf16 %v4883_v10, %v4881_v44  ;;  %v1492_v19 = vsub.f32 %v7824_v17, %v6028_v60  ;;  %v4747_v44 = vld [vmem:[#allocation2 + $0x34] sm:$0xf0]  ;;  %v7836_v17 = vld [vmem:[#allocation19_spill] sm:$0xff] }
 0x35c   : > { %v4887_v40 = vpop.eup %4886  ;;  %4898 = vpow2.f32 %v1591_v6  ;;  %v1677_v0 = vunpack.c.l.b16 %v6128_v41  ;;  %v1642_v35 = vpack.c.bf16 %v4885_v4, %v4879_v45  ;;  %v1613_v45 = vmul.f32 1.442695, %v1496_v57  ;;  %v4599_v6 = vld [vmem:[#allocation2 + $0x30] sm:$0xf]  ;;  %v7826_v4 = vld [vmem:[#allocation24_spill] sm:$0xff] }
 0x35d   : > { %1695 = vmatmul.bf16.vlgmr.msra.gmra.mxu0 %v6104_v46  ;;  %v4889_v58 = vpop.eup %4888  ;;  %4900 = vpow2.f32 %v1521_v27  ;;  %v1494_v27 = vsub.f32 %v7825_v26, %v6028_v60  ;;  %v1617_v29 = vmul.f32 1.442695, %v1498_v20  ;;  %v1488_v53 = vsub.f32 %v7826_v4, %v6028_v60 }
 0x35e   : > { %1733 = vmatpush.bf16.msrb.mxu0 %v1650_v63  ;;  %v1509_v63 = vmul.f32 1.442695, %v1444_v50  ;;  %v4891_v37 = vpop.eup %4890  ;;  %v6153_v50 = vpack.c.bf16 %v992_v52, %v927_v54  ;;  %v4600_v1 = vor.u32 %v4747_v44, %v4599_v6  ;;  %v1482_v20 = vsub.f32 %v7833_v7, %v6028_v60 }
 0x35f   : > { %v4893_v49 = vpop.eup %4892  ;;  %1713 = vmatpush.bf16.msra.mxu1 %v1659_v18  ;;  %v1657_v9 = vpack.c.bf16 %v4891_v37, %v4889_v58  ;;  %v7827_v58 = vld [vmem:[#allocation25_spill] sm:$0xff]  ;;  %v6165_v37 = vpop.f32.mrf.mxu0  ;;  %v1597_v47 = vmul.f32 1.442695, %v1488_v53 }
 0x360   : > { %4902 = vpow2.f32 %v1509_v63  ;;  %v4895_v39 = vpop.eup %4894  ;;  %v1640_v24 = vpack.c.bf16 %v4893_v49, %v4887_v40  ;;  %7823 = vst [vmem:[#allocation29_spill] sm:$0xff] %v6153_v50  ;;  %v1672_v40 = vunpack.c.h.b16 %v6074_v11  ;;  %v1490_v30 = vsub.f32 %v7827_v58, %v6028_v60 }
 0x361   : > { %4904 = vpow2.f32 %v1579_v38  ;;  %v4897_v62 = vpop.eup %4896  ;;  %v1605_v38 = vmul.f32 1.442695, %v1492_v19  ;;  %7828 = vst [vmem:[#allocation31_spill] sm:$0xff] %v6165_v37  ;;  %v1478_v19 = vsub.f32 %v7836_v17, %v6028_v60 }
 0x362   : > { %1734 = vmatpush.bf16.msrb.mxu0 %v1648_v42  ;;  %4906 = vpow2.f32 %v1583_v12  ;;  %v6144_v42 = vpack.c.b16 %v1677_v0, %v1675_v43  ;;  %v4899_v51 = vpop.eup %4898  ;;  %v1674_v12 = vunpack.c.h.b16 %v6078_v2  ;;  %v4591_v43 = vld [vmem:[#allocation2 + $0x20] sm:$0xf]  ;;  %v4745_v0 = vld [vmem:[#allocation2 + $0x24] sm:$0xf0]  ;;  %v7830_v2 = vld [vmem:[#allocation22_spill] sm:$0xff] }
 0x363   : > { %4908 = vpow2.f32 %v1513_v13  ;;  %v4901_v22 = vpop.eup %4900  ;;  %1714 = vmatpush.bf16.msra.mxu1 %v1657_v9  ;;  %v1655_v14 = vpack.c.bf16 %v4899_v51, %v4897_v62  ;;  %v1609_v13 = vmul.f32 1.442695, %v1494_v27  ;;  %v4592_v11 = vor.u32 %v4745_v0, %v4591_v43  ;;  %v7831_v62 = vld [vmem:[#allocation23_spill] sm:$0xff] }
 0x364   : > { %4910 = vpow2.f32 %v1633_v23  ;;  %v6167_v23 = vpop.f32.mrf.mxu1  ;;  %v1486_v8 = vsub.f32 %v7831_v62, %v6028_v60  ;;  %v1676_v27 = vunpack.c.h.b16 %v6126_v48 }
 0x365   : > { %4912 = vpow2.f32 %v1571_v36  ;;  %7829 = vst [vmem:[#allocation17_spill] sm:$0xff] %v6167_v23 }
 0x366   : > { %1735 = vmatpush.bf16.msrb.mxu0 %v1646_v34  ;;  %v4903_v25 = vpop.eup %4902  ;;  %4914 = vpow2.f32 %v1575_v16  ;;  %v1638_v34 = vpack.c.bf16 %v4901_v22, %v4895_v39  ;;  %v1484_v39 = vsub.f32 %v7830_v2, %v6028_v60  ;;  %v6171_v16 = vpack.c.b16 %v1674_v12, %v1672_v40 }
 0x367   : > { %v4905_v21 = vpop.eup %4904  ;;  %4916 = vpow2.f32 %v1629_v55  ;;  %1715 = vmatpush.bf16.msra.mxu1 %v1655_v14  ;;  %v1601_v55 = vmul.f32 1.442695, %v1490_v30  ;;  %v933_v54 = vpop.f32.mrf.mxu0  ;;  %v4746_v30 = vld [vmem:[#allocation2 + $0x34] sm:$0xf] }
 0x368   : > { %v4907_v28 = vpop.eup %4906  ;;  %4918 = vpow2.f32 %v1621_v31  ;;  %v1589_v57 = vmul.f32 1.442695, %v1484_v39  ;;  %v1593_v31 = vmul.f32 1.442695, %v1486_v8 }
 0x369   : > { %v4909_v15 = vpop.eup %4908  ;;  %4920 = vpow2.f32 %v1625_v32  ;;  %v1653_v10 = vpack.c.bf16 %v4907_v28, %v4905_v21 }
 0x36a   : > { %1736 = vmatpush.bf16.msrb.mxu0 %v1644_v33  ;;  %v4911_v3 = vpop.eup %4910  ;;  %v1636_v63 = vpack.c.bf16 %v4909_v15, %v4903_v25  ;;  %4922 = vpow2.f32 %v1613_v45  ;;  %v7832_v25 = vld [vmem:[#allocation20_spill] sm:$0xff]  ;;  %v1585_v45 = vmul.f32 1.442695, %v1482_v20 }
 0x36b   : > { %v4913_v59 = vpop.eup %4912  ;;  %1716 = vmatpush.bf16.msra.mxu1 %v1653_v10  ;;  %4924 = vpow2.f32 %v1617_v29  ;;  %v1480_v5 = vsub.f32 %v7832_v25, %v6028_v60  ;;  %v1678_v29 = vunpack.c.h.b16 %v6128_v41  ;;  %v1577_v10 = vmul.f32 1.442695, %v1478_v19 }
 0x36c   : > { %v4915_v61 = vpop.eup %4914  ;;  %4926 = vpow2.f32 %v1605_v38  ;;  %v998_v52 = vpop.f32.mrf.mxu1 }
 0x36d   : > { %1700 = vmatmul.bf16.gmra.mxu0 %v6144_v42  ;;  %v4917_v33 = vpop.eup %4916  ;;  %v1651_v18 = vpack.c.bf16 %v4915_v61, %v4913_v59  ;;  %4928 = vpow2.f32 %v1609_v13  ;;  %v6181_v14 = vpack.c.bf16 %v998_v52, %v933_v54  ;;  %v1682_v53 = vpack.c.b16 %v1678_v29, %v1676_v27  ;;  %v4601_v13 = vld [vmem:[#allocation2 + $0x38] sm:$0xf0] }
 0x36e   : > { %1737 = vmatpush.bf16.msrb.mxu0 %v1642_v35  ;;  %v4919_v35 = vpop.eup %4918  ;;  %v1666_v49 = vpack.c.bf16 %v4911_v3, %v4917_v33  ;;  %4930 = vpow2.f32 %v1597_v47  ;;  %v1581_v3 = vmul.f32 1.442695, %v1480_v5 }
 0x36f   : > { %v4921_v36 = vpop.eup %4920  ;;  %1717 = vmatpush.bf16.msra.mxu1 %v1651_v18  ;;  %4932 = vpow2.f32 %v1601_v55  ;;  %7834 = vst [vmem:[#allocation15_spill] sm:$0xff] %v6181_v14  ;;  %v6189_v61 = vpop.f32.mrf.mxu0 }
 0x370   : > { %v4923_v9 = vpop.eup %4922  ;;  %v1664_v51 = vpack.c.bf16 %v4921_v36, %v4919_v35  ;;  %4934 = vpow2.f32 %v1589_v57  ;;  %7837 = vst [vmem:[#allocation16_spill] sm:$0xff] %v6189_v61  ;;  %v4604_v35 = vor.u32 %v4746_v30, %v4601_v13  ;;  %v4593_v36 = vld [vmem:[#allocation2 + $0x28] sm:$0xf0] }
 0x371   : > { %v4925_v22 = vpop.eup %4924  ;;  %4936 = vpow2.f32 %v1593_v31 }
 0x372   : > { %1738 = vmatpush.bf16.msrb.mxu0 %v1640_v24  ;;  %1718 = vmatmul.bf16.vlgmr.msra.gmra.mxu1 %v6171_v16  ;;  %v7702_v24 = vmov 1065369472   ;;  %v4927_v21 = vpop.eup %4926  ;;  %v1662_v32 = vpack.c.bf16 %v4925_v22, %v4923_v9  ;;  %4938 = vpow2.f32 %v1581_v3  ;;  %v1853_v9 = vpop.trf.xlu1 }
 0x373   : > { %1756 = vmatpush.bf16.msrb.mxu1 %v1666_v49  ;;  %v4929_v28 = vpop.eup %4928  ;;  %4940 = vpow2.f32 %v1585_v45  ;;  %v4744_v49 = vld [vmem:[#allocation2 + $0x24] sm:$0xf] }
 0x374   : > { %v4931_v6 = vpop.eup %4930  ;;  %v1660_v44 = vpack.c.bf16 %v4929_v28, %v4927_v21 }
 0x375   : > { %v4933_v59 = vpop.eup %4932 }
 0x376   : > { %1739 = vmatpush.bf16.msrb.mxu0 %v1638_v34  ;;  %v7835_v34 = vld [vmem:[#allocation18_spill] sm:$0xff]  ;;  %v4935_v33 = vpop.eup %4934 }
 0x377   : > { %1757 = vmatpush.bf16.msrb.mxu1 %v1664_v51  ;;  %v1476_v15 = vsub.f32 %v7835_v34, %v6028_v60  ;;  %v1658_v60 = vpack.c.bf16 %v4933_v59, %v4931_v6  ;;  %v4937_v4 = vpop.eup %4936  ;;  %v939_v41 = vpop.f32.mrf.mxu0  ;;  %v1433_v6 = vsub.f32 -inf, %v5974_v56 }
 0x378   : > { %v1656_v38 = vpack.c.bf16 %v4937_v4, %v4935_v33 }
 0x379   : > { %v1573_v26 = vmul.f32 1.442695, %v1476_v15 }
 0x37a   : > { %1740 = vmatpush.bf16.msrb.mxu0 %v1636_v63  ;;  %v6191_v63 = vpop.f32.mrf.mxu1  ;;  %v6211_v25 = vpop.trf.xlu1 }
 0x37b   : > { %1758 = vmatpush.bf16.msrb.mxu1 %v1662_v32  ;;  %7838 = vst [vmem:[#allocation13_spill] sm:$0xff] %v6191_v63  ;;  %4942 = vpow2.f32 %v1573_v26  ;;  %v1434_v26 = vmul.f32 1.442695, %v1433_v6 }
 0x37c   : > { %4944 = vpow2.f32 %v1577_v10 }
 0x37d   : > { %1705 = vmatmul.bf16.gmra.mxu0 %v7702_v24  ;;  %4946 = vpow2.f32 %v1434_v26 }
 0x37e   : > { %1943 = vmatpush.bf16.msra.mxu0 %v4600_v1  ;;  %v4939_v1 = vpop.eup %4938 }
 0x37f   : > { %1759 = vmatpush.bf16.msrb.mxu1 %v1660_v44  ;;  %v4941_v48 = vpop.eup %4940 }
 0x380   : > { %v1654_v43 = vpack.c.bf16 %v4941_v48, %v4939_v1 }
 0x381   : > { %v4943_v12 = vpop.eup %4942 }
 0x382   : > { %1944 = vmatpush.bf16.msra.mxu0 %v4592_v11  ;;  %1723 = vmatmul.bf16.gmra.mxu1 %v1682_v53  ;;  %v1004_v40 = vpop.f32.mrf.mxu1  ;;  %v4945_v58 = vpop.eup %4944  ;;  %v4596_v11 = vor.u32 %v4744_v49, %v4593_v36 }
 0x383   : > { %1760 = vmatpush.bf16.msrb.mxu1 %v1658_v60  ;;  %v6194_v0 = vpack.c.bf16 %v1004_v40, %v939_v41  ;;  %v1652_v18 = vpack.c.bf16 %v4945_v58, %v4943_v12  ;;  %v1855_v32 = vpop.trf.xlu1  ;;  %v6232_v10 = vpop.eup %4946 }
 0x384   : > { %v1788_v4 = vperm.slane %v6232_v10, 0 }
 0x385   : > { %7839 = vst [vmem:[#allocation14_spill] sm:$0xff] %v6194_v0 }
 0x386   : > { %v1792_v56 = vperm.slane %v1788_v4, 0 }
 0x387   : > { %1761 = vmatpush.bf16.msrb.mxu1 %v1656_v38 }
 0x388   : > { %v1794_v41 = vmul.f32 0.0, %v1792_v56 }
 0x38a   : > { %v6200_v2 = vpop.f32.mrf.mxu1 }
 0x38b   : > { %1762 = vmatpush.bf16.msrb.mxu1 %v1654_v43  ;;  %7841 = vst [vmem:[#allocation12_spill] sm:$0xff] %v6200_v2  ;;  %v6223_v17 = vpop.trf.xlu1 }
 0x38d   : > { %1741 = vmatmul.bf16.vlgmr.msrb.gmra.mxu0 %v6104_v46  ;;  %v6198_v46 = vpop.f32.mrf.mxu0 }
 0x38e   : > { %7840 = vst [vmem:[#allocation11_spill] sm:$0xff] %v6198_v46 }
 0x38f   : > { %1763 = vmatpush.bf16.msrb.mxu1 %v1652_v18 }
 0x392   : > { %1728 = vmatmul.bf16.gmra.mxu1 %v7702_v24 }
 0x393   : > { %2032 = vmatpush.bf16.msra.mxu1 %v4604_v35  ;;  %v1857_v45 = vpop.trf.xlu1 }
 0x397   : > { %2033 = vmatpush.bf16.msra.mxu1 %v4596_v11 }
 0x39b   : > { %v6228_v59 = vpop.trf.xlu1 }
 0x39d   : > { %1746 = vmatmul.bf16.gmra.mxu0 %v6144_v42  ;;  %v945_v39 = vpop.f32.mrf.mxu0  ;;  %v1010_v47 = vpop.f32.mrf.mxu1 }
 0x39e   : > { %v6202_v62 = vpack.c.bf16 %v1010_v47, %v945_v39 }
 0x3a2   : > { %1764 = vmatmul.bf16.vlgmr.msrb.gmra.mxu1 %v6171_v16 }
 0x3a3   : > { %v1859_v29 = vpop.trf.xlu1 }
 0x3a5   : > { %v6206_v8 = vpop.f32.mrf.mxu0  ;;  %v6208_v55 = vpop.f32.mrf.mxu1 }
 0x3ad   : > { %1751 = vmatmul.bf16.gmra.mxu0 %v7702_v24 }
 0x3af   : > { %v951_v51 = vpop.f32.mrf.mxu0  ;;  %v1016_v22 = vpop.f32.mrf.mxu1 }
 0x3b0   : > { %v1040_v42 = vpack.c.bf16 %v1016_v22, %v951_v51 }
 0x3b2   : > { %1769 = vmatmul.bf16.gmra.mxu1 %v1682_v53  ;;  %v3962_v7 = vunpack.c.l.b16 %v1040_v42  ;;  %v3963_v20 = vunpack.c.h.b16 %v1040_v42  ;;  %v6237_v53 = vpop.trf.xlu1 }
 0x3b7   : > { %v954_v5 = vpop.f32.mrf.mxu0  ;;  %v1019_v57 = vpop.f32.mrf.mxu1 }
 0x3b8   : > { %v1041_v16 = vpack.c.bf16 %v1019_v57, %v954_v5 }
 0x3ba   : > { %v3964_v31 = vunpack.c.l.b16 %v1041_v16  ;;  %v3965_v54 = vunpack.c.h.b16 %v1041_v16  ;;  %v1861_v40 = vpop.trf.xlu1 }
 0x3bc   : > { %v6213_v52 = vpack.c.b16 %v3964_v31, %v3962_v7  ;;  %v6215_v21 = vpack.c.b16 %v3965_v54, %v3963_v20  ;;  %v1789_v54 = vperm.slane %v6232_v10, 4 }
 0x3bd   : > { %4605 = vmatmul.msk.bf16.vlgmr.msra.gmra.mxu0 %vm1126_vm2, %v1853_v9 }
 0x3be   : > { %7842 = vst [vmem:[#allocation9_spill] sm:$0xff] %v6213_v52 }
 0x3bf   : > { %7843 = vst [vmem:[#allocation10_spill] sm:$0xff] %v6215_v21  ;;  %v1022_v34 = vpop.f32.mrf.mxu1 }
 0x3c0   : > { %v957_v28 = vpop.f32.mrf.mxu0 }
 0x3c1   : > { %v6217_v15 = vpack.c.bf16 %v1022_v34, %v957_v28  ;;  %v1793_v28 = vperm.slane %v1789_v54, 0 }
 0x3c2   : > { %1774 = vmatmul.bf16.gmra.mxu1 %v7702_v24  ;;  %v6243_v13 = vpop.trf.xlu1 }
 0x3c3   : > { %v1795_v6 = vmul.f32 0.0, %v1793_v28 }
 0x3c7   : > { %v6234_v33 = vpop.f32.mrf.mxu1 }
 0x3c8   : > { %v6221_v3 = vpop.f32.mrf.mxu0 }
 0x3ca   : > { %v1863_v11 = vpop.trf.xlu1 }
 0x3cd   : > { %4606 = vmatmul.msk.bf16.gmra.mxu0 %vm1126_vm2, %v1855_v32 }
 0x3d2   : > { %4621 = vmatmul.msk.bf16.vlgmr.msra.gmra.mxu1 %vm1126_vm2, %v1853_v9  ;;  %v6251_v22 = vpop.trf.xlu1 }
 0x3da   : > { %v1696_v19 = vpop.f32.mrf.mxu0  ;;  %v1865_v20 = vpop.trf.xlu1 }
 0x3dd   : > { %4607 = vmatmul.msk.bf16.gmra.mxu0 %vm1126_vm2, %v1857_v45 }
 0x3e2   : > { %v1698_v44 = vpop.f32.mrf.mxu0  ;;  %4622 = vmatmul.msk.bf16.gmra.mxu1 %vm1126_vm2, %v1855_v32  ;;  %v6258_v32 = vpop.trf.xlu1 }
 0x3ea   : > { %v1701_v27 = vpop.f32.mrf.mxu0 }
 0x3ed   : > { %4608 = vmatmul.msk.bf16.gmra.mxu0 %vm1126_vm2, %v1859_v29 }
 0x3ef   : > { %v1719_v1 = vpop.f32.mrf.mxu1 }
 0x3f0   : > { %v1720_v48 = vadd.f32 %v1719_v1, %v1696_v19 }
 0x3f2   : > { %v1703_v60 = vpop.f32.mrf.mxu0  ;;  %v6239_v12 = vadd.f32 %v1794_v41, %v1720_v48  ;;  %4623 = vmatmul.msk.bf16.gmra.mxu1 %vm1126_vm2, %v1857_v45 }
 0x3f4   : > { %7844 = vst [vmem:[#allocation28_spill] sm:$0xff] %v6239_v12 }
 0x3f7   : > { %v1721_v43 = vpop.f32.mrf.mxu1 }
 0x3f8   : > { %v1722_v30 = vadd.f32 %v1721_v43, %v1698_v44  ;;  %v1867_v44 = vpop.trf.xlu1 }
 0x3fa   : > { %v1706_v38 = vpop.f32.mrf.mxu0  ;;  %v6245_v18 = vadd.f32 %v1794_v41, %v1722_v30  ;;  %v3203_v30 = vunpack.c.h.b16 %v6202_v62 }
 0x3fc   : > { %7845 = vst [vmem:[#allocation30_spill] sm:$0xff] %v6245_v18 }
 0x3fd   : > { %4609 = vmatmul.msk.bf16.gmra.mxu0 %vm1126_vm2, %v1861_v40 }
 0x3ff   : > { %v1724_v35 = vpop.f32.mrf.mxu1 }
 0x400   : > { %v1725_v36 = vadd.f32 %v1724_v35, %v1701_v27 }
 0x402   : > { %v1708_v58 = vpop.f32.mrf.mxu0  ;;  %v6247_v39 = vadd.f32 %v1794_v41, %v1725_v36  ;;  %4624 = vmatmul.msk.bf16.gmra.mxu1 %vm1126_vm2, %v1859_v29 }
 0x404   : > { %7846 = vst [vmem:[#allocation26_spill] sm:$0xff] %v6247_v39 }
 0x407   : > { %v1726_v47 = vpop.f32.mrf.mxu1 }
 0x408   : > { %v1727_v51 = vadd.f32 %v1726_v47, %v1703_v60 }
 0x40a   : > { %v1742_v49 = vpop.f32.mrf.mxu0  ;;  %v6253_v42 = vadd.f32 %v1794_v41, %v1727_v51  ;;  %v1039_v41 = vpack.c.bf16 %v6208_v55, %v6206_v8 }
 0x40c   : > { %7847 = vst [vmem:[#allocation27_spill] sm:$0xff] %v6253_v42  ;;  %v3204_v35 = vunpack.c.l.b16 %v1039_v41 }
 0x40d   : > { %4610 = vmatmul.msk.bf16.gmra.mxu0 %vm1126_vm2, %v1863_v11 }
 0x40f   : > { %v1729_v5 = vpop.f32.mrf.mxu1 }
 0x410   : > { %v1730_v7 = vadd.f32 %v1729_v5, %v1706_v38 }
 0x412   : > { %v1744_v9 = vpop.f32.mrf.mxu0  ;;  %4625 = vmatmul.msk.bf16.gmra.mxu1 %vm1126_vm2, %v1861_v40  ;;  %v3202_v40 = vunpack.c.l.b16 %v6202_v62  ;;  %v1818_v62 = vmul.f32 0.0, %v6232_v10 }
 0x414   : > { %v6281_v47 = vpack.c.b16 %v3204_v35, %v3202_v40 }
 0x416   : > { %7852 = vst [vmem:[#allocation20_spill] sm:$0xff] %v6281_v47 }
 0x417   : > { %v1731_v16 = vpop.f32.mrf.mxu1 }
 0x41a   : > { %v1747_v57 = vpop.f32.mrf.mxu0 }
 0x41d   : > { %4611 = vmatmul.msk.bf16.gmra.mxu0 %vm1126_vm2, %v1865_v20 }
 0x41f   : > { %v1765_v34 = vpop.f32.mrf.mxu1 }
 0x420   : > { %v1766_v45 = vadd.f32 %v1765_v34, %v1742_v49  ;;  %v3205_v49 = vunpack.c.h.b16 %v1039_v41 }
 0x422   : > { %v1749_v31 = vpop.f32.mrf.mxu0  ;;  %v6260_v26 = vadd.f32 %v1795_v6, %v1766_v45  ;;  %4626 = vmatmul.msk.bf16.gmra.mxu1 %vm1126_vm2, %v1863_v11 }
 0x424   : > { %7848 = vst [vmem:[#allocation24_spill] sm:$0xff] %v6260_v26 }
 0x427   : > { %v1767_v27 = vpop.f32.mrf.mxu1 }
 0x428   : > { %v1768_v60 = vadd.f32 %v1767_v27, %v1744_v9  ;;  %v6283_v9 = vpack.c.b16 %v3205_v49, %v3203_v30  ;;  %v1868_v30 = vpop.trf.xlu1  ;;  %v3967_v49 = vunpack.c.h.b16 %v6217_v15 }
 0x42a   : > { %v1752_v19 = vpop.f32.mrf.mxu0  ;;  %v6264_v4 = vadd.f32 %v1795_v6, %v1768_v60  ;;  %7853 = vst [vmem:[#allocation21_spill] sm:$0xff] %v6283_v9 }
 0x42c   : > { %7849 = vst [vmem:[#allocation25_spill] sm:$0xff] %v6264_v4 }
 0x42d   : > { %4612 = vmatmul.msk.bf16.gmra.mxu0 %vm1126_vm2, %v1867_v44 }
 0x42f   : > { %v1770_v56 = vpop.f32.mrf.mxu1 }
 0x430   : > { %v1771_v38 = vadd.f32 %v1770_v56, %v1747_v57 }
 0x432   : > { %v1754_v29 = vpop.f32.mrf.mxu0  ;;  %v6268_v48 = vadd.f32 %v1795_v6, %v1771_v38  ;;  %4627 = vmatmul.msk.bf16.gmra.mxu1 %vm1126_vm2, %v1865_v20 }
 0x434   : > { %7850 = vst [vmem:[#allocation22_spill] sm:$0xff] %v6268_v48 }
 0x437   : > { %v1772_v43 = vpop.f32.mrf.mxu1 }
 0x438   : > { %v1773_v36 = vadd.f32 %v1772_v43, %v1749_v31  ;;  %v1043_v43 = vpack.c.bf16 %v6234_v33, %v6221_v3 }
 0x43a   : > { %v6266_v1 = vpop.f32.mrf.mxu0  ;;  %v6279_v11 = vadd.f32 %v1795_v6, %v1773_v36  ;;  %v3968_v36 = vunpack.c.l.b16 %v1043_v43 }
 0x43c   : > { %7851 = vst [vmem:[#allocation23_spill] sm:$0xff] %v6279_v11 }
 0x43d   : > { %4613 = vmatmul.msk.bf16.gmra.mxu0 %vm1126_vm2, %v6211_v25 }
 0x43f   : > { %v1775_v51 = vpop.f32.mrf.mxu1 }
 0x440   : > { %v1776_v8 = vadd.f32 %v1775_v51, %v1752_v19  ;;  %v3969_v51 = vunpack.c.h.b16 %v1043_v43 }
 0x442   : > { %v6276_v58 = vpop.f32.mrf.mxu0  ;;  %v1821_v55 = vrot.slane %v1776_v8, 4  ;;  %4628 = vmatmul.msk.bf16.gmra.mxu1 %vm1126_vm2, %v1867_v44 }
 0x444   : > { %v1822_v57 = vsel %vm373_vm0, %v1730_v7, %v1821_v55 }
 0x445   : > { %v6292_v20 = vadd.f32 %v1822_v57, %v1818_v62  ;;  %v6369_v62 = vpack.c.b16 %v3969_v51, %v3967_v49 }
 0x447   : > { %7854 = vst [vmem:[#allocation18_spill] sm:$0xff] %v6292_v20  ;;  %v1777_v16 = vpop.f32.mrf.mxu1 }
 0x448   : > { %7865 = vst [vmem:[#allocation41_spill] sm:$0xff] %v6369_v62 }
 0x44a   : > { %v6285_v5 = vpop.f32.mrf.mxu0 }
 0x44d   : > { %4614 = vmatmul.msk.bf16.gmra.mxu0 %vm1126_vm2, %v6223_v17 }
 0x44f   : > { %v6296_v54 = vpop.f32.mrf.mxu1 }
 0x450   : > { %7855 = vst [vmem:[#allocation19_spill] sm:$0xff] %v6296_v54 }
 0x452   : > { %v6294_v31 = vpop.f32.mrf.mxu0  ;;  %4629 = vmatmul.msk.bf16.gmra.mxu1 %vm1126_vm2, %v6211_v25 }
 0x457   : > { %v6304_v34 = vpop.f32.mrf.mxu1 }
 0x458   : > { %7856 = vst [vmem:[#allocation32_spill] sm:$0xff] %v6304_v34 }
 0x45a   : > { %v6298_v28 = vpop.f32.mrf.mxu0 }
 0x45d   : > { %4615 = vmatmul.msk.bf16.gmra.mxu0 %vm1126_vm2, %v6228_v59 }
 0x45f   : > { %v6308_v7 = vpop.f32.mrf.mxu1 }
 0x460   : > { %7857 = vst [vmem:[#allocation33_spill] sm:$0xff] %v6308_v7  ;;  %v2152_v63 = vmax.f32 %v6296_v54, %v6308_v7 }
 0x462   : > { %v6306_v10 = vpop.f32.mrf.mxu0  ;;  %4630 = vmatmul.msk.bf16.gmra.mxu1 %vm1126_vm2, %v6223_v17 }
 0x467   : > { %v6316_v45 = vpop.f32.mrf.mxu1 }
 0x468   : > { %7858 = vst [vmem:[#allocation34_spill] sm:$0xff] %v6316_v45  ;;  %v2153_v20 = vmax.f32 %v6304_v34, %v6316_v45  ;;  %v2115_v45 = vmax.f32 %v6266_v1, %v6285_v5 }
 0x46a   : > { %v6310_v19 = vpop.f32.mrf.mxu0 }
 0x46d   : > { %4616 = vmatmul.msk.bf16.gmra.mxu0 %vm1126_vm2, %v6237_v53 }
 0x46f   : > { %v6320_v6 = vpop.f32.mrf.mxu1 }
 0x470   : > { %7859 = vst [vmem:[#allocation35_spill] sm:$0xff] %v6320_v6  ;;  %v2154_v50 = vmax.f32 %v2152_v63, %v6320_v6 }
 0x472   : > { %v6318_v25 = vpop.f32.mrf.mxu0  ;;  %4631 = vmatmul.msk.bf16.gmra.mxu1 %vm1126_vm2, %v6228_v59 }
 0x477   : > { %v6328_v27 = vpop.f32.mrf.mxu1 }
 0x478   : > { %7860 = vst [vmem:[#allocation36_spill] sm:$0xff] %v6328_v27  ;;  %v2155_v61 = vmax.f32 %v2153_v20, %v6328_v27 }
 0x47a   : > { %v6322_v44 = vpop.f32.mrf.mxu0 }
 0x47d   : > { %4617 = vmatmul.msk.bf16.gmra.mxu0 %vm1126_vm2, %v6243_v13 }
 0x47f   : > { %v6332_v29 = vpop.f32.mrf.mxu1 }
 0x480   : > { %7861 = vst [vmem:[#allocation37_spill] sm:$0xff] %v6332_v29 }
 0x482   : > { %v6330_v17 = vpop.f32.mrf.mxu0  ;;  %4632 = vmatmul.msk.bf16.gmra.mxu1 %vm1126_vm2, %v6237_v53 }
 0x487   : > { %v6340_v56 = vpop.f32.mrf.mxu1 }
 0x488   : > { %7862 = vst [vmem:[#allocation38_spill] sm:$0xff] %v6340_v56  ;;  %v2157_v23 = vmax.f32 %v2155_v61, %v6340_v56  ;;  %v2117_v61 = vmax.f32 %v2115_v45, %v6298_v28 }
 0x48a   : > { %v6338_v60 = vpop.f32.mrf.mxu0 }
 0x48d   : > { %4618 = vmatmul.msk.bf16.gmra.mxu0 %vm1126_vm2, %v6251_v22 }
 0x48f   : > { %v6342_v59 = vpop.f32.mrf.mxu1 }
 0x492   : > { %v6344_v38 = vpop.f32.mrf.mxu0  ;;  %4633 = vmatmul.msk.bf16.gmra.mxu1 %vm1126_vm2, %v6243_v13  ;;  %v3966_v13 = vunpack.c.l.b16 %v6217_v15 }
 0x494   : > { %v6367_v55 = vpack.c.b16 %v3968_v36, %v3966_v13 }
 0x496   : > { %7864 = vst [vmem:[#allocation40_spill] sm:$0xff] %v6367_v55 }
 0x497   : > { %v6350_v41 = vpop.f32.mrf.mxu1 }
 0x498   : > { %7863 = vst [vmem:[#allocation39_spill] sm:$0xff] %v6350_v41  ;;  %v2159_v34 = vmax.f32 %v2157_v23, %v6350_v41  ;;  %v2119_v23 = vmax.f32 %v2117_v61, %v6310_v19 }
 0x49a   : > { %v6352_v53 = vpop.f32.mrf.mxu0 }
 0x49d   : > { %4619 = vmatmul.msk.bf16.gmra.mxu0 %vm1126_vm2, %v6258_v32 }
 0x49f   : > { %v6354_v40 = vpop.f32.mrf.mxu1 }
 0x4a2   : > { %4634 = vmatmul.msk.bf16.gmra.mxu1 %vm1126_vm2, %v6251_v22  ;;  %v6361_v35 = vpop.f32.mrf.mxu0 }
 0x4a7   : > { %v6365_v8 = vpop.f32.mrf.mxu1 }
 0x4a8   : > { %v2161_v63 = vmax.f32 %v2159_v34, %v6365_v8  ;;  %v2121_v34 = vmax.f32 %v2119_v23, %v6322_v44 }
 0x4aa   : > { %v6371_v3 = vpop.f32.mrf.mxu0 }
 0x4ad   : > { %4620 = vmatmul.msk.bf16.gmra.mxu0 %vm1126_vm2, %v1868_v30 }
 0x4af   : > { %v6373_v33 = vpop.f32.mrf.mxu1 }
 0x4b2   : > { %4635 = vmatmul.msk.bf16.gmra.mxu1 %vm1126_vm2, %v6258_v32  ;;  %v6379_v57 = vpop.f32.mrf.mxu0 }
 0x4b7   : > { %v6377_v22 = vpop.f32.mrf.mxu1 }
 0x4b8   : > { %v2163_v6 = vmax.f32 %v2161_v63, %v6377_v22  ;;  %v2123_v63 = vmax.f32 %v2121_v34, %v6338_v60 }
 0x4ba   : > { %v6383_v16 = vpop.f32.mrf.mxu0 }
 0x4bf   : > { %v6381_v15 = vpop.f32.mrf.mxu1 }
 0x4c2   : > { %4636 = vmatmul.msk.bf16.gmra.mxu1 %vm1126_vm2, %v1868_v30  ;;  %v6388_v13 = vpop.f32.mrf.mxu0 }
 0x4c7   : > { %v6386_v43 = vpop.f32.mrf.mxu1 }
 0x4ca   : > { %v6392_v36 = vpop.f32.mrf.mxu0 }
 0x4cf   : > { %v6390_v49 = vpop.f32.mrf.mxu1 }
 0x4d0   : > { %7866 = vst [vmem:[#allocation42_spill] sm:$0xff] %v6390_v49 }
 0x4d2   : > { %v6398_v24 = vpop.f32.mrf.mxu0 }
 0x4d7   : > { %v6394_v51 = vpop.f32.mrf.mxu1 }
 0x4d8   : > { %7867 = vst [vmem:[#allocation43_spill] sm:$0xff] %v6394_v51 }
 0x4da   : > { %v6402_v26 = vpop.f32.mrf.mxu0 }
 0x4df   : > { %v6396_v32 = vpop.f32.mrf.mxu1 }
 0x4e0   : > { %7868 = vst [vmem:[#allocation44_spill] sm:$0xff] %v6396_v32 }
 0x4e2   : > { %v6406_v30 = vpop.f32.mrf.mxu0 }
 0x4e7   : > { %v6400_v4 = vpop.f32.mrf.mxu1 }
 0x4e8   : > { %7869 = vst [vmem:[#allocation45_spill] sm:$0xff] %v6400_v4 }
 0x4ea   : > { %v6410_v11 = vpop.f32.mrf.mxu0 }
 0x4ef   : > { %v6404_v18 = vpop.f32.mrf.mxu1 }
 0x4f0   : > { %7870 = vst [vmem:[#allocation46_spill] sm:$0xff] %v6404_v18 }
 0x4f2   : > { %v6414_v42 = vpop.f32.mrf.mxu0 }
 0x4f7   : > { %v6408_v12 = vpop.f32.mrf.mxu1 }
 0x4f8   : > { %7871 = vst [vmem:[#allocation47_spill] sm:$0xff] %v6408_v12 }
 0x4fa   : > { %v6420_v21 = vpop.f32.mrf.mxu0 }
 0x4ff   : > { %v6412_v48 = vpop.f32.mrf.mxu1 }
 0x500   : > { %7872 = vst [vmem:[#allocation48_spill] sm:$0xff] %v6412_v48 }
 0x502   : > { %v6424_v52 = vpop.f32.mrf.mxu0 }
 0x507   : > { %v6416_v39 = vpop.f32.mrf.mxu1 }
 0x508   : > { %7873 = vst [vmem:[#allocation49_spill] sm:$0xff] %v6416_v39 }
 0x50a   : > { %v6428_v47 = vpop.f32.mrf.mxu0 }
 0x50b   : > { %7877 = vst [vmem:[#allocation53_spill] sm:$0xff] %v6428_v47  ;;  %v2116_v47 = vmax.f32 %v6276_v58, %v6294_v31 }
 0x50d   : > { %v2118_v54 = vmax.f32 %v2116_v47, %v6306_v10 }
 0x50f   : > { %v6418_v62 = vpop.f32.mrf.mxu1  ;;  %v2120_v7 = vmax.f32 %v2118_v54, %v6318_v25 }
 0x510   : > { %7874 = vst [vmem:[#allocation50_spill] sm:$0xff] %v6418_v62 }
 0x511   : > { %v2122_v56 = vmax.f32 %v2120_v7, %v6330_v17 }
 0x512   : > { %v6432_v2 = vpop.f32.mrf.mxu0 }
 0x513   : > { %7879 = vst [vmem:[#allocation55_spill] sm:$0xff] %v6432_v2  ;;  %v2156_v2 = vmax.f32 %v2154_v50, %v6332_v29  ;;  %v2124_v45 = vmax.f32 %v2122_v56, %v6344_v38 }
 0x515   : > { %v2158_v20 = vmax.f32 %v2156_v2, %v6342_v59  ;;  %v2165_v2 = vmax.f32 %v2163_v6, %v6386_v43  ;;  %v2126_v61 = vmax.f32 %v2124_v45, %v6361_v35  ;;  %v2125_v6 = vmax.f32 %v2123_v63, %v6352_v53 }
 0x517   : > { %v6422_v55 = vpop.f32.mrf.mxu1  ;;  %v2160_v27 = vmax.f32 %v2158_v20, %v6354_v40  ;;  %v2167_v20 = vmax.f32 %v2165_v2, %v6394_v51  ;;  %v2128_v23 = vmax.f32 %v2126_v61, %v6379_v57  ;;  %v2127_v2 = vmax.f32 %v2125_v6, %v6371_v3 }
 0x518   : > { %7875 = vst [vmem:[#allocation51_spill] sm:$0xff] %v6422_v55 }
 0x519   : > { %v2162_v47 = vmax.f32 %v2160_v27, %v6373_v33  ;;  %v2169_v27 = vmax.f32 %v2167_v20, %v6400_v4  ;;  %v2130_v51 = vmax.f32 %v2128_v23, %v6388_v13 }
 0x51a   : > { %v6438_v14 = vpop.f32.mrf.mxu0 }
 0x51b   : > { %v2164_v54 = vmax.f32 %v2162_v47, %v6381_v15  ;;  %v2171_v47 = vmax.f32 %v2169_v27, %v6408_v12  ;;  %v2132_v20 = vmax.f32 %v2130_v51, %v6398_v24 }
 0x51d   : > { %v2166_v7 = vmax.f32 %v2164_v54, %v6390_v49  ;;  %v2173_v45 = vmax.f32 %v2171_v47, %v6416_v39  ;;  %v2129_v54 = vmax.f32 %v2127_v2, %v6383_v16  ;;  %v2134_v27 = vmax.f32 %v2132_v20, %v6406_v30  ;;  %v7880_v49 = vld [vmem:[#allocation55_spill] sm:$0xff] }
 0x51f   : > { %v6426_v9 = vpop.f32.mrf.mxu1  ;;  %v2168_v56 = vmax.f32 %v2166_v7, %v6396_v32  ;;  %v2175_v61 = vmax.f32 %v2173_v45, %v6422_v55  ;;  %v2131_v7 = vmax.f32 %v2129_v54, %v6392_v36  ;;  %v2136_v2 = vmax.f32 %v2134_v27, %v6414_v42  ;;  %v7881_v27 = vld [vmem:[#allocation53_spill] sm:$0xff] }
 0x520   : > { %7876 = vst [vmem:[#allocation52_spill] sm:$0xff] %v6426_v9 }
 0x521   : > { %v2170_v34 = vmax.f32 %v2168_v56, %v6404_v18  ;;  %v2133_v47 = vmax.f32 %v2131_v7, %v6402_v26  ;;  %v2138_v54 = vmax.f32 %v2136_v2, %v6424_v52 }
 0x522   : > { %v6460_v50 = vpop.f32.mrf.mxu0 }
 0x523   : > { %v2172_v63 = vmax.f32 %v2170_v34, %v6412_v48  ;;  %v2135_v45 = vmax.f32 %v2133_v47, %v6410_v11  ;;  %v2140_v4 = vmax.f32 %v2138_v54, %v7880_v49 }
 0x525   : > { %v2174_v6 = vmax.f32 %v2172_v63, %v6418_v62 }
 0x527   : > { %v6430_v0 = vpop.f32.mrf.mxu1  ;;  %v2176_v51 = vmax.f32 %v2174_v6, %v6426_v9 }
 0x528   : > { %7878 = vst [vmem:[#allocation54_spill] sm:$0xff] %v6430_v0  ;;  %v2177_v23 = vmax.f32 %v2175_v61, %v6430_v0  ;;  %v2137_v61 = vmax.f32 %v2135_v45, %v6420_v21 }
 0x52a   : > { %v6484_v41 = vpop.f32.mrf.mxu0  ;;  %v2139_v6 = vmax.f32 %v2137_v61, %v7881_v27 }
 0x52c   : > { %v2141_v47 = vmax.f32 %v2139_v6, %v6438_v14 }
 0x52f   : > { %v6434_v46 = vpop.f32.mrf.mxu1 }
 0x530   : > { %v2178_v20 = vmax.f32 %v2176_v51, %v6434_v46  ;;  %v2143_v51 = vmax.f32 %v2141_v47, %v6484_v41 }
 0x532   : > { %v6507_v32 = vpop.f32.mrf.mxu0 }
 0x537   : > { %v6445_v37 = vpop.f32.mrf.mxu1 }
 0x538   : > { %v2179_v34 = vmax.f32 %v2177_v23, %v6445_v37  ;;  %v2142_v23 = vmax.f32 %v2140_v4, %v6460_v50 }
 0x53a   : > { %v2144_v2 = vmax.f32 %v2142_v23, %v6507_v32 }
 0x53c   : > { %v2145_v18 = vmax.f32 %v2143_v51, %v2144_v2 }
 0x53e   : > { %v2146_v39 = vrot.slane %v2145_v18, 4 }
 0x53f   : > { %v6470_v29 = vpop.f32.mrf.mxu1 }
 0x540   : > { %v2180_v7 = vmax.f32 %v2178_v20, %v6470_v29  ;;  %v2147_v48 = vmax.f32 %v2145_v18, %v2146_v39 }
 0x542   : > { %v2148_v55 = vrot.slane %v2147_v48, 2 }
 0x544   : > { %v2149_v0 = vmax.f32 %v2147_v48, %v2148_v55 }
 0x546   : > { %v2150_v9 = vrot.slane %v2149_v0, 1 }
 0x547   : > { %v6494_v56 = vpop.f32.mrf.mxu1 }
 0x548   : > { %v2181_v63 = vmax.f32 %v2179_v34, %v6494_v56 }
 0x54a   : > { %v2182_v12 = vmax.f32 %v2180_v7, %v2181_v63  ;;  %v2151_v63 = vmax.f32 %v2149_v0, %v2150_v9 }
 0x54c   : > { %v2183_v34 = vrot.slane %v2182_v12, 4 }
 0x54e   : > { %v2184_v45 = vmax.f32 %v2182_v12, %v2183_v34 }
 0x550   : > { %v2185_v54 = vrot.slane %v2184_v45, 2 }
 0x552   : > { %v2186_v20 = vmax.f32 %v2184_v45, %v2185_v54 }
 0x554   : > { %v2187_v62 = vrot.slane %v2186_v20, 1 }
 0x556   : > { %v2188_v61 = vmax.f32 %v2186_v20, %v2187_v62 }
 0x558   : > { %v2191_v4 = vrot.slane %v2188_v61, 4 }
 0x55a   : > { %v2192_v7 = vsel %vm373_vm0, %v2151_v63, %v2191_v4 }
 0x55b   : > { %v6515_v6 = vrot.slane %v2192_v7, 7 }
 0x55d   : > { %v2200_v23 = vperm.slane %v6515_v6, 1  ;;  %v2201_v7 = vperm.slane %v6515_v6, 5 }
 0x55f   : > { %v6518_v47 = vperm.slane %v2200_v23, 1 }
 0x561   : > { %v2234_v12 = vsub.f32 %v6371_v3, %v6518_v47  ;;  %v2236_v18 = vsub.f32 %v6379_v57, %v6518_v47  ;;  %v2230_v39 = vsub.f32 %v6352_v53, %v6518_v47  ;;  %v2232_v0 = vsub.f32 %v6361_v35, %v6518_v47 }
 0x562   : > { %v2226_v55 = vsub.f32 %v6338_v60, %v6518_v47  ;;  %v2228_v2 = vsub.f32 %v6344_v38, %v6518_v47  ;;  %v2222_v3 = vsub.f32 %v6322_v44, %v6518_v47  ;;  %v2224_v53 = vsub.f32 %v6330_v17, %v6518_v47 }
 0x563   : > { %v2326_v48 = vmul.f32 1.442695, %v2234_v12  ;;  %v2330_v9 = vmul.f32 1.442695, %v2236_v18  ;;  %v2318_v62 = vmul.f32 1.442695, %v2230_v39  ;;  %v2218_v60 = vsub.f32 %v6310_v19, %v6518_v47 }
 0x564   : > { %v2322_v51 = vmul.f32 1.442695, %v2232_v0  ;;  %v2310_v57 = vmul.f32 1.442695, %v2226_v55  ;;  %v2314_v35 = vmul.f32 1.442695, %v2228_v2  ;;  %v2220_v54 = vsub.f32 %v6318_v25, %v6518_v47 }
 0x565   : > { %4948 = vpow2.f32 %v2326_v48  ;;  %v2302_v45 = vmul.f32 1.442695, %v2222_v3  ;;  %v2306_v20 = vmul.f32 1.442695, %v2224_v53  ;;  %v2214_v17 = vsub.f32 %v6298_v28, %v6518_v47 }
 0x566   : > { %4950 = vpow2.f32 %v2330_v9  ;;  %v2294_v63 = vmul.f32 1.442695, %v2218_v60  ;;  %v2216_v19 = vsub.f32 %v6306_v10, %v6518_v47  ;;  %v2298_v23 = vmul.f32 1.442695, %v2220_v54 }
 0x567   : > { %4952 = vpow2.f32 %v2318_v62  ;;  %v2210_v39 = vsub.f32 %v6285_v5, %v6518_v47  ;;  %v2286_v0 = vmul.f32 1.442695, %v2214_v17  ;;  %v6547_v28 = vperm.slane %v2201_v7, 1 }
 0x568   : > { %4954 = vpow2.f32 %v2322_v51  ;;  %v2212_v48 = vsub.f32 %v6294_v31, %v6518_v47  ;;  %v2290_v9 = vmul.f32 1.442695, %v2216_v19  ;;  %v2206_v2 = vsub.f32 %v6266_v1, %v6518_v47 }
 0x569   : > { %4956 = vpow2.f32 %v2310_v57  ;;  %v2208_v51 = vsub.f32 %v6276_v58, %v6518_v47  ;;  %v2278_v5 = vmul.f32 1.442695, %v2210_v39  ;;  %v2235_v3 = vsub.f32 %v6381_v15, %v6547_v28  ;;  %v7882_v39 = vld [vmem:[#allocation31_spill] sm:$0xff] }
 0x56a   : > { %4958 = vpow2.f32 %v2314_v35  ;;  %v2282_v57 = vmul.f32 1.442695, %v2212_v48  ;;  %v2237_v53 = vsub.f32 %v6386_v43, %v6547_v28  ;;  %v2227_v1 = vsub.f32 %v6354_v40, %v6547_v28 }
 0x56b   : > { %v4949_v34 = vpop.eup %4948  ;;  %4960 = vpow2.f32 %v2302_v45  ;;  %v2270_v60 = vmul.f32 1.442695, %v2206_v2  ;;  %v2231_v58 = vsub.f32 %v6373_v33, %v6547_v28  ;;  %v2274_v45 = vmul.f32 1.442695, %v2208_v51  ;;  %v7885_v51 = vld [vmem:[#allocation37_spill] sm:$0xff] }
 0x56c   : > { %v4951_v38 = vpop.eup %4950  ;;  %4962 = vpow2.f32 %v2306_v20  ;;  %v2266_v15 = vsub.f32 %v6484_v41, %v6518_v47  ;;  %v2233_v43 = vsub.f32 %v6377_v22, %v6547_v28  ;;  %v2332_v20 = vmul.f32 1.442695, %v2237_v53 }
 0x56d   : > { %v4953_v44 = vpop.eup %4952  ;;  %v2412_v61 = vpack.c.bf16 %v4951_v38, %v4949_v34  ;;  %4964 = vpow2.f32 %v2294_v63  ;;  %v2328_v38 = vmul.f32 1.442695, %v2235_v3  ;;  %v2268_v40 = vsub.f32 %v6507_v32, %v6518_v47 }
 0x56e   : > { %v4955_v4 = vpop.eup %4954  ;;  %4966 = vpow2.f32 %v2298_v23  ;;  %v2312_v33 = vmul.f32 1.442695, %v2227_v1  ;;  %v2320_v17 = vmul.f32 1.442695, %v2231_v58  ;;  %v2264_v41 = vsub.f32 %v6460_v50, %v6518_v47 }
 0x56f   : > { %2450 = vmatpush.bf16.msrb.mxu2 %v2412_v61  ;;  %v4957_v12 = vpop.eup %4956  ;;  %v2410_v25 = vpack.c.bf16 %v4955_v4, %v4953_v44  ;;  %4968 = vpow2.f32 %v2286_v0  ;;  %v2262_v4 = vsub.f32 %v6438_v14, %v6518_v47  ;;  %v2390_v63 = vmul.f32 1.442695, %v2266_v15  ;;  %v7883_v0 = vld [vmem:[#allocation17_spill] sm:$0xff]  ;;  %v7887_v15 = vld [vmem:[#allocation38_spill] sm:$0xff] }
 0x570   : > { %v4959_v18 = vpop.eup %4958  ;;  %4970 = vpow2.f32 %v2290_v9  ;;  %v2229_v7 = vsub.f32 %v6365_v8, %v6547_v28  ;;  %v2324_v19 = vmul.f32 1.442695, %v2233_v43  ;;  %v2394_v14 = vmul.f32 1.442695, %v2268_v40 }
 0x571   : > { %v4961_v55 = vpop.eup %4960  ;;  %v2408_v10 = vpack.c.bf16 %v4959_v18, %v4957_v12  ;;  %4972 = vpow2.f32 %v2278_v5  ;;  %v2223_v12 = vsub.f32 %v6342_v59, %v6547_v28  ;;  %v2382_v50 = vmul.f32 1.442695, %v2262_v4  ;;  %v7884_v59 = vld [vmem:[#allocation39_spill] sm:$0xff] }
 0x572   : > { %v4963_v62 = vpop.eup %4962  ;;  %4974 = vpow2.f32 %v2282_v57  ;;  %v6581_v48 = vpack.c.bf16 %v7883_v0, %v7882_v39  ;;  %v2260_v8 = vsub.f32 %v7880_v49, %v6518_v47  ;;  %v2386_v9 = vmul.f32 1.442695, %v2264_v41 }
 0x573   : > { %2451 = vmatpush.bf16.msrb.mxu2 %v2410_v25  ;;  %v4965_v31 = vpop.eup %4964  ;;  %v2406_v35 = vpack.c.bf16 %v4963_v62, %v4961_v55  ;;  %4976 = vpow2.f32 %v2270_v60  ;;  %v2258_v25 = vsub.f32 %v7881_v27, %v6518_v47  ;;  %v2316_v62 = vmul.f32 1.442695, %v2229_v7 }
 0x574   : > { %v4967_v34 = vpop.eup %4966  ;;  %4978 = vpow2.f32 %v2274_v45  ;;  %v2219_v5 = vsub.f32 %v7885_v51, %v6547_v28  ;;  %v2304_v3 = vmul.f32 1.442695, %v2223_v12  ;;  %v2254_v49 = vsub.f32 %v6420_v21, %v6518_v47 }
 0x575   : > { %v4969_v54 = vpop.eup %4968  ;;  %v2404_v44 = vpack.c.bf16 %v4967_v34, %v4965_v31  ;;  %4980 = vpow2.f32 %v2328_v38  ;;  %v7886_v31 = vld [vmem:[#allocation29_spill] sm:$0xff]  ;;  %v2436_v1 = vunpack.c.l.b16 %v6581_v48  ;;  %v2256_v60 = vsub.f32 %v6424_v52, %v6518_v47 }
 0x576   : > { %v4971_v61 = vpop.eup %4970  ;;  %4982 = vpow2.f32 %v2332_v20  ;;  %v2434_v53 = vunpack.c.l.b16 %v7886_v31  ;;  %v2378_v58 = vmul.f32 1.442695, %v2260_v8  ;;  %v2221_v38 = vsub.f32 %v7887_v15, %v6547_v28  ;;  %v7888_v20 = vld [vmem:[#allocation35_spill] sm:$0xff] }
 0x577   : > { %2452 = vmatpush.bf16.msrb.mxu2 %v2408_v10  ;;  %v4973_v22 = vpop.eup %4972  ;;  %v2402_v32 = vpack.c.bf16 %v4971_v61, %v4969_v54  ;;  %4984 = vpow2.f32 %v2312_v33  ;;  %v2225_v10 = vsub.f32 %v7884_v59, %v6547_v28  ;;  %v2296_v61 = vmul.f32 1.442695, %v2219_v5 }
 0x578   : > { %v4975_v23 = vpop.eup %4974  ;;  %4986 = vpow2.f32 %v2320_v17  ;;  %v2250_v52 = vsub.f32 %v6410_v11, %v6518_v47  ;;  %v2366_v4 = vmul.f32 1.442695, %v2254_v49  ;;  %v6603_v41 = vpack.c.b16 %v2436_v1, %v2434_v53  ;;  %v7893_v1 = vld [vmem:[#allocation16_spill] sm:$0xff] }
 0x579   : > { %v4977_v18 = vpop.eup %4976  ;;  %4988 = vpow2.f32 %v2390_v63  ;;  %v2400_v27 = vpack.c.bf16 %v4975_v23, %v4973_v22  ;;  %v2308_v54 = vmul.f32 1.442695, %v2225_v10  ;;  %v2252_v63 = vsub.f32 %v6414_v42, %v6518_v47  ;;  %v7891_v10 = vld [vmem:[#allocation34_spill] sm:$0xff] }
 0x57a   : > { %v4979_v55 = vpop.eup %4978  ;;  %4990 = vpow2.f32 %v2324_v19  ;;  %v2370_v22 = vmul.f32 1.442695, %v2256_v60  ;;  %v7889_v19 = vld [vmem:[#allocation36_spill] sm:$0xff]  ;;  %v2300_v23 = vmul.f32 1.442695, %v2221_v38  ;;  %v2246_v39 = vsub.f32 %v6402_v26, %v6518_v47  ;;  %v7892_v26 = vld [vmem:[#allocation19_spill] sm:$0xff] }
 0x57b   : > { %2453 = vmatpush.bf16.msrb.mxu2 %v2406_v35  ;;  %v4981_v2 = vpop.eup %4980  ;;  %4992 = vpow2.f32 %v2394_v14  ;;  %v2374_v35 = vmul.f32 1.442695, %v2258_v25  ;;  %v2398_v43 = vpack.c.bf16 %v4979_v55, %v4977_v18  ;;  %v7890_v14 = vld [vmem:[#allocation33_spill] sm:$0xff]  ;;  %v2358_v0 = vmul.f32 1.442695, %v2250_v52 }
 0x57c   : > { %v4983_v57 = vpop.eup %4982  ;;  %4994 = vpow2.f32 %v2382_v50  ;;  %v2211_v25 = vsub.f32 %v7890_v14, %v6547_v28  ;;  %v2362_v55 = vmul.f32 1.442695, %v2252_v63  ;;  %v2207_v5 = vsub.f32 %v7892_v26, %v6547_v28  ;;  %v7894_v60 = vld [vmem:[#allocation13_spill] sm:$0xff] }
 0x57d   : > { %v6592_v34 = vpop.eup %4984  ;;  %4996 = vpow2.f32 %v2386_v9  ;;  %v2413_v40 = vpack.c.bf16 %v4983_v57, %v4981_v2  ;;  %v2248_v9 = vsub.f32 %v6406_v30, %v6518_v47  ;;  %v2242_v30 = vsub.f32 %v6392_v36, %v6518_v47 }
 0x57e   : > { %v4987_v45 = vpop.eup %4986  ;;  %4998 = vpow2.f32 %v2316_v62  ;;  %v2213_v62 = vsub.f32 %v7891_v10, %v6547_v28  ;;  %v2350_v49 = vmul.f32 1.442695, %v2246_v39  ;;  %v2238_v52 = vsub.f32 %v6383_v16, %v6518_v47 }
 0x57f   : > { %2454 = vmatpush.bf16.msrb.mxu2 %v2404_v44  ;;  %v4989_v21 = vpop.eup %4988  ;;  %v2215_v44 = vsub.f32 %v7888_v20, %v6547_v28  ;;  %5000 = vpow2.f32 %v2304_v3  ;;  %v2280_v3 = vmul.f32 1.442695, %v2211_v25  ;;  %v2354_v15 = vmul.f32 1.442695, %v2248_v9 }
 0x580   : > { %v4991_v33 = vpop.eup %4990  ;;  %5002 = vpow2.f32 %v2374_v35  ;;  %v2269_v20 = vsub.f32 %v6494_v56, %v6547_v28  ;;  %v2334_v25 = vmul.f32 1.442695, %v2238_v52 }
 0x581   : > { %v4993_v17 = vpop.eup %4992  ;;  %5004 = vpow2.f32 %v2378_v58  ;;  %v2288_v50 = vmul.f32 1.442695, %v2215_v44  ;;  %v2411_v18 = vpack.c.bf16 %v4991_v33, %v4987_v45  ;;  %v6625_v58 = vpack.c.bf16 %v7894_v60, %v7893_v1  ;;  %v7896_v33 = vld [vmem:[#allocation15_spill] sm:$0xff]  ;;  %v4751_v1 = vld [vmem:[#allocation2 + $0x54] sm:$0xf0] }
 0x582   : > { %v4995_v7 = vpop.eup %4994  ;;  %5006 = vpow2.f32 %v2308_v54  ;;  %v2428_v12 = vpack.c.bf16 %v4993_v17, %v4989_v21  ;;  %v2244_v45 = vsub.f32 %v6398_v24, %v6518_v47  ;;  %v2272_v44 = vmul.f32 1.442695, %v2207_v5 }
 0x583   : > { %2455 = vmatpush.bf16.msrb.mxu2 %v2402_v32  ;;  %v2217_v32 = vsub.f32 %v7889_v19, %v6547_v28  ;;  %v4997_v11 = vpop.eup %4996  ;;  %5008 = vpow2.f32 %v2296_v61  ;;  %v2438_v24 = vunpack.c.l.b16 %v7896_v33  ;;  %v2440_v63 = vunpack.c.l.b16 %v6625_v58 }
 0x584   : > { %v4999_v42 = vpop.eup %4998  ;;  %5010 = vpow2.f32 %v2366_v4  ;;  %2473 = vmatpush.bf16.msrb.mxu3 %v2428_v12  ;;  %v2426_v2 = vpack.c.bf16 %v4997_v11, %v4995_v7  ;;  %v2342_v4 = vmul.f32 1.442695, %v2242_v30  ;;  %v2346_v7 = vmul.f32 1.442695, %v2244_v45  ;;  %v7899_v30 = vld [vmem:[#allocation50_spill] sm:$0xff]  ;;  %v7900_v45 = vld [vmem:[#allocation51_spill] sm:$0xff] }
 0x585   : > { %v5001_v8 = vpop.eup %5000  ;;  %5012 = vpow2.f32 %v2370_v22  ;;  %v2409_v57 = vpack.c.bf16 %v4999_v42, %v6592_v34  ;;  %v7895_v34 = vld [vmem:[#allocation32_spill] sm:$0xff]  ;;  %v2240_v22 = vsub.f32 %v6388_v13, %v6518_v47  ;;  %v2267_v19 = vsub.f32 %v6470_v29, %v6547_v28 }
 0x586   : > { %v5003_v59 = vpop.eup %5002  ;;  %5014 = vpow2.f32 %v2300_v23  ;;  %v2209_v54 = vsub.f32 %v7895_v34, %v6547_v28  ;;  %v2396_v12 = vmul.f32 1.442695, %v2269_v20  ;;  %v2263_v13 = vsub.f32 %v6434_v46, %v6547_v28 }
 0x587   : > { %2456 = vmatpush.bf16.msrb.mxu2 %v2400_v27  ;;  %v2292_v27 = vmul.f32 1.442695, %v2217_v32  ;;  %v5005_v51 = vpop.eup %5004  ;;  %5016 = vpow2.f32 %v2288_v50  ;;  %v2338_v47 = vmul.f32 1.442695, %v2240_v22  ;;  %v2265_v42 = vsub.f32 %v6445_v37, %v6547_v28  ;;  %v7898_v37 = vld [vmem:[#allocation54_spill] sm:$0xff] }
 0x588   : > { %v5007_v53 = vpop.eup %5006  ;;  %5018 = vpow2.f32 %v2358_v0  ;;  %2474 = vmatpush.bf16.msrb.mxu3 %v2426_v2  ;;  %v2424_v36 = vpack.c.bf16 %v5005_v51, %v5003_v59  ;;  %v2276_v32 = vmul.f32 1.442695, %v2209_v54  ;;  %v2392_v39 = vmul.f32 1.442695, %v2267_v19  ;;  %v7897_v59 = vld [vmem:[#allocation52_spill] sm:$0xff] }
 0x589   : > { %v5009_v35 = vpop.eup %5008  ;;  %5020 = vpow2.f32 %v2362_v55  ;;  %v2407_v61 = vpack.c.bf16 %v5007_v53, %v5001_v8  ;;  %v2259_v10 = vsub.f32 %v7897_v59, %v6547_v28  ;;  %v2261_v2 = vsub.f32 %v7898_v37, %v6547_v28  ;;  %v4749_v19 = vld [vmem:[#allocation2 + $0x44] sm:$0xf0] }
 0x58a   : > { %v5011_v38 = vpop.eup %5010  ;;  %5022 = vpow2.f32 %v2292_v27  ;;  %v2388_v51 = vmul.f32 1.442695, %v2265_v42  ;;  %v2435_v20 = vunpack.c.h.b16 %v7886_v31 }
 0x58b   : > { %2457 = vmatpush.bf16.msrb.mxu2 %v2398_v43  ;;  %v2284_v43 = vmul.f32 1.442695, %v2213_v62  ;;  %v5013_v21 = vpop.eup %5012  ;;  %5024 = vpow2.f32 %v2280_v3  ;;  %v2384_v62 = vmul.f32 1.442695, %v2263_v13 }
 0x58c   : > { %5026 = vpow2.f32 %v2350_v49  ;;  %2475 = vmatpush.bf16.msrb.mxu3 %v2424_v36  ;;  %v2422_v23 = vpack.c.bf16 %v5013_v21, %v5011_v38  ;;  %v2255_v49 = vsub.f32 %v7899_v30, %v6547_v28  ;;  %v2380_v38 = vmul.f32 1.442695, %v2261_v2  ;;  %v4647_v36 = vld [vmem:[#allocation2 + $0x50] sm:$0xf] }
 0x58d   : > { %5028 = vpow2.f32 %v2354_v15  ;;  %v2257_v15 = vsub.f32 %v7900_v45, %v6547_v28  ;;  %v2439_v30 = vunpack.c.h.b16 %v7896_v33 }
 0x58e   : > { %2458 = vmatmul.bf16.vlgmr.msrb.gmra.mxu2 %v6603_v41  ;;  %5030 = vpow2.f32 %v2284_v43  ;;  %v2368_v52 = vmul.f32 1.442695, %v2255_v49  ;;  %v2441_v49 = vunpack.c.h.b16 %v6625_v58 }
 0x58f   : > { %2496 = vmatpush.bf16.msra.mxu2 %v2413_v40  ;;  %v5015_v40 = vpop.eup %5014  ;;  %5032 = vpow2.f32 %v2272_v44  ;;  %v4648_v44 = vor.u32 %v4751_v1, %v4647_v36  ;;  %v2372_v22 = vmul.f32 1.442695, %v2257_v15  ;;  %v4649_v36 = vld [vmem:[#allocation2 + $0x58] sm:$0xf0] }
 0x590   : > { %v5017_v17 = vpop.eup %5016  ;;  %v2405_v11 = vpack.c.bf16 %v5015_v40, %v5009_v35  ;;  %5034 = vpow2.f32 %v2342_v4  ;;  %2476 = vmatpush.bf16.msrb.mxu3 %v2422_v23  ;;  %v2376_v35 = vmul.f32 1.442695, %v2259_v10  ;;  %v7901_v40 = vld [vmem:[#allocation48_spill] sm:$0xff]  ;;  %v4639_v4 = vld [vmem:[#allocation2 + $0x40] sm:$0xf] }
 0x591   : > { %v5019_v56 = vpop.eup %5018  ;;  %5036 = vpow2.f32 %v2346_v7 }
 0x592   : > { %v5021_v16 = vpop.eup %5020  ;;  %5038 = vpow2.f32 %v2276_v32 }
 0x593   : > { %2497 = vmatpush.bf16.msra.mxu2 %v2411_v18  ;;  %v5023_v14 = vpop.eup %5022  ;;  %v6643_v18 = vpack.c.b16 %v2440_v63, %v2438_v24  ;;  %v2420_v0 = vpack.c.bf16 %v5021_v16, %v5019_v56  ;;  %5040 = vpow2.f32 %v2396_v12  ;;  %v2251_v24 = vsub.f32 %v7901_v40, %v6547_v28  ;;  %v7903_v16 = vld [vmem:[#allocation46_spill] sm:$0xff]  ;;  %v4641_v40 = vld [vmem:[#allocation2 + $0x48] sm:$0xf0] }
 0x594   : > { %v5025_v50 = vpop.eup %5024  ;;  %v2403_v9 = vpack.c.bf16 %v5023_v14, %v5017_v17  ;;  %5042 = vpow2.f32 %v2334_v25  ;;  %v7902_v17 = vld [vmem:[#allocation49_spill] sm:$0xff]  ;;  %v2247_v12 = vsub.f32 %v7903_v16, %v6547_v28  ;;  %v7904_v14 = vld [vmem:[#allocation47_spill] sm:$0xff] }
 0x595   : > { %v5027_v29 = vpop.eup %5026  ;;  %2477 = vmatpush.bf16.msrb.mxu3 %v2420_v0  ;;  %5044 = vpow2.f32 %v2338_v47  ;;  %v2253_v63 = vsub.f32 %v7902_v17, %v6547_v28  ;;  %v2249_v25 = vsub.f32 %v7904_v14, %v6547_v28 }
 0x596   : > { %v5029_v8 = vpop.eup %5028  ;;  %5046 = vpow2.f32 %v2392_v39  ;;  %v7906_v39 = vld [vmem:[#allocation44_spill] sm:$0xff] }
 0x597   : > { %2498 = vmatpush.bf16.msra.mxu2 %v2409_v57  ;;  %v5031_v55 = vpop.eup %5030  ;;  %v2418_v26 = vpack.c.bf16 %v5029_v8, %v5027_v29  ;;  %5048 = vpow2.f32 %v2384_v62  ;;  %v7905_v29 = vmov 1065369472   ;;  %v2243_v0 = vsub.f32 %v7906_v39, %v6547_v28 }
 0x598   : > { %v5033_v46 = vpop.eup %5032  ;;  %v2401_v3 = vpack.c.bf16 %v5031_v55, %v5025_v50  ;;  %5050 = vpow2.f32 %v2388_v51  ;;  %v2364_v50 = vmul.f32 1.442695, %v2253_v63  ;;  %v2352_v8 = vmul.f32 1.442695, %v2247_v12  ;;  %v7909_v51 = vld [vmem:[#allocation43_spill] sm:$0xff] }
 0x599   : > { %v5035_v27 = vpop.eup %5034  ;;  %2478 = vmatpush.bf16.msrb.mxu3 %v2418_v26  ;;  %5052 = vpow2.f32 %v2376_v35  ;;  %v2344_v2 = vmul.f32 1.442695, %v2243_v0  ;;  %v2241_v26 = vsub.f32 %v7909_v51, %v6547_v28 }
 0x59a   : > { %v5037_v5 = vpop.eup %5036  ;;  %5054 = vpow2.f32 %v2380_v38 }
 0x59b   : > { %2499 = vmatpush.bf16.msra.mxu2 %v2407_v61  ;;  %v5039_v57 = vpop.eup %5038  ;;  %v2416_v34 = vpack.c.bf16 %v5037_v5, %v5035_v27  ;;  %v2437_v61 = vunpack.c.h.b16 %v6581_v48  ;;  %v4640_v48 = vor.u32 %v4749_v19, %v4639_v4  ;;  %5056 = vpow2.f32 %v2368_v52  ;;  %v7908_v27 = vld [vmem:[#allocation42_spill] sm:$0xff] }
 0x59c   : > { %v5041_v53 = vpop.eup %5040  ;;  %v2399_v43 = vpack.c.bf16 %v5039_v57, %v5033_v46  ;;  %5058 = vpow2.f32 %v2372_v22  ;;  %v2356_v46 = vmul.f32 1.442695, %v2249_v25  ;;  %v2239_v37 = vsub.f32 %v7908_v27, %v6547_v28 }
 0x59d   : > { %v5043_v60 = vpop.eup %5042  ;;  %2479 = vmatpush.bf16.msrb.mxu3 %v2416_v34  ;;  %v6662_v23 = vpack.c.b16 %v2437_v61, %v2435_v20  ;;  %v2340_v1 = vmul.f32 1.442695, %v2241_v26  ;;  %v4750_v20 = vld [vmem:[#allocation2 + $0x54] sm:$0xf]  ;;  %v4748_v61 = vld [vmem:[#allocation2 + $0x44] sm:$0xf] }
 0x59e   : > { %2463 = vmatmul.bf16.gmra.mxu2 %v6643_v18  ;;  %v5045_v54 = vpop.eup %5044  ;;  %v2336_v35 = vmul.f32 1.442695, %v2239_v37 }
 0x59f   : > { %2500 = vmatpush.bf16.msra.mxu2 %v2405_v11  ;;  %v5047_v21 = vpop.eup %5046  ;;  %v2414_v7 = vpack.c.bf16 %v5045_v54, %v5043_v60  ;;  %v2360_v11 = vmul.f32 1.442695, %v2251_v24  ;;  %v4644_v24 = vor.u32 %v4748_v61, %v4641_v40 }
 0x5a0   : > { %v5049_v56 = vpop.eup %5048  ;;  %v2429_v31 = vpack.c.bf16 %v5041_v53, %v5047_v21 }
 0x5a1   : > { %v5051_v32 = vpop.eup %5050  ;;  %2480 = vmatpush.bf16.msrb.mxu3 %v2414_v7  ;;  %5060 = vpow2.f32 %v2360_v11  ;;  %v2196_v7 = vsub.f32 -inf, %v6515_v6 }
 0x5a2   : > { %v5053_v13 = vpop.eup %5052  ;;  %v2427_v47 = vpack.c.bf16 %v5051_v32, %v5049_v56  ;;  %5062 = vpow2.f32 %v2364_v50 }
 0x5a3   : > { %2501 = vmatpush.bf16.msra.mxu2 %v2403_v9  ;;  %v5055_v42 = vpop.eup %5054  ;;  %v7907_v9 = vld [vmem:[#allocation45_spill] sm:$0xff]  ;;  %5064 = vpow2.f32 %v2352_v8  ;;  %v2197_v19 = vmul.f32 1.442695, %v2196_v7 }
 0x5a4   : > { %2481 = vmatmul.bf16.vlgmr.msrb.gmra.mxu3 %v6662_v23  ;;  %v2245_v55 = vsub.f32 %v7907_v9, %v6547_v28  ;;  %v5057_v59 = vpop.eup %5056  ;;  %v2425_v10 = vpack.c.bf16 %v5055_v42, %v5053_v13  ;;  %5066 = vpow2.f32 %v2356_v46  ;;  %v2445_v28 = vpack.c.b16 %v2441_v49, %v2439_v30 }
 0x5a5   : > { %2519 = vmatpush.bf16.msra.mxu3 %v2429_v31  ;;  %v5059_v62 = vpop.eup %5058  ;;  %5068 = vpow2.f32 %v2344_v2 }
 0x5a6   : > { %v2348_v5 = vmul.f32 1.442695, %v2245_v55  ;;  %v2423_v57 = vpack.c.bf16 %v5059_v62, %v5057_v59 }
 0x5a7   : > { %2502 = vmatpush.bf16.msra.mxu2 %v2401_v3  ;;  %v5061_v3 = vpop.eup %5060 }
 0x5a8   : > { %v5063_v53 = vpop.eup %5062  ;;  %5070 = vpow2.f32 %v2348_v5 }
 0x5a9   : > { %2520 = vmatpush.bf16.msra.mxu3 %v2427_v47  ;;  %v5065_v60 = vpop.eup %5064  ;;  %v2421_v45 = vpack.c.bf16 %v5063_v53, %v5061_v3  ;;  %5072 = vpow2.f32 %v2336_v35 }
 0x5aa   : > { %v5067_v15 = vpop.eup %5066  ;;  %5074 = vpow2.f32 %v2340_v1 }
 0x5ab   : > { %2503 = vmatpush.bf16.msra.mxu2 %v2399_v43  ;;  %v5069_v38 = vpop.eup %5068  ;;  %v2419_v34 = vpack.c.bf16 %v5067_v15, %v5065_v60  ;;  %5076 = vpow2.f32 %v2197_v19 }
 0x5ad   : > { %2521 = vmatpush.bf16.msra.mxu3 %v2425_v10 }
 0x5ae   : > { %2468 = vmatmul.bf16.gmra.mxu2 %v7905_v29  ;;  %v5071_v33 = vpop.eup %5070 }
 0x5af   : > { %2707 = vmatpush.bf16.msrb.mxu2 %v4648_v44  ;;  %v5073_v58 = vpop.eup %5072  ;;  %v2417_v54 = vpack.c.bf16 %v5071_v33, %v5069_v38  ;;  %v4652_v44 = vor.u32 %v4750_v20, %v4649_v36 }
 0x5b0   : > { %v5075_v43 = vpop.eup %5074 }
 0x5b1   : > { %2522 = vmatpush.bf16.msra.mxu3 %v2423_v57  ;;  %v2415_v21 = vpack.c.bf16 %v5075_v43, %v5073_v58 }
 0x5b3   : > { %2708 = vmatpush.bf16.msrb.mxu2 %v4640_v48 }
 0x5b4   : > { %2486 = vmatmul.bf16.gmra.mxu3 %v2445_v28 }
 0x5b5   : > { %2523 = vmatpush.bf16.msra.mxu3 %v2421_v45 }
 0x5b9   : > { %2524 = vmatpush.bf16.msra.mxu3 %v2419_v34 }
 0x5bd   : > { %2525 = vmatpush.bf16.msra.mxu3 %v2417_v54 }
 0x5be   : > { %2504 = vmatmul.bf16.vlgmr.msra.gmra.mxu2 %v6603_v41  ;;  %v2617_v41 = vpop.trf.xlu2 }
 0x5c1   : > { %2526 = vmatpush.bf16.msra.mxu3 %v2415_v21 }
 0x5c4   : > { %2491 = vmatmul.bf16.gmra.mxu3 %v7905_v29 }
 0x5c5   : > { %2796 = vmatpush.bf16.msrb.mxu3 %v4652_v44 }
 0x5c6   : > { %v6686_v52 = vpop.trf.xlu2 }
 0x5c9   : > { %2797 = vmatpush.bf16.msrb.mxu3 %v4644_v24 }
 0x5ce   : > { %2509 = vmatmul.bf16.gmra.mxu2 %v6643_v18  ;;  %v2619_v4 = vpop.trf.xlu2 }
 0x5d4   : > { %2527 = vmatmul.bf16.vlgmr.msra.gmra.mxu3 %v6662_v23  ;;  %v6701_v23 = vpop.eup %5076 }
 0x5d5   : > { %v2551_v12 = vperm.slane %v6701_v23, 1  ;;  %v2552_v1 = vperm.slane %v6701_v23, 5  ;;  %v2581_v19 = vmul.f32 0.0, %v6701_v23 }
 0x5d6   : > { %v6690_v17 = vpop.trf.xlu2 }
 0x5d7   : > { %v2555_v6 = vperm.slane %v2551_v12, 1  ;;  %v2556_v45 = vperm.slane %v2552_v1, 1 }
 0x5d9   : > { %v2557_v13 = vmul.f32 0.0, %v2555_v6  ;;  %v2558_v34 = vmul.f32 0.0, %v2556_v45  ;;  %v7918_v6 = vld [vmem:[#allocation18_spill] sm:$0xff] }
 0x5de   : > { %2514 = vmatmul.bf16.gmra.mxu2 %v7905_v29  ;;  %v2621_v63 = vpop.trf.xlu2 }
 0x5e4   : > { %2532 = vmatmul.bf16.gmra.mxu3 %v2445_v28 }
 0x5e6   : > { %v6694_v22 = vpop.trf.xlu2 }
 0x5ee   : > { %4653 = vmatmul.msk.bf16.vlgmr.msrb.gmra.mxu2 %vm1126_vm2, %v2617_v41  ;;  %v2623_v31 = vpop.trf.xlu2 }
 0x5f4   : > { %2537 = vmatmul.bf16.gmra.mxu3 %v7905_v29 }
 0x5f6   : > { %v6699_v48 = vpop.trf.xlu2 }
 0x5fe   : > { %4654 = vmatmul.msk.bf16.gmra.mxu2 %vm1126_vm2, %v2619_v4  ;;  %v2625_v11 = vpop.trf.xlu2 }
 0x604   : > { %4669 = vmatmul.msk.bf16.vlgmr.msrb.gmra.mxu3 %vm1126_vm2, %v2617_v41 }
 0x606   : > { %v6708_v42 = vpop.trf.xlu2 }
 0x60e   : > { %4655 = vmatmul.msk.bf16.gmra.mxu2 %vm1126_vm2, %v2621_v63  ;;  %v2627_v55 = vpop.trf.xlu2 }
 0x611   : > { %v2459_v18 = vpop.f32.mrf.mxu2 }
 0x614   : > { %4670 = vmatmul.msk.bf16.gmra.mxu3 %vm1126_vm2, %v2619_v4 }
 0x616   : > { %v6716_v27 = vpop.trf.xlu2 }
 0x619   : > { %v2461_v56 = vpop.f32.mrf.mxu2 }
 0x61e   : > { %4656 = vmatmul.msk.bf16.gmra.mxu2 %vm1126_vm2, %v2623_v31  ;;  %v2629_v5 = vpop.trf.xlu2 }
 0x621   : > { %v2464_v32 = vpop.f32.mrf.mxu2 }
 0x624   : > { %4671 = vmatmul.msk.bf16.gmra.mxu3 %vm1126_vm2, %v2621_v63 }
 0x626   : > { %v6722_v30 = vpop.trf.xlu2 }
 0x627   : > { %v2482_v14 = vpop.f32.mrf.mxu3 }
 0x628   : > { %v2483_v50 = vadd.f32 %v2482_v14, %v2459_v18  ;;  %v4133_v14 = vperm.slane %v7918_v6, 0 }
 0x629   : > { %v2466_v16 = vpop.f32.mrf.mxu2 }
 0x62a   : > { %v6706_v47 = vadd.f32 %v2557_v13, %v2483_v50 }
 0x62c   : > { %7910 = vst [vmem:[#allocation55_spill] sm:$0xff] %v6706_v47 }
 0x62e   : > { %4657 = vmatmul.msk.bf16.gmra.mxu2 %vm1126_vm2, %v2625_v11  ;;  %v2631_v60 = vpop.trf.xlu2 }
 0x62f   : > { %v2484_v39 = vpop.f32.mrf.mxu3 }
 0x630   : > { %v2485_v8 = vadd.f32 %v2484_v39, %v2461_v56 }
 0x631   : > { %v2469_v25 = vpop.f32.mrf.mxu2 }
 0x632   : > { %v6710_v9 = vadd.f32 %v2557_v13, %v2485_v8 }
 0x634   : > { %7911 = vst [vmem:[#allocation53_spill] sm:$0xff] %v6710_v9  ;;  %4672 = vmatmul.msk.bf16.gmra.mxu3 %vm1126_vm2, %v2623_v31 }
 0x636   : > { %v2632_v1 = vpop.trf.xlu2 }
 0x637   : > { %v2487_v46 = vpop.f32.mrf.mxu3 }
 0x638   : > { %v2488_v10 = vadd.f32 %v2487_v46, %v2464_v32 }
 0x639   : > { %v2471_v0 = vpop.f32.mrf.mxu2 }
 0x63a   : > { %v6714_v62 = vadd.f32 %v2557_v13, %v2488_v10 }
 0x63c   : > { %7912 = vst [vmem:[#allocation31_spill] sm:$0xff] %v6714_v62 }
 0x63e   : > { %4658 = vmatmul.msk.bf16.gmra.mxu2 %vm1126_vm2, %v2627_v55 }
 0x63f   : > { %v2489_v37 = vpop.f32.mrf.mxu3 }
 0x640   : > { %v2490_v51 = vadd.f32 %v2489_v37, %v2466_v16 }
 0x641   : > { %v2505_v59 = vpop.f32.mrf.mxu2 }
 0x642   : > { %v6718_v26 = vadd.f32 %v2557_v13, %v2490_v51 }
 0x644   : > { %7913 = vst [vmem:[#allocation17_spill] sm:$0xff] %v6718_v26  ;;  %4673 = vmatmul.msk.bf16.gmra.mxu3 %vm1126_vm2, %v2625_v11 }
 0x647   : > { %v2492_v3 = vpop.f32.mrf.mxu3 }
 0x648   : > { %v2493_v53 = vadd.f32 %v2492_v3, %v2469_v25  ;;  %v4134_v25 = vperm.slane %v7918_v6, 4 }
 0x649   : > { %v2507_v2 = vpop.f32.mrf.mxu2 }
 0x64e   : > { %4659 = vmatmul.msk.bf16.gmra.mxu2 %vm1126_vm2, %v2629_v5 }
 0x64f   : > { %v2494_v49 = vpop.f32.mrf.mxu3 }
 0x651   : > { %v2510_v57 = vpop.f32.mrf.mxu2 }
 0x654   : > { %4674 = vmatmul.msk.bf16.gmra.mxu3 %vm1126_vm2, %v2627_v55 }
 0x657   : > { %v2528_v15 = vpop.f32.mrf.mxu3 }
 0x658   : > { %v2529_v38 = vadd.f32 %v2528_v15, %v2505_v59 }
 0x659   : > { %v2512_v35 = vpop.f32.mrf.mxu2 }
 0x65a   : > { %v6727_v33 = vadd.f32 %v2558_v34, %v2529_v38 }
 0x65c   : > { %7914 = vst [vmem:[#allocation39_spill] sm:$0xff] %v6727_v33 }
 0x65e   : > { %4660 = vmatmul.msk.bf16.gmra.mxu2 %vm1126_vm2, %v2631_v60 }
 0x65f   : > { %v2530_v58 = vpop.f32.mrf.mxu3 }
 0x660   : > { %v2531_v43 = vadd.f32 %v2530_v58, %v2507_v2 }
 0x661   : > { %v2515_v28 = vpop.f32.mrf.mxu2 }
 0x662   : > { %v6729_v36 = vadd.f32 %v2558_v34, %v2531_v43 }
 0x664   : > { %7915 = vst [vmem:[#allocation37_spill] sm:$0xff] %v6729_v36  ;;  %4675 = vmatmul.msk.bf16.gmra.mxu3 %vm1126_vm2, %v2629_v5 }
 0x667   : > { %v2533_v21 = vpop.f32.mrf.mxu3 }
 0x668   : > { %v2534_v44 = vadd.f32 %v2533_v21, %v2510_v57 }
 0x669   : > { %v2517_v54 = vpop.f32.mrf.mxu2 }
 0x66a   : > { %v6736_v61 = vadd.f32 %v2558_v34, %v2534_v44 }
 0x66c   : > { %7916 = vst [vmem:[#allocation29_spill] sm:$0xff] %v6736_v61 }
 0x66e   : > { %4661 = vmatmul.msk.bf16.gmra.mxu2 %vm1126_vm2, %v6686_v52 }
 0x66f   : > { %v2535_v40 = vpop.f32.mrf.mxu3 }
 0x670   : > { %v2536_v41 = vadd.f32 %v2535_v40, %v2512_v35 }
 0x671   : > { %v6734_v20 = vpop.f32.mrf.mxu2 }
 0x672   : > { %v6740_v4 = vadd.f32 %v2558_v34, %v2536_v41 }
 0x674   : > { %7917 = vst [vmem:[#allocation38_spill] sm:$0xff] %v6740_v4  ;;  %4676 = vmatmul.msk.bf16.gmra.mxu3 %vm1126_vm2, %v2631_v60 }
 0x677   : > { %v2538_v63 = vpop.f32.mrf.mxu3 }
 0x678   : > { %v2539_v7 = vadd.f32 %v2538_v63, %v2515_v28 }
 0x679   : > { %v6738_v24 = vpop.f32.mrf.mxu2 }
 0x67a   : > { %v2584_v56 = vrot.slane %v2539_v7, 4 }
 0x67c   : > { %v2585_v31 = vsel %vm373_vm0, %v2493_v53, %v2584_v56 }
 0x67d   : > { %v2586_v32 = vrot.slane %v2585_v31, 7 }
 0x67e   : > { %4662 = vmatmul.msk.bf16.gmra.mxu2 %vm1126_vm2, %v6690_v17 }
 0x67f   : > { %v2588_v16 = vadd.f32 %v2586_v32, %v2581_v19  ;;  %v2540_v12 = vpop.f32.mrf.mxu3 }
 0x681   : > { %v6745_v18 = vpop.f32.mrf.mxu2  ;;  %v4138_v50 = vperm.slane %v2588_v16, 1  ;;  %v4139_v13 = vperm.slane %v2588_v16, 5 }
 0x683   : > { %v6753_v39 = vsel %vm4117_vm3, %v4133_v14, %v4138_v50  ;;  %v6755_v0 = vsel %vm4117_vm3, %v4134_v25, %v4139_v13 }
 0x684   : > { %7919 = vst [vmem:[#allocation35_spill] sm:$0xff] %v6753_v39  ;;  %4677 = vmatmul.msk.bf16.gmra.mxu3 %vm1126_vm2, %v6686_v52 }
 0x685   : > { %7920 = vst [vmem:[#allocation36_spill] sm:$0xff] %v6755_v0 }
 0x687   : > { %v6761_v23 = vpop.f32.mrf.mxu3 }
 0x688   : > { %7921 = vst [vmem:[#allocation33_spill] sm:$0xff] %v6761_v23 }
 0x689   : > { %v6749_v11 = vpop.f32.mrf.mxu2 }
 0x68e   : > { %4663 = vmatmul.msk.bf16.gmra.mxu2 %vm1126_vm2, %v6694_v22 }
 0x68f   : > { %v6765_v55 = vpop.f32.mrf.mxu3 }
 0x690   : > { %7922 = vst [vmem:[#allocation34_spill] sm:$0xff] %v6765_v55 }
 0x691   : > { %v6763_v8 = vpop.f32.mrf.mxu2 }
 0x694   : > { %4678 = vmatmul.msk.bf16.gmra.mxu3 %vm1126_vm2, %v6690_v17 }
 0x697   : > { %v6773_v59 = vpop.f32.mrf.mxu3 }
 0x698   : > { %7923 = vst [vmem:[#allocation19_spill] sm:$0xff] %v6773_v59  ;;  %v2916_v26 = vmax.f32 %v6761_v23, %v6773_v59 }
 0x699   : > { %v6767_v46 = vpop.f32.mrf.mxu2 }
 0x69e   : > { %4664 = vmatmul.msk.bf16.gmra.mxu2 %vm1126_vm2, %v6699_v48 }
 0x69f   : > { %v6777_v10 = vpop.f32.mrf.mxu3 }
 0x6a0   : > { %7924 = vst [vmem:[#allocation16_spill] sm:$0xff] %v6777_v10  ;;  %v2917_v4 = vmax.f32 %v6765_v55, %v6777_v10  ;;  %v2879_v10 = vmax.f32 %v6734_v20, %v6745_v18 }
 0x6a1   : > { %v6775_v52 = vpop.f32.mrf.mxu2 }
 0x6a4   : > { %4679 = vmatmul.msk.bf16.gmra.mxu3 %vm1126_vm2, %v6694_v22 }
 0x6a7   : > { %v6785_v2 = vpop.f32.mrf.mxu3 }
 0x6a8   : > { %7925 = vst [vmem:[#allocation13_spill] sm:$0xff] %v6785_v2  ;;  %v2918_v0 = vmax.f32 %v2916_v26, %v6785_v2 }
 0x6a9   : > { %v6779_v37 = vpop.f32.mrf.mxu2 }
 0x6ae   : > { %4665 = vmatmul.msk.bf16.gmra.mxu2 %vm1126_vm2, %v6708_v42 }
 0x6af   : > { %v6789_v51 = vpop.f32.mrf.mxu3 }
 0x6b0   : > { %7926 = vst [vmem:[#allocation32_spill] sm:$0xff] %v6789_v51  ;;  %v2919_v62 = vmax.f32 %v2917_v4, %v6789_v51 }
 0x6b1   : > { %v6787_v17 = vpop.f32.mrf.mxu2 }
 0x6b4   : > { %4680 = vmatmul.msk.bf16.gmra.mxu3 %vm1126_vm2, %v6699_v48 }
 0x6b7   : > { %v6797_v3 = vpop.f32.mrf.mxu3 }
 0x6b8   : > { %7927 = vst [vmem:[#allocation15_spill] sm:$0xff] %v6797_v3 }
 0x6b9   : > { %v6791_v5 = vpop.f32.mrf.mxu2 }
 0x6be   : > { %4666 = vmatmul.msk.bf16.gmra.mxu2 %vm1126_vm2, %v6716_v27 }
 0x6bf   : > { %v6801_v57 = vpop.f32.mrf.mxu3 }
 0x6c0   : > { %7928 = vst [vmem:[#allocation52_spill] sm:$0xff] %v6801_v57  ;;  %v2921_v39 = vmax.f32 %v2919_v62, %v6801_v57  ;;  %v2881_v62 = vmax.f32 %v2879_v10, %v6763_v8 }
 0x6c1   : > { %v6799_v22 = vpop.f32.mrf.mxu2 }
 0x6c4   : > { %4681 = vmatmul.msk.bf16.gmra.mxu3 %vm1126_vm2, %v6708_v42 }
 0x6c7   : > { %v6807_v53 = vpop.f32.mrf.mxu3 }
 0x6c9   : > { %v6809_v49 = vpop.f32.mrf.mxu2 }
 0x6ce   : > { %4667 = vmatmul.msk.bf16.gmra.mxu2 %vm1126_vm2, %v6722_v30 }
 0x6cf   : > { %v6811_v48 = vpop.f32.mrf.mxu3 }
 0x6d0   : > { %7929 = vst [vmem:[#allocation54_spill] sm:$0xff] %v6811_v48  ;;  %v2923_v55 = vmax.f32 %v2921_v39, %v6811_v48  ;;  %v2883_v39 = vmax.f32 %v2881_v62, %v6775_v52 }
 0x6d1   : > { %v6813_v35 = vpop.f32.mrf.mxu2 }
 0x6d4   : > { %4682 = vmatmul.msk.bf16.gmra.mxu3 %vm1126_vm2, %v6716_v27 }
 0x6d7   : > { %v6818_v60 = vpop.f32.mrf.mxu3 }
 0x6d9   : > { %v6820_v42 = vpop.f32.mrf.mxu2 }
 0x6de   : > { %4668 = vmatmul.msk.bf16.gmra.mxu2 %vm1126_vm2, %v2632_v1 }
 0x6df   : > { %v6822_v45 = vpop.f32.mrf.mxu3 }
 0x6e0   : > { %v2925_v26 = vmax.f32 %v2923_v55, %v6822_v45  ;;  %v2885_v55 = vmax.f32 %v2883_v39, %v6787_v17 }
 0x6e1   : > { %v6826_v15 = vpop.f32.mrf.mxu2 }
 0x6e4   : > { %4683 = vmatmul.msk.bf16.gmra.mxu3 %vm1126_vm2, %v6722_v30 }
 0x6e7   : > { %v6828_v28 = vpop.f32.mrf.mxu3 }
 0x6e9   : > { %v6832_v34 = vpop.f32.mrf.mxu2 }
 0x6ef   : > { %v6830_v38 = vpop.f32.mrf.mxu3 }
 0x6f0   : > { %v2927_v57 = vmax.f32 %v2925_v26, %v6830_v38  ;;  %v2887_v26 = vmax.f32 %v2885_v55, %v6799_v22 }
 0x6f1   : > { %v6837_v58 = vpop.f32.mrf.mxu2 }
 0x6f4   : > { %4684 = vmatmul.msk.bf16.gmra.mxu3 %vm1126_vm2, %v2632_v1 }
 0x6f7   : > { %v6835_v27 = vpop.f32.mrf.mxu3 }
 0x6f9   : > { %v6841_v43 = vpop.f32.mrf.mxu2 }
 0x6ff   : > { %v6839_v54 = vpop.f32.mrf.mxu3 }
 0x701   : > { %v6845_v30 = vpop.f32.mrf.mxu2 }
 0x707   : > { %v6843_v21 = vpop.f32.mrf.mxu3 }
 0x708   : > { %7930 = vst [vmem:[#allocation50_spill] sm:$0xff] %v6843_v21 }
 0x709   : > { %v6851_v41 = vpop.f32.mrf.mxu2 }
 0x70f   : > { %v6847_v44 = vpop.f32.mrf.mxu3 }
 0x710   : > { %7931 = vst [vmem:[#allocation51_spill] sm:$0xff] %v6847_v44 }
 0x711   : > { %v6855_v7 = vpop.f32.mrf.mxu2 }
 0x717   : > { %v6849_v40 = vpop.f32.mrf.mxu3 }
 0x718   : > { %7932 = vst [vmem:[#allocation48_spill] sm:$0xff] %v6849_v40 }
 0x719   : > { %v6859_v31 = vpop.f32.mrf.mxu2 }
 0x71f   : > { %v6853_v63 = vpop.f32.mrf.mxu3 }
 0x720   : > { %7933 = vst [vmem:[#allocation49_spill] sm:$0xff] %v6853_v63 }
 0x721   : > { %v6863_v32 = vpop.f32.mrf.mxu2 }
 0x727   : > { %v6857_v56 = vpop.f32.mrf.mxu3 }
 0x728   : > { %7934 = vst [vmem:[#allocation46_spill] sm:$0xff] %v6857_v56 }
 0x729   : > { %v6867_v12 = vpop.f32.mrf.mxu2 }
 0x72f   : > { %v6861_v19 = vpop.f32.mrf.mxu3 }
 0x730   : > { %7935 = vst [vmem:[#allocation47_spill] sm:$0xff] %v6861_v19 }
 0x731   : > { %v6873_v25 = vpop.f32.mrf.mxu2 }
 0x737   : > { %v6865_v16 = vpop.f32.mrf.mxu3 }
 0x738   : > { %7936 = vst [vmem:[#allocation44_spill] sm:$0xff] %v6865_v16 }
 0x739   : > { %v6877_v13 = vpop.f32.mrf.mxu2 }
 0x73f   : > { %v6869_v6 = vpop.f32.mrf.mxu3 }
 0x740   : > { %7937 = vst [vmem:[#allocation45_spill] sm:$0xff] %v6869_v6 }
 0x741   : > { %v6881_v36 = vpop.f32.mrf.mxu2 }
 0x742   : > { %7941 = vst [vmem:[#allocation56_spill] sm:$0xff] %v6881_v36  ;;  %v2880_v36 = vmax.f32 %v6738_v24, %v6749_v11 }
 0x744   : > { %v2882_v23 = vmax.f32 %v2880_v36, %v6767_v46 }
 0x746   : > { %v2884_v59 = vmax.f32 %v2882_v23, %v6779_v37 }
 0x747   : > { %v6871_v14 = vpop.f32.mrf.mxu3 }
 0x748   : > { %7938 = vst [vmem:[#allocation42_spill] sm:$0xff] %v6871_v14  ;;  %v2886_v2 = vmax.f32 %v2884_v59, %v6791_v5 }
 0x749   : > { %v6885_v9 = vpop.f32.mrf.mxu2 }
 0x74a   : > { %7943 = vst [vmem:[#allocation58_spill] sm:$0xff] %v6885_v9  ;;  %v2920_v9 = vmax.f32 %v2918_v0, %v6797_v3  ;;  %v2888_v10 = vmax.f32 %v2886_v2, %v6809_v49 }
 0x74c   : > { %v2922_v4 = vmax.f32 %v2920_v9, %v6807_v53  ;;  %v2929_v9 = vmax.f32 %v2927_v57, %v6839_v54  ;;  %v2890_v62 = vmax.f32 %v2888_v10, %v6820_v42  ;;  %v2889_v57 = vmax.f32 %v2887_v26, %v6813_v35 }
 0x74e   : > { %v2924_v51 = vmax.f32 %v2922_v4, %v6818_v60  ;;  %v2931_v4 = vmax.f32 %v2929_v9, %v6847_v44  ;;  %v2892_v39 = vmax.f32 %v2890_v62, %v6832_v34  ;;  %v2891_v9 = vmax.f32 %v2889_v57, %v6826_v15 }
 0x74f   : > { %v6875_v50 = vpop.f32.mrf.mxu3 }
 0x750   : > { %7939 = vst [vmem:[#allocation43_spill] sm:$0xff] %v6875_v50  ;;  %v2926_v36 = vmax.f32 %v2924_v51, %v6828_v28  ;;  %v2933_v51 = vmax.f32 %v2931_v4, %v6853_v63  ;;  %v2894_v44 = vmax.f32 %v2892_v39, %v6841_v43 }
 0x751   : > { %v6891_v61 = vpop.f32.mrf.mxu2 }
 0x752   : > { %v2928_v23 = vmax.f32 %v2926_v36, %v6835_v27  ;;  %v2935_v36 = vmax.f32 %v2933_v51, %v6861_v19  ;;  %v2896_v4 = vmax.f32 %v2894_v44, %v6851_v41 }
 0x754   : > { %v2930_v59 = vmax.f32 %v2928_v23, %v6843_v21  ;;  %v2937_v10 = vmax.f32 %v2935_v36, %v6869_v6  ;;  %v2893_v23 = vmax.f32 %v2891_v9, %v6837_v58  ;;  %v2898_v51 = vmax.f32 %v2896_v4, %v6859_v31  ;;  %v7944_v21 = vld [vmem:[#allocation58_spill] sm:$0xff] }
 0x756   : > { %v2932_v2 = vmax.f32 %v2930_v59, %v6849_v40  ;;  %v2939_v62 = vmax.f32 %v2937_v10, %v6875_v50  ;;  %v2895_v59 = vmax.f32 %v2893_v23, %v6845_v30  ;;  %v2900_v9 = vmax.f32 %v2898_v51, %v6867_v12  ;;  %v7945_v51 = vld [vmem:[#allocation56_spill] sm:$0xff] }
 0x757   : > { %v6879_v1 = vpop.f32.mrf.mxu3 }
 0x758   : > { %7940 = vst [vmem:[#allocation18_spill] sm:$0xff] %v6879_v1  ;;  %v2934_v55 = vmax.f32 %v2932_v2, %v6857_v56  ;;  %v2897_v36 = vmax.f32 %v2895_v59, %v6855_v7  ;;  %v2902_v23 = vmax.f32 %v2900_v9, %v6877_v13 }
 0x759   : > { %v6913_v0 = vpop.f32.mrf.mxu2 }
 0x75a   : > { %v2936_v26 = vmax.f32 %v2934_v55, %v6865_v16  ;;  %v2899_v10 = vmax.f32 %v2897_v36, %v6863_v32  ;;  %v2904_v63 = vmax.f32 %v2902_v23, %v7944_v21 }
 0x75c   : > { %v2938_v57 = vmax.f32 %v2936_v26, %v6871_v14 }
 0x75e   : > { %v2940_v44 = vmax.f32 %v2938_v57, %v6879_v1 }
 0x75f   : > { %v6883_v33 = vpop.f32.mrf.mxu3 }
 0x760   : > { %7942 = vst [vmem:[#allocation57_spill] sm:$0xff] %v6883_v33  ;;  %v2941_v39 = vmax.f32 %v2939_v62, %v6883_v33  ;;  %v2901_v62 = vmax.f32 %v2899_v10, %v6873_v25 }
 0x761   : > { %v6937_v48 = vpop.f32.mrf.mxu2 }
 0x762   : > { %v2903_v57 = vmax.f32 %v2901_v62, %v7945_v51 }
 0x764   : > { %v2905_v36 = vmax.f32 %v2903_v57, %v6891_v61 }
 0x767   : > { %v6887_v47 = vpop.f32.mrf.mxu3 }
 0x768   : > { %v2942_v4 = vmax.f32 %v2940_v44, %v6887_v47  ;;  %v2907_v44 = vmax.f32 %v2905_v36, %v6937_v48 }
 0x769   : > { %v6960_v40 = vpop.f32.mrf.mxu2 }
 0x76f   : > { %v6898_v29 = vpop.f32.mrf.mxu3 }
 0x770   : > { %v2943_v55 = vmax.f32 %v2941_v39, %v6898_v29  ;;  %v2906_v39 = vmax.f32 %v2904_v63, %v6913_v0 }
 0x772   : > { %v2908_v9 = vmax.f32 %v2906_v39, %v6960_v40 }
 0x774   : > { %v2909_v56 = vmax.f32 %v2907_v44, %v2908_v9 }
 0x776   : > { %v2910_v6 = vrot.slane %v2909_v56, 4 }
 0x777   : > { %v6923_v3 = vpop.f32.mrf.mxu3 }
 0x778   : > { %v2944_v59 = vmax.f32 %v2942_v4, %v6923_v3  ;;  %v2911_v16 = vmax.f32 %v2909_v56, %v2910_v6 }
 0x77a   : > { %v2912_v50 = vrot.slane %v2911_v16, 2 }
 0x77c   : > { %v2913_v33 = vmax.f32 %v2911_v16, %v2912_v50 }
 0x77e   : > { %v2914_v1 = vrot.slane %v2913_v33, 1 }
 0x77f   : > { %v6947_v2 = vpop.f32.mrf.mxu3 }
 0x780   : > { %v2945_v26 = vmax.f32 %v2943_v55, %v6947_v2 }
 0x782   : > { %v2946_v19 = vmax.f32 %v2944_v59, %v2945_v26  ;;  %v2915_v26 = vmax.f32 %v2913_v33, %v2914_v1 }
 0x784   : > { %v2947_v55 = vrot.slane %v2946_v19, 4 }
 0x786   : > { %v2948_v10 = vmax.f32 %v2946_v19, %v2947_v55 }
 0x788   : > { %v2949_v23 = vrot.slane %v2948_v10, 2 }
 0x78a   : > { %v2950_v4 = vmax.f32 %v2948_v10, %v2949_v23 }
 0x78c   : > { %v2951_v14 = vrot.slane %v2950_v4, 1 }
 0x78e   : > { %v2952_v62 = vmax.f32 %v2950_v4, %v2951_v14 }
 0x790   : > { %v2955_v63 = vrot.slane %v2952_v62, 4 }
 0x792   : > { %v2956_v59 = vsel %vm373_vm0, %v2915_v26, %v2955_v63 }
 0x793   : > { %v6968_v57 = vrot.slane %v2956_v59, 6 }
 0x795   : > { %v2964_v39 = vperm.slane %v6968_v57, 2  ;;  %v2965_v26 = vperm.slane %v6968_v57, 6 }
 0x797   : > { %v6971_v36 = vperm.slane %v2964_v39, 2 }
 0x799   : > { %v2998_v19 = vsub.f32 %v6826_v15, %v6971_v36  ;;  %v3000_v56 = vsub.f32 %v6832_v34, %v6971_v36  ;;  %v2994_v16 = vsub.f32 %v6813_v35, %v6971_v36  ;;  %v2996_v33 = vsub.f32 %v6820_v42, %v6971_v36 }
 0x79a   : > { %v2990_v50 = vsub.f32 %v6799_v22, %v6971_v36  ;;  %v2992_v9 = vsub.f32 %v6809_v49, %v6971_v36  ;;  %v2986_v15 = vsub.f32 %v6787_v17, %v6971_v36  ;;  %v2988_v35 = vsub.f32 %v6791_v5, %v6971_v36 }
 0x79b   : > { %v3090_v6 = vmul.f32 1.442695, %v2998_v19  ;;  %v3094_v14 = vmul.f32 1.442695, %v3000_v56  ;;  %v3082_v1 = vmul.f32 1.442695, %v2994_v16  ;;  %v2982_v22 = vsub.f32 %v6775_v52, %v6971_v36 }
 0x79c   : > { %v3086_v44 = vmul.f32 1.442695, %v2996_v33  ;;  %v3074_v34 = vmul.f32 1.442695, %v2990_v50  ;;  %v3078_v42 = vmul.f32 1.442695, %v2992_v9  ;;  %v2984_v23 = vsub.f32 %v6779_v37, %v6971_v36 }
 0x79d   : > { %5078 = vpow2.f32 %v3090_v6  ;;  %v3066_v10 = vmul.f32 1.442695, %v2986_v15  ;;  %v3070_v4 = vmul.f32 1.442695, %v2988_v35  ;;  %v2978_v5 = vsub.f32 %v6763_v8, %v6971_v36 }
 0x79e   : > { %5080 = vpow2.f32 %v3094_v14  ;;  %v3058_v59 = vmul.f32 1.442695, %v2982_v22  ;;  %v2980_v52 = vsub.f32 %v6767_v46, %v6971_v36  ;;  %v3062_v39 = vmul.f32 1.442695, %v2984_v23 }
 0x79f   : > { %5082 = vpow2.f32 %v3082_v1  ;;  %v6998_v16 = vperm.slane %v2965_v26, 2  ;;  %v2970_v33 = vsub.f32 %v6734_v20, %v6971_v36  ;;  %v2974_v6 = vsub.f32 %v6745_v18, %v6971_v36 }
 0x7a0   : > { %5084 = vpow2.f32 %v3086_v44  ;;  %v3050_v8 = vmul.f32 1.442695, %v2978_v5  ;;  %v2976_v14 = vsub.f32 %v6749_v11, %v6971_v36  ;;  %v3054_v46 = vmul.f32 1.442695, %v2980_v52 }
 0x7a1   : > { %5086 = vpow2.f32 %v3074_v34  ;;  %v2972_v1 = vsub.f32 %v6738_v24, %v6971_v36  ;;  %v2991_v20 = vsub.f32 %v6818_v60, %v6998_v16  ;;  %v3034_v15 = vmul.f32 1.442695, %v2970_v33 }
 0x7a2   : > { %5088 = vpow2.f32 %v3078_v42  ;;  %v2999_v18 = vsub.f32 %v6835_v27, %v6998_v16  ;;  %v3042_v34 = vmul.f32 1.442695, %v2974_v6  ;;  %v3001_v11 = vsub.f32 %v6839_v54, %v6998_v16 }
 0x7a3   : > { %v5079_v55 = vpop.eup %5078  ;;  %5090 = vpow2.f32 %v3066_v10  ;;  %v3046_v35 = vmul.f32 1.442695, %v2976_v14  ;;  %v3027_v24 = vsub.f32 %v6887_v47, %v6998_v16  ;;  %v2995_v60 = vsub.f32 %v6828_v28, %v6998_v16  ;;  %v7947_v14 = vld [vmem:[#allocation12_spill] sm:$0xff] }
 0x7a4   : > { %v5081_v49 = vpop.eup %5080  ;;  %5092 = vpow2.f32 %v3070_v4  ;;  %v3076_v27 = vmul.f32 1.442695, %v2991_v20  ;;  %v3092_v23 = vmul.f32 1.442695, %v2999_v18  ;;  %v3030_v54 = vsub.f32 %v6937_v48, %v6971_v36 }
 0x7a5   : > { %v5083_v17 = vpop.eup %5082  ;;  %v3176_v62 = vpack.c.bf16 %v5081_v49, %v5079_v55  ;;  %5094 = vpow2.f32 %v3058_v59  ;;  %v3038_v55 = vmul.f32 1.442695, %v2972_v1  ;;  %v3029_v49 = vsub.f32 %v6898_v29, %v6998_v16 }
 0x7a6   : > { %v5085_v63 = vpop.eup %5084  ;;  %5096 = vpow2.f32 %v3062_v39  ;;  %v3096_v4 = vmul.f32 1.442695, %v3001_v11  ;;  %v3032_v26 = vsub.f32 %v6960_v40, %v6971_v36  ;;  %v3084_v29 = vmul.f32 1.442695, %v2995_v60  ;;  %v7949_v11 = vld [vmem:[#allocation14_spill] sm:$0xff] }
 0x7a7   : > { %3214 = vmatpush.bf16.msrb.mxu0 %v3176_v62  ;;  %v5087_v19 = vpop.eup %5086  ;;  %v3174_v37 = vpack.c.bf16 %v5085_v63, %v5083_v17  ;;  %5098 = vpow2.f32 %v3050_v8  ;;  %v2997_v17 = vsub.f32 %v6830_v38, %v6998_v16  ;;  %v3148_v62 = vmul.f32 1.442695, %v3027_v24  ;;  %v7946_v8 = vld [vmem:[#allocation11_spill] sm:$0xff] }
 0x7a8   : > { %v5089_v56 = vpop.eup %5088  ;;  %5100 = vpow2.f32 %v3054_v46  ;;  %v3026_v5 = vsub.f32 %v6891_v61, %v6971_v36  ;;  %v3152_v48 = vmul.f32 1.442695, %v3029_v49  ;;  %v3028_v52 = vsub.f32 %v6913_v0, %v6971_v36 }
 0x7a9   : > { %v5091_v50 = vpop.eup %5090  ;;  %v3172_v9 = vpack.c.bf16 %v5089_v56, %v5087_v19  ;;  %5102 = vpow2.f32 %v3034_v15  ;;  %v3154_v38 = vmul.f32 1.442695, %v3030_v54  ;;  %v2993_v19 = vsub.f32 %v6822_v45, %v6998_v16 }
 0x7aa   : > { %v5093_v44 = vpop.eup %5092  ;;  %5104 = vpow2.f32 %v3042_v34  ;;  %v2987_v61 = vsub.f32 %v6807_v53, %v6998_v16  ;;  %v3158_v33 = vmul.f32 1.442695, %v3032_v26  ;;  %v7036_v46 = vpack.c.bf16 %v7947_v14, %v7946_v8 }
 0x7ab   : > { %3215 = vmatpush.bf16.msrb.mxu0 %v3174_v37  ;;  %v5095_v42 = vpop.eup %5094  ;;  %v3170_v22 = vpack.c.bf16 %v5093_v44, %v5091_v50  ;;  %5106 = vpow2.f32 %v3046_v35  ;;  %v3088_v37 = vmul.f32 1.442695, %v2997_v17  ;;  %v3022_v0 = vsub.f32 %v7945_v51, %v6971_v36  ;;  %v7948_v44 = vld [vmem:[#allocation54_spill] sm:$0xff]  ;;  %v7950_v35 = vld [vmem:[#allocation15_spill] sm:$0xff] }
 0x7ac   : > { %v5097_v10 = vpop.eup %5096  ;;  %5108 = vpow2.f32 %v3038_v55  ;;  %v3146_v50 = vmul.f32 1.442695, %v3026_v5  ;;  %v3024_v1 = vsub.f32 %v7944_v21, %v6971_v36  ;;  %v2989_v20 = vsub.f32 %v7948_v44, %v6998_v16 }
 0x7ad   : > { %v5099_v47 = vpop.eup %5098  ;;  %v3168_v28 = vpack.c.bf16 %v5097_v10, %v5095_v42  ;;  %5110 = vpow2.f32 %v3076_v27  ;;  %v3080_v15 = vmul.f32 1.442695, %v2993_v19  ;;  %v3198_v51 = vunpack.c.l.b16 %v7949_v11  ;;  %v7951_v27 = vld [vmem:[#allocation13_spill] sm:$0xff] }
 0x7ae   : > { %v5101_v63 = vpop.eup %5100  ;;  %5112 = vpow2.f32 %v3092_v23  ;;  %v2983_v42 = vsub.f32 %v7950_v35, %v6998_v16  ;;  %v3068_v24 = vmul.f32 1.442695, %v2987_v61  ;;  %v3200_v21 = vunpack.c.l.b16 %v7036_v46 }
 0x7af   : > { %3216 = vmatpush.bf16.msrb.mxu0 %v3172_v9  ;;  %v5103_v59 = vpop.eup %5102  ;;  %5114 = vpow2.f32 %v3096_v4  ;;  %v3166_v40 = vpack.c.bf16 %v5101_v63, %v5099_v47  ;;  %v3150_v9 = vmul.f32 1.442695, %v3028_v52  ;;  %v3138_v10 = vmul.f32 1.442695, %v3022_v0  ;;  %v7952_v47 = vld [vmem:[#allocation52_spill] sm:$0xff] }
 0x7b0   : > { %v5105_v39 = vpop.eup %5104  ;;  %5116 = vpow2.f32 %v3148_v62  ;;  %v2979_v49 = vsub.f32 %v7951_v27, %v6998_v16  ;;  %v3020_v23 = vsub.f32 %v6877_v13, %v6971_v36  ;;  %v3142_v54 = vmul.f32 1.442695, %v3024_v1 }
 0x7b1   : > { %v5107_v56 = vpop.eup %5106  ;;  %5118 = vpow2.f32 %v3084_v29  ;;  %v2985_v17 = vsub.f32 %v7952_v47, %v6998_v16  ;;  %v3072_v62 = vmul.f32 1.442695, %v2989_v20  ;;  %v3060_v63 = vmul.f32 1.442695, %v2983_v42  ;;  %v7955_v20 = vld [vmem:[#allocation16_spill] sm:$0xff] }
 0x7b2   : > { %v5109_v6 = vpop.eup %5108  ;;  %5120 = vpow2.f32 %v3152_v48  ;;  %v3164_v18 = vpack.c.bf16 %v5107_v56, %v5105_v39  ;;  %v3014_v13 = vsub.f32 %v6863_v32, %v6971_v36  ;;  %v3134_v39 = vmul.f32 1.442695, %v3020_v23  ;;  %v7957_v23 = vld [vmem:[#allocation34_spill] sm:$0xff] }
 0x7b3   : > { %3217 = vmatpush.bf16.msrb.mxu0 %v3170_v22  ;;  %v7040_v45 = vpop.eup %5110  ;;  %5122 = vpow2.f32 %v3154_v38  ;;  %v3018_v22 = vsub.f32 %v6873_v25, %v6971_v36  ;;  %v3162_v25 = vpack.c.bf16 %v5109_v6, %v5103_v59  ;;  %v7066_v38 = vpack.c.b16 %v3200_v21, %v3198_v51 }
 0x7b4   : > { %v5113_v53 = vpop.eup %5112  ;;  %5124 = vpow2.f32 %v3088_v37  ;;  %v3016_v59 = vsub.f32 %v6867_v12, %v6971_v36  ;;  %v7953_v37 = vld [vmem:[#allocation32_spill] sm:$0xff]  ;;  %v3064_v56 = vmul.f32 1.442695, %v2985_v17  ;;  %v3052_v8 = vmul.f32 1.442695, %v2979_v49 }
 0x7b5   : > { %v5115_v34 = vpop.eup %5114  ;;  %5126 = vpow2.f32 %v3158_v33  ;;  %v3130_v48 = vmul.f32 1.442695, %v3018_v22  ;;  %v7954_v33 = vld [vmem:[#allocation19_spill] sm:$0xff]  ;;  %v3010_v0 = vsub.f32 %v6855_v7, %v6971_v36  ;;  %v7956_v7 = vld [vmem:[#allocation33_spill] sm:$0xff] }
 0x7b6   : > { %v7049_v55 = vpop.eup %5116  ;;  %5128 = vpow2.f32 %v3146_v50  ;;  %v3177_v26 = vpack.c.bf16 %v5115_v34, %v5113_v53  ;;  %v2975_v6 = vsub.f32 %v7954_v33, %v6998_v16  ;;  %v3122_v50 = vmul.f32 1.442695, %v3014_v13  ;;  %v7958_v33 = vld [vmem:[#allocation20_spill] sm:$0xff] }
 0x7b7   : > { %3218 = vmatpush.bf16.msrb.mxu0 %v3168_v28  ;;  %v5119_v60 = vpop.eup %5118  ;;  %5130 = vpow2.f32 %v3150_v9  ;;  %v3012_v9 = vsub.f32 %v6859_v31, %v6971_v36  ;;  %v3126_v53 = vmul.f32 1.442695, %v3016_v59  ;;  %v2971_v35 = vsub.f32 %v7956_v7, %v6998_v16 }
 0x7b8   : > { %v7058_v4 = vpop.eup %5120  ;;  %5132 = vpow2.f32 %v3080_v15  ;;  %v2977_v15 = vsub.f32 %v7955_v20, %v6998_v16  ;;  %v3044_v42 = vmul.f32 1.442695, %v2975_v6  ;;  %v3006_v31 = vsub.f32 %v6845_v30, %v6971_v36 }
 0x7b9   : > { %v5123_v28 = vpop.eup %5122  ;;  %5134 = vpow2.f32 %v3068_v24  ;;  %v3191_v29 = vpack.c.bf16 %v7058_v4, %v7049_v55  ;;  %v3114_v22 = vmul.f32 1.442695, %v3010_v0  ;;  %v3118_v27 = vmul.f32 1.442695, %v3012_v9 }
 0x7ba   : > { %v5125_v5 = vpop.eup %5124  ;;  %5136 = vpow2.f32 %v3138_v10  ;;  %v3048_v47 = vmul.f32 1.442695, %v2977_v15  ;;  %v3033_v30 = vsub.f32 %v6947_v2, %v6998_v16  ;;  %v3031_v2 = vsub.f32 %v6923_v3, %v6998_v16 }
 0x7bb   : > { %3219 = vmatpush.bf16.msrb.mxu0 %v3166_v40  ;;  %v5127_v52 = vpop.eup %5126  ;;  %5138 = vpow2.f32 %v3142_v54  ;;  %v2981_v40 = vsub.f32 %v7953_v37, %v6998_v16  ;;  %v3175_v14 = vpack.c.bf16 %v5125_v5, %v5119_v60  ;;  %v3008_v60 = vsub.f32 %v6851_v41, %v6971_v36 }
 0x7bc   : > { %v5129_v19 = vpop.eup %5128  ;;  %5140 = vpow2.f32 %v3072_v62  ;;  %v3192_v61 = vpack.c.bf16 %v5127_v52, %v5123_v28  ;;  %v2973_v54 = vsub.f32 %v7957_v23, %v6998_v16  ;;  %v3036_v62 = vmul.f32 1.442695, %v2971_v35  ;;  %v4755_v35 = vld [vmem:[#allocation2 + $0x74] sm:$0xf0] }
 0x7bd   : > { %v5131_v32 = vpop.eup %5130  ;;  %5142 = vpow2.f32 %v3060_v63  ;;  %v3002_v41 = vsub.f32 %v6837_v58, %v6971_v36  ;;  %v3106_v63 = vmul.f32 1.442695, %v3006_v31  ;;  %v3004_v5 = vsub.f32 %v6841_v43, %v6971_v36 }
 0x7be   : > { %v5133_v12 = vpop.eup %5132  ;;  %5144 = vpow2.f32 %v3130_v48  ;;  %3237 = vmatpush.bf16.msrb.mxu1 %v3192_v61  ;;  %v3190_v34 = vpack.c.bf16 %v5131_v32, %v5129_v19  ;;  %v3110_v13 = vmul.f32 1.442695, %v3008_v60  ;;  %v3040_v52 = vmul.f32 1.442695, %v2973_v54 }
 0x7bf   : > { %3220 = vmatpush.bf16.msrb.mxu0 %v3164_v18  ;;  %v5135_v1 = vpop.eup %5134  ;;  %5146 = vpow2.f32 %v3134_v39  ;;  %v3056_v18 = vmul.f32 1.442695, %v2981_v40  ;;  %v3173_v24 = vpack.c.bf16 %v5133_v12, %v7040_v45  ;;  %v3160_v19 = vmul.f32 1.442695, %v3033_v30  ;;  %v7959_v12 = vld [vmem:[#allocation18_spill] sm:$0xff] }
 0x7c0   : > { %v5137_v44 = vpop.eup %5136  ;;  %5148 = vpow2.f32 %v3064_v56  ;;  %v3098_v40 = vmul.f32 1.442695, %v3002_v41  ;;  %v3102_v43 = vmul.f32 1.442695, %v3004_v5  ;;  %v3156_v61 = vmul.f32 1.442695, %v3031_v2 }
 0x7c1   : > { %v5139_v51 = vpop.eup %5138  ;;  %5150 = vpow2.f32 %v3052_v8  ;;  %v3023_v0 = vsub.f32 %v7959_v12, %v6998_v16  ;;  %v3199_v23 = vunpack.c.h.b16 %v7949_v11  ;;  %v4687_v11 = vld [vmem:[#allocation2 + $0x60] sm:$0xf] }
 0x7c2   : > { %v5141_v21 = vpop.eup %5140  ;;  %5152 = vpow2.f32 %v3122_v50  ;;  %3238 = vmatpush.bf16.msrb.mxu1 %v3190_v34  ;;  %v3188_v45 = vpack.c.bf16 %v5139_v51, %v5137_v44  ;;  %v7961_v34 = vld [vmem:[#allocation42_spill] sm:$0xff] }
 0x7c3   : > { %3221 = vmatpush.bf16.msrb.mxu0 %v3162_v25  ;;  %v5143_v10 = vpop.eup %5142  ;;  %5154 = vpow2.f32 %v3126_v53  ;;  %v3171_v25 = vpack.c.bf16 %v5141_v21, %v5135_v1  ;;  %v7960_v1 = vld [vmem:[#allocation57_spill] sm:$0xff]  ;;  %v3019_v51 = vsub.f32 %v7961_v34, %v6998_v16  ;;  %v3140_v7 = vmul.f32 1.442695, %v3023_v0 }
 0x7c4   : > { %v5145_v49 = vpop.eup %5144  ;;  %5156 = vpow2.f32 %v3056_v18  ;;  %v3025_v9 = vsub.f32 %v7960_v1, %v6998_v16 }
 0x7c5   : > { %v5147_v17 = vpop.eup %5146  ;;  %5158 = vpow2.f32 %v3044_v42  ;;  %v3132_v30 = vmul.f32 1.442695, %v3019_v51  ;;  %v7972_v51 = vld [vmem:[#allocation21_spill] sm:$0xff] }
 0x7c6   : > { %3222 = vmatmul.bf16.vlgmr.msrb.gmra.mxu0 %v7066_v38  ;;  %v5149_v28 = vpop.eup %5148  ;;  %5160 = vpow2.f32 %v3114_v22  ;;  %3239 = vmatpush.bf16.msrb.mxu1 %v3188_v45  ;;  %v3186_v59 = vpack.c.bf16 %v5147_v17, %v5145_v49  ;;  %v3144_v31 = vmul.f32 1.442695, %v3025_v9  ;;  %v7963_v45 = vld [vmem:[#allocation44_spill] sm:$0xff] }
 0x7c7   : > { %3260 = vmatpush.bf16.msra.mxu0 %v3177_v26  ;;  %v5151_v26 = vpop.eup %5150  ;;  %5162 = vpow2.f32 %v3118_v27  ;;  %v3169_v58 = vpack.c.bf16 %v5149_v28, %v5143_v10  ;;  %v4695_v27 = vld [vmem:[#allocation2 + $0x70] sm:$0xf]  ;;  %v3015_v17 = vsub.f32 %v7963_v45, %v6998_v16 }
 0x7c8   : > { %v5153_v48 = vpop.eup %5152  ;;  %5164 = vpow2.f32 %v3048_v47  ;;  %v4696_v54 = vor.u32 %v4755_v35, %v4695_v27  ;;  %v3201_v47 = vunpack.c.h.b16 %v7036_v46  ;;  %v7965_v46 = vld [vmem:[#allocation46_spill] sm:$0xff]  ;;  %v4752_v27 = vld [vmem:[#allocation2 + $0x64] sm:$0xf] }
 0x7c9   : > { %v5155_v39 = vpop.eup %5154  ;;  %5166 = vpow2.f32 %v3036_v62  ;;  %v4753_v62 = vld [vmem:[#allocation2 + $0x64] sm:$0xf0]  ;;  %v3124_v2 = vmul.f32 1.442695, %v3015_v17  ;;  %v2960_v17 = vsub.f32 -inf, %v6968_v57 }
 0x7ca   : > { %v5157_v37 = vpop.eup %5156  ;;  %5168 = vpow2.f32 %v3106_v63  ;;  %3240 = vmatpush.bf16.msrb.mxu1 %v3186_v59  ;;  %v3184_v32 = vpack.c.bf16 %v5155_v39, %v5153_v48  ;;  %v4688_v5 = vor.u32 %v4753_v62, %v4687_v11  ;;  %v3011_v48 = vsub.f32 %v7965_v46, %v6998_v16 }
 0x7cb   : > { %3261 = vmatpush.bf16.msra.mxu0 %v3175_v14  ;;  %v5159_v56 = vpop.eup %5158  ;;  %5170 = vpow2.f32 %v3110_v13  ;;  %v3167_v6 = vpack.c.bf16 %v5157_v37, %v5151_v26  ;;  %v7113_v13 = vpack.c.b16 %v3201_v47, %v3199_v23 }
 0x7cc   : > { %v5161_v36 = vpop.eup %5160  ;;  %5172 = vpow2.f32 %v3040_v52  ;;  %v7966_v52 = vld [vmem:[#allocation47_spill] sm:$0xff] }
 0x7cd   : > { %v5163_v3 = vpop.eup %5162  ;;  %5174 = vpow2.f32 %v3160_v19  ;;  %v3013_v59 = vsub.f32 %v7966_v52, %v6998_v16 }
 0x7ce   : > { %v5165_v8 = vpop.eup %5164  ;;  %5176 = vpow2.f32 %v3098_v40  ;;  %3241 = vmatpush.bf16.msrb.mxu1 %v3184_v32  ;;  %v3182_v53 = vpack.c.bf16 %v5163_v3, %v5161_v36  ;;  %v7968_v40 = vld [vmem:[#allocation48_spill] sm:$0xff]  ;;  %v7969_v36 = vld [vmem:[#allocation49_spill] sm:$0xff] }
 0x7cf   : > { %3262 = vmatpush.bf16.msra.mxu0 %v3173_v24  ;;  %v5167_v14 = vpop.eup %5166  ;;  %5178 = vpow2.f32 %v3102_v43  ;;  %v3165_v20 = vpack.c.bf16 %v5165_v8, %v5159_v56  ;;  %v7962_v24 = vld [vmem:[#allocation43_spill] sm:$0xff]  ;;  %v3007_v56 = vsub.f32 %v7968_v40, %v6998_v16  ;;  %v3116_v43 = vmul.f32 1.442695, %v3011_v48 }
 0x7d0   : > { %v5169_v50 = vpop.eup %5168  ;;  %5180 = vpow2.f32 %v3156_v61  ;;  %v3021_v21 = vsub.f32 %v7962_v24, %v6998_v16  ;;  %v3009_v61 = vsub.f32 %v7969_v36, %v6998_v16  ;;  %v3120_v32 = vmul.f32 1.442695, %v3013_v59 }
 0x7d1   : > { %v5171_v44 = vpop.eup %5170  ;;  %5182 = vpow2.f32 %v3140_v7  ;;  %v3108_v0 = vmul.f32 1.442695, %v3007_v56 }
 0x7d2   : > { %v5173_v15 = vpop.eup %5172  ;;  %3242 = vmatpush.bf16.msrb.mxu1 %v3182_v53  ;;  %v3180_v22 = vpack.c.bf16 %v5171_v44, %v5169_v50  ;;  %v3136_v41 = vmul.f32 1.442695, %v3021_v21  ;;  %5184 = vpow2.f32 %v3144_v31  ;;  %v7971_v50 = vld [vmem:[#allocation51_spill] sm:$0xff]  ;;  %v3112_v9 = vmul.f32 1.442695, %v3009_v61 }
 0x7d3   : > { %3263 = vmatpush.bf16.msra.mxu0 %v3171_v25  ;;  %v5175_v18 = vpop.eup %5174  ;;  %v3163_v60 = vpack.c.bf16 %v5173_v15, %v5167_v14  ;;  %v7964_v25 = vld [vmem:[#allocation45_spill] sm:$0xff]  ;;  %5186 = vpow2.f32 %v3132_v30  ;;  %v7970_v14 = vld [vmem:[#allocation50_spill] sm:$0xff]  ;;  %v3005_v1 = vsub.f32 %v7971_v50, %v6998_v16 }
 0x7d4   : > { %v5177_v42 = vpop.eup %5176  ;;  %v3017_v28 = vsub.f32 %v7964_v25, %v6998_v16  ;;  %5188 = vpow2.f32 %v3136_v41  ;;  %v3003_v12 = vsub.f32 %v7970_v14, %v6998_v16  ;;  %v4697_v21 = vld [vmem:[#allocation2 + $0x78] sm:$0xf0]  ;;  %v2961_v25 = vmul.f32 1.442695, %v2960_v17 }
 0x7d5   : > { %v5179_v10 = vpop.eup %5178  ;;  %5190 = vpow2.f32 %v3124_v2  ;;  %v3104_v44 = vmul.f32 1.442695, %v3005_v1 }
 0x7d6   : > { %3227 = vmatmul.bf16.gmra.mxu0 %v7958_v33  ;;  %v5181_v49 = vpop.eup %5180  ;;  %3243 = vmatpush.bf16.msrb.mxu1 %v3180_v22  ;;  %v3178_v63 = vpack.c.bf16 %v5179_v10, %v5177_v42  ;;  %v3128_v39 = vmul.f32 1.442695, %v3017_v28  ;;  %v3100_v53 = vmul.f32 1.442695, %v3003_v12  ;;  %v4754_v22 = vld [vmem:[#allocation2 + $0x74] sm:$0xf] }
 0x7d7   : > { %3264 = vmatpush.bf16.msra.mxu0 %v3169_v58  ;;  %v3193_v26 = vpack.c.bf16 %v5175_v18, %v5181_v49  ;;  %v5183_v19 = vpop.eup %5182  ;;  %v7967_v58 = vmov 1065369472   ;;  %v4700_v10 = vor.u32 %v4754_v22, %v4697_v21 }
 0x7d8   : > { %v5185_v37 = vpop.eup %5184  ;;  %5192 = vpow2.f32 %v3128_v39 }
 0x7d9   : > { %v5187_v3 = vpop.eup %5186  ;;  %5194 = vpow2.f32 %v3116_v43 }
 0x7da   : > { %3244 = vmatpush.bf16.msrb.mxu1 %v3178_v63  ;;  %v5189_v8 = vpop.eup %5188  ;;  %5196 = vpow2.f32 %v3120_v32 }
 0x7db   : > { %3265 = vmatpush.bf16.msra.mxu0 %v3167_v6  ;;  %v3189_v6 = vpack.c.bf16 %v5185_v37, %v5183_v19  ;;  %v5191_v55 = vpop.eup %5190  ;;  %v3187_v4 = vpack.c.bf16 %v5189_v8, %v5187_v3  ;;  %5198 = vpow2.f32 %v3108_v0 }
 0x7dc   : > { %5200 = vpow2.f32 %v3112_v9 }
 0x7dd   : > { %3245 = vmatmul.bf16.vlgmr.msrb.gmra.mxu1 %v7113_v13  ;;  %5202 = vpow2.f32 %v3100_v53 }
 0x7de   : > { %3283 = vmatpush.bf16.msra.mxu1 %v3193_v26  ;;  %5204 = vpow2.f32 %v3104_v44 }
 0x7df   : > { %3266 = vmatpush.bf16.msra.mxu0 %v3165_v20  ;;  %5206 = vpow2.f32 %v2961_v25 }
 0x7e2   : > { %3284 = vmatpush.bf16.msra.mxu1 %v3191_v29  ;;  %v5193_v29 = vpop.eup %5192 }
 0x7e3   : > { %3267 = vmatpush.bf16.msra.mxu0 %v3163_v60  ;;  %v5195_v20 = vpop.eup %5194  ;;  %v3185_v15 = vpack.c.bf16 %v5193_v29, %v5191_v55  ;;  %v4689_v60 = vld [vmem:[#allocation2 + $0x68] sm:$0xf0] }
 0x7e4   : > { %v5197_v18 = vpop.eup %5196  ;;  %v4692_v49 = vor.u32 %v4752_v27, %v4689_v60 }
 0x7e5   : > { %v5199_v34 = vpop.eup %5198  ;;  %v3183_v16 = vpack.c.bf16 %v5197_v18, %v5195_v20 }
 0x7e6   : > { %3232 = vmatmul.bf16.gmra.mxu0 %v7967_v58  ;;  %3285 = vmatpush.bf16.msra.mxu1 %v3189_v6  ;;  %v5201_v7 = vpop.eup %5200 }
 0x7e7   : > { %3471 = vmatpush.bf16.msrb.mxu0 %v4696_v54  ;;  %v5203_v35 = vpop.eup %5202  ;;  %v3181_v42 = vpack.c.bf16 %v5201_v7, %v5199_v34 }
 0x7e8   : > { %v5205_v24 = vpop.eup %5204 }
 0x7e9   : > { %v3179_v31 = vpack.c.bf16 %v5205_v24, %v5203_v35  ;;  %v7153_v63 = vpop.eup %5206 }
 0x7ea   : > { %3286 = vmatpush.bf16.msra.mxu1 %v3187_v4  ;;  %v3315_v11 = vperm.slane %v7153_v63, 2  ;;  %v3316_v53 = vperm.slane %v7153_v63, 6 }
 0x7eb   : > { %3472 = vmatpush.bf16.msrb.mxu0 %v4688_v5 }
 0x7ec   : > { %v3320_v20 = vperm.slane %v3316_v53, 2 }
 0x7ed   : > { %3250 = vmatmul.bf16.gmra.mxu1 %v7972_v51 }
 0x7ee   : > { %3287 = vmatpush.bf16.msra.mxu1 %v3185_v15 }
 0x7f2   : > { %3288 = vmatpush.bf16.msra.mxu1 %v3183_v16 }
 0x7f6   : > { %3268 = vmatmul.bf16.vlgmr.msra.gmra.mxu0 %v7066_v38  ;;  %3289 = vmatpush.bf16.msra.mxu1 %v3181_v42  ;;  %v3381_v38 = vpop.trf.xlu0 }
 0x7fa   : > { %3290 = vmatpush.bf16.msra.mxu1 %v3179_v31 }
 0x7fd   : > { %3255 = vmatmul.bf16.gmra.mxu1 %v7967_v58 }
 0x7fe   : > { %3560 = vmatpush.bf16.msrb.mxu1 %v4700_v10  ;;  %v7140_v23 = vpop.trf.xlu0 }
 0x802   : > { %3561 = vmatpush.bf16.msrb.mxu1 %v4692_v49 }
 0x806   : > { %3273 = vmatmul.bf16.gmra.mxu0 %v7958_v33  ;;  %v3383_v54 = vpop.trf.xlu0 }
 0x80d   : > { %3291 = vmatmul.bf16.vlgmr.msra.gmra.mxu1 %v7113_v13  ;;  %v3319_v13 = vperm.slane %v3315_v11, 2 }
 0x80e   : > { %v7144_v47 = vpop.trf.xlu0 }
 0x80f   : > { %v3321_v2 = vmul.f32 0.0, %v3319_v13 }
 0x816   : > { %3278 = vmatmul.bf16.gmra.mxu0 %v7967_v58  ;;  %v3385_v33 = vpop.trf.xlu0 }
 0x81d   : > { %3296 = vmatmul.bf16.gmra.mxu1 %v7972_v51  ;;  %v3322_v51 = vmul.f32 0.0, %v3320_v20 }
 0x81e   : > { %v7149_v62 = vpop.trf.xlu0 }
 0x826   : > { %4701 = vmatmul.msk.bf16.vlgmr.msrb.gmra.mxu0 %vm1126_vm2, %v3381_v38  ;;  %v3387_v41 = vpop.trf.xlu0 }
 0x82d   : > { %3301 = vmatmul.bf16.gmra.mxu1 %v7967_v58 }
 0x82e   : > { %v7156_v5 = vpop.trf.xlu0 }
 0x836   : > { %4702 = vmatmul.msk.bf16.gmra.mxu0 %vm1126_vm2, %v3383_v54  ;;  %v3389_v52 = vpop.trf.xlu0 }
 0x83d   : > { %4717 = vmatmul.msk.bf16.vlgmr.msrb.gmra.mxu1 %vm1126_vm2, %v3381_v38 }
 0x83e   : > { %v7162_v40 = vpop.trf.xlu0 }
 0x843   : > { %v3223_v45 = vpop.f32.mrf.mxu0 }
 0x846   : > { %4703 = vmatmul.msk.bf16.gmra.mxu0 %vm1126_vm2, %v3385_v33  ;;  %v3391_v32 = vpop.trf.xlu0 }
 0x84b   : > { %v3225_v30 = vpop.f32.mrf.mxu0 }
 0x84d   : > { %4718 = vmatmul.msk.bf16.gmra.mxu1 %vm1126_vm2, %v3383_v54 }
 0x84e   : > { %v7170_v12 = vpop.trf.xlu0 }
 0x853   : > { %v3228_v28 = vpop.f32.mrf.mxu0 }
 0x856   : > { %4704 = vmatmul.msk.bf16.gmra.mxu0 %vm1126_vm2, %v3387_v41  ;;  %v3393_v55 = vpop.trf.xlu0 }
 0x85a   : > { %v3246_v57 = vpop.f32.mrf.mxu1 }
 0x85b   : > { %v3230_v26 = vpop.f32.mrf.mxu0  ;;  %v3247_v48 = vadd.f32 %v3246_v57, %v3223_v45 }
 0x85d   : > { %v7158_v59 = vadd.f32 %v3321_v2, %v3247_v48  ;;  %4719 = vmatmul.msk.bf16.gmra.mxu1 %vm1126_vm2, %v3385_v33  ;;  %v7981_v48 = vld [vmem:[#allocation35_spill] sm:$0xff] }
 0x85e   : > { %v7177_v44 = vpop.trf.xlu0 }
 0x85f   : > { %7973 = vst [vmem:[#allocation58_spill] sm:$0xff] %v7158_v59 }
 0x862   : > { %v3248_v39 = vpop.f32.mrf.mxu1 }
 0x863   : > { %v3233_v46 = vpop.f32.mrf.mxu0  ;;  %v3249_v37 = vadd.f32 %v3248_v39, %v3225_v30 }
 0x865   : > { %v7164_v56 = vadd.f32 %v3321_v2, %v3249_v37 }
 0x866   : > { %4705 = vmatmul.msk.bf16.gmra.mxu0 %vm1126_vm2, %v3389_v52  ;;  %v3395_v16 = vpop.trf.xlu0 }
 0x867   : > { %7974 = vst [vmem:[#allocation56_spill] sm:$0xff] %v7164_v56 }
 0x86a   : > { %v3251_v43 = vpop.f32.mrf.mxu1 }
 0x86b   : > { %v3235_v19 = vpop.f32.mrf.mxu0  ;;  %v3252_v61 = vadd.f32 %v3251_v43, %v3228_v28  ;;  %v3345_v28 = vmul.f32 0.0, %v7153_v63 }
 0x86d   : > { %v7166_v3 = vadd.f32 %v3321_v2, %v3252_v61  ;;  %4720 = vmatmul.msk.bf16.gmra.mxu1 %vm1126_vm2, %v3387_v41 }
 0x86e   : > { %v3396_v53 = vpop.trf.xlu0 }
 0x86f   : > { %7975 = vst [vmem:[#allocation11_spill] sm:$0xff] %v7166_v3 }
 0x872   : > { %v3253_v6 = vpop.f32.mrf.mxu1 }
 0x873   : > { %v3269_v36 = vpop.f32.mrf.mxu0  ;;  %v3254_v14 = vadd.f32 %v3253_v6, %v3230_v26 }
 0x875   : > { %v7172_v0 = vadd.f32 %v3321_v2, %v3254_v14 }
 0x876   : > { %4706 = vmatmul.msk.bf16.gmra.mxu0 %vm1126_vm2, %v3391_v32 }
 0x877   : > { %7976 = vst [vmem:[#allocation12_spill] sm:$0xff] %v7172_v0 }
 0x87a   : > { %v3256_v50 = vpop.f32.mrf.mxu1 }
 0x87b   : > { %v3271_v8 = vpop.f32.mrf.mxu0  ;;  %v3257_v9 = vadd.f32 %v3256_v50, %v3233_v46 }
 0x87d   : > { %4721 = vmatmul.msk.bf16.gmra.mxu1 %vm1126_vm2, %v3389_v52  ;;  %v7983_v52 = vld [vmem:[#allocation36_spill] sm:$0xff] }
 0x882   : > { %v3258_v4 = vpop.f32.mrf.mxu1 }
 0x883   : > { %v3274_v1 = vpop.f32.mrf.mxu0 }
 0x886   : > { %4707 = vmatmul.msk.bf16.gmra.mxu0 %vm1126_vm2, %v3393_v55 }
 0x88a   : > { %v3292_v15 = vpop.f32.mrf.mxu1 }
 0x88b   : > { %v3276_v29 = vpop.f32.mrf.mxu0  ;;  %v3293_v34 = vadd.f32 %v3292_v15, %v3269_v36 }
 0x88d   : > { %v7179_v7 = vadd.f32 %v3322_v51, %v3293_v34  ;;  %4722 = vmatmul.msk.bf16.gmra.mxu1 %vm1126_vm2, %v3391_v32 }
 0x88f   : > { %7977 = vst [vmem:[#allocation54_spill] sm:$0xff] %v7179_v7 }
 0x892   : > { %v3294_v35 = vpop.f32.mrf.mxu1 }
 0x893   : > { %v3279_v18 = vpop.f32.mrf.mxu0  ;;  %v3295_v24 = vadd.f32 %v3294_v35, %v3271_v8 }
 0x895   : > { %v7183_v21 = vadd.f32 %v3322_v51, %v3295_v24 }
 0x896   : > { %4708 = vmatmul.msk.bf16.gmra.mxu0 %vm1126_vm2, %v3395_v16 }
 0x897   : > { %7978 = vst [vmem:[#allocation14_spill] sm:$0xff] %v7183_v21 }
 0x89a   : > { %v3297_v31 = vpop.f32.mrf.mxu1 }
 0x89b   : > { %v3281_v42 = vpop.f32.mrf.mxu0  ;;  %v3298_v10 = vadd.f32 %v3297_v31, %v3274_v1 }
 0x89d   : > { %v7187_v60 = vadd.f32 %v3322_v51, %v3298_v10  ;;  %4723 = vmatmul.msk.bf16.gmra.mxu1 %vm1126_vm2, %v3393_v55 }
 0x89f   : > { %7979 = vst [vmem:[#allocation15_spill] sm:$0xff] %v7187_v60 }
 0x8a2   : > { %v3299_v27 = vpop.f32.mrf.mxu1 }
 0x8a3   : > { %v7185_v22 = vpop.f32.mrf.mxu0  ;;  %v3300_v38 = vadd.f32 %v3299_v27, %v3276_v29 }
 0x8a5   : > { %v7194_v54 = vadd.f32 %v3322_v51, %v3300_v38 }
 0x8a6   : > { %4709 = vmatmul.msk.bf16.gmra.mxu0 %vm1126_vm2, %v7140_v23 }
 0x8a7   : > { %7980 = vst [vmem:[#allocation13_spill] sm:$0xff] %v7194_v54 }
 0x8aa   : > { %v3302_v45 = vpop.f32.mrf.mxu1 }
 0x8ab   : > { %v7192_v49 = vpop.f32.mrf.mxu0  ;;  %v3303_v17 = vadd.f32 %v3302_v45, %v3279_v18 }
 0x8ad   : > { %v3348_v30 = vrot.slane %v3303_v17, 4  ;;  %4724 = vmatmul.msk.bf16.gmra.mxu1 %vm1126_vm2, %v3395_v16 }
 0x8af   : > { %v3349_v25 = vsel %vm373_vm0, %v3257_v9, %v3348_v30 }
 0x8b0   : > { %v3350_v41 = vrot.slane %v3349_v25, 6 }
 0x8b2   : > { %v3352_v26 = vadd.f32 %v3350_v41, %v3345_v28  ;;  %v3304_v11 = vpop.f32.mrf.mxu1 }
 0x8b3   : > { %v7196_v33 = vpop.f32.mrf.mxu0 }
 0x8b4   : > { %v4143_v57 = vperm.slane %v3352_v26, 2  ;;  %v4144_v46 = vperm.slane %v3352_v26, 6 }
 0x8b6   : > { %4710 = vmatmul.msk.bf16.gmra.mxu0 %vm1126_vm2, %v7144_v47  ;;  %v7206_v2 = vsel %vm4120_vm4, %v7981_v48, %v4143_v57  ;;  %v7209_v39 = vsel %vm4120_vm4, %v7983_v52, %v4144_v46 }
 0x8b7   : > { %7982 = vst [vmem:[#allocation52_spill] sm:$0xff] %v7206_v2 }
 0x8b8   : > { %7984 = vst [vmem:[#allocation32_spill] sm:$0xff] %v7209_v39 }
 0x8ba   : > { %v7211_v19 = vpop.f32.mrf.mxu1 }
 0x8bb   : > { %v7203_v13 = vpop.f32.mrf.mxu0  ;;  %7985 = vst [vmem:[#allocation19_spill] sm:$0xff] %v7211_v19 }
 0x8bd   : > { %4725 = vmatmul.msk.bf16.gmra.mxu1 %vm1126_vm2, %v7140_v23 }
 0x8c2   : > { %v7219_v63 = vpop.f32.mrf.mxu1 }
 0x8c3   : > { %v7213_v37 = vpop.f32.mrf.mxu0  ;;  %7986 = vst [vmem:[#allocation16_spill] sm:$0xff] %v7219_v63 }
 0x8c6   : > { %4711 = vmatmul.msk.bf16.gmra.mxu0 %vm1126_vm2, %v7149_v62 }
 0x8ca   : > { %v7223_v36 = vpop.f32.mrf.mxu1 }
 0x8cb   : > { %v7221_v43 = vpop.f32.mrf.mxu0  ;;  %7987 = vst [vmem:[#allocation33_spill] sm:$0xff] %v7223_v36  ;;  %v3680_v0 = vmax.f32 %v7211_v19, %v7223_v36 }
 0x8cd   : > { %4726 = vmatmul.msk.bf16.gmra.mxu1 %vm1126_vm2, %v7144_v47 }
 0x8d2   : > { %v7231_v32 = vpop.f32.mrf.mxu1 }
 0x8d3   : > { %v7225_v61 = vpop.f32.mrf.mxu0  ;;  %7988 = vst [vmem:[#allocation34_spill] sm:$0xff] %v7231_v32  ;;  %v3681_v54 = vmax.f32 %v7219_v63, %v7231_v32  ;;  %v3643_v32 = vmax.f32 %v7185_v22, %v7196_v33 }
 0x8d6   : > { %4712 = vmatmul.msk.bf16.gmra.mxu0 %vm1126_vm2, %v7156_v5 }
 0x8da   : > { %v7235_v6 = vpop.f32.mrf.mxu1 }
 0x8db   : > { %v7233_v23 = vpop.f32.mrf.mxu0  ;;  %7989 = vst [vmem:[#allocation20_spill] sm:$0xff] %v7235_v6  ;;  %v3682_v39 = vmax.f32 %v3680_v0, %v7235_v6 }
 0x8dd   : > { %4727 = vmatmul.msk.bf16.gmra.mxu1 %vm1126_vm2, %v7149_v62 }
 0x8e2   : > { %v7243_v14 = vpop.f32.mrf.mxu1 }
 0x8e3   : > { %v7237_v8 = vpop.f32.mrf.mxu0  ;;  %7990 = vst [vmem:[#allocation18_spill] sm:$0xff] %v7243_v14  ;;  %v3683_v3 = vmax.f32 %v3681_v54, %v7243_v14 }
 0x8e6   : > { %4713 = vmatmul.msk.bf16.gmra.mxu0 %vm1126_vm2, %v7162_v40 }
 0x8ea   : > { %v7247_v50 = vpop.f32.mrf.mxu1 }
 0x8eb   : > { %v7245_v47 = vpop.f32.mrf.mxu0  ;;  %7991 = vst [vmem:[#allocation57_spill] sm:$0xff] %v7247_v50 }
 0x8ed   : > { %4728 = vmatmul.msk.bf16.gmra.mxu1 %vm1126_vm2, %v7156_v5 }
 0x8f2   : > { %v7255_v9 = vpop.f32.mrf.mxu1 }
 0x8f3   : > { %v7253_v1 = vpop.f32.mrf.mxu0  ;;  %7992 = vst [vmem:[#allocation42_spill] sm:$0xff] %v7255_v9  ;;  %v3685_v2 = vmax.f32 %v3683_v3, %v7255_v9  ;;  %v3645_v3 = vmax.f32 %v3643_v32, %v7213_v37 }
 0x8f6   : > { %4714 = vmatmul.msk.bf16.gmra.mxu0 %vm1126_vm2, %v7170_v12 }
 0x8fa   : > { %v7257_v62 = vpop.f32.mrf.mxu1 }
 0x8fb   : > { %v7259_v55 = vpop.f32.mrf.mxu0 }
 0x8fd   : > { %4729 = vmatmul.msk.bf16.gmra.mxu1 %vm1126_vm2, %v7162_v40 }
 0x902   : > { %v7265_v4 = vpop.f32.mrf.mxu1 }
 0x903   : > { %7993 = vst [vmem:[#allocation43_spill] sm:$0xff] %v7265_v4  ;;  %v7267_v5 = vpop.f32.mrf.mxu0  ;;  %v3687_v63 = vmax.f32 %v3685_v2, %v7265_v4  ;;  %v3647_v2 = vmax.f32 %v3645_v3, %v7225_v61 }
 0x906   : > { %4715 = vmatmul.msk.bf16.gmra.mxu0 %vm1126_vm2, %v7177_v44 }
 0x90a   : > { %v7269_v29 = vpop.f32.mrf.mxu1 }
 0x90b   : > { %v7274_v20 = vpop.f32.mrf.mxu0 }
 0x90d   : > { %4730 = vmatmul.msk.bf16.gmra.mxu1 %vm1126_vm2, %v7170_v12 }
 0x912   : > { %v7276_v15 = vpop.f32.mrf.mxu1 }
 0x913   : > { %v7278_v40 = vpop.f32.mrf.mxu0  ;;  %v3689_v0 = vmax.f32 %v3687_v63, %v7276_v15  ;;  %v3649_v63 = vmax.f32 %v3647_v2, %v7237_v8 }
 0x916   : > { %4716 = vmatmul.msk.bf16.gmra.mxu0 %vm1126_vm2, %v3396_v53 }
 0x91a   : > { %v7280_v18 = vpop.f32.mrf.mxu1 }
 0x91b   : > { %v7286_v51 = vpop.f32.mrf.mxu0 }
 0x91d   : > { %4731 = vmatmul.msk.bf16.gmra.mxu1 %vm1126_vm2, %v7177_v44 }
 0x922   : > { %v7284_v34 = vpop.f32.mrf.mxu1 }
 0x923   : > { %v7290_v12 = vpop.f32.mrf.mxu0  ;;  %v3691_v9 = vmax.f32 %v3689_v0, %v7284_v34  ;;  %v3651_v0 = vmax.f32 %v3649_v63, %v7253_v1 }
 0x92a   : > { %v7288_v16 = vpop.f32.mrf.mxu1 }
 0x92b   : > { %v7295_v42 = vpop.f32.mrf.mxu0 }
 0x92d   : > { %4732 = vmatmul.msk.bf16.gmra.mxu1 %vm1126_vm2, %v3396_v53 }
 0x932   : > { %v7293_v35 = vpop.f32.mrf.mxu1 }
 0x933   : > { %v7299_v31 = vpop.f32.mrf.mxu0 }
 0x93a   : > { %v7297_v24 = vpop.f32.mrf.mxu1 }
 0x93b   : > { %7994 = vst [vmem:[#allocation44_spill] sm:$0xff] %v7297_v24  ;;  %v7305_v27 = vpop.f32.mrf.mxu0 }
 0x942   : > { %v7301_v10 = vpop.f32.mrf.mxu1 }
 0x943   : > { %7995 = vst [vmem:[#allocation45_spill] sm:$0xff] %v7301_v10  ;;  %v7309_v45 = vpop.f32.mrf.mxu0 }
 0x94a   : > { %v7303_v44 = vpop.f32.mrf.mxu1 }
 0x94b   : > { %7996 = vst [vmem:[#allocation46_spill] sm:$0xff] %v7303_v44  ;;  %v7313_v30 = vpop.f32.mrf.mxu0 }
 0x952   : > { %v7307_v38 = vpop.f32.mrf.mxu1 }
 0x953   : > { %7997 = vst [vmem:[#allocation47_spill] sm:$0xff] %v7307_v38  ;;  %v7317_v28 = vpop.f32.mrf.mxu0 }
 0x95a   : > { %v7311_v17 = vpop.f32.mrf.mxu1 }
 0x95b   : > { %7998 = vst [vmem:[#allocation48_spill] sm:$0xff] %v7311_v17  ;;  %v7321_v26 = vpop.f32.mrf.mxu0 }
 0x962   : > { %v7315_v25 = vpop.f32.mrf.mxu1 }
 0x963   : > { %7999 = vst [vmem:[#allocation49_spill] sm:$0xff] %v7315_v25  ;;  %v7327_v46 = vpop.f32.mrf.mxu0 }
 0x96a   : > { %v7319_v41 = vpop.f32.mrf.mxu1 }
 0x96b   : > { %8000 = vst [vmem:[#allocation50_spill] sm:$0xff] %v7319_v41  ;;  %v7331_v52 = vpop.f32.mrf.mxu0 }
 0x972   : > { %v7323_v11 = vpop.f32.mrf.mxu1 }
 0x973   : > { %8001 = vst [vmem:[#allocation51_spill] sm:$0xff] %v7323_v11  ;;  %v7335_v21 = vpop.f32.mrf.mxu0 }
 0x974   : > { %8005 = vst [vmem:[#allocation59_spill] sm:$0xff] %v7335_v21  ;;  %v3644_v21 = vmax.f32 %v7192_v49, %v7203_v13 }
 0x976   : > { %v3646_v19 = vmax.f32 %v3644_v21, %v7221_v43 }
 0x978   : > { %v3648_v36 = vmax.f32 %v3646_v19, %v7233_v23 }
 0x97a   : > { %v7325_v57 = vpop.f32.mrf.mxu1  ;;  %v3650_v6 = vmax.f32 %v3648_v36, %v7245_v47 }
 0x97b   : > { %8002 = vst [vmem:[#allocation21_spill] sm:$0xff] %v7325_v57  ;;  %v7339_v56 = vpop.f32.mrf.mxu0 }
 0x97c   : > { %8007 = vst [vmem:[#allocation61_spill] sm:$0xff] %v7339_v56  ;;  %v3684_v56 = vmax.f32 %v3682_v39, %v7247_v50  ;;  %v3652_v32 = vmax.f32 %v3650_v6, %v7259_v55 }
 0x97e   : > { %v3686_v54 = vmax.f32 %v3684_v56, %v7257_v62  ;;  %v3693_v56 = vmax.f32 %v3691_v9, %v7293_v35  ;;  %v3654_v3 = vmax.f32 %v3652_v32, %v7274_v20  ;;  %v3653_v9 = vmax.f32 %v3651_v0, %v7267_v5 }
 0x980   : > { %v3688_v14 = vmax.f32 %v3686_v54, %v7269_v29  ;;  %v3695_v54 = vmax.f32 %v3693_v56, %v7301_v10  ;;  %v3656_v2 = vmax.f32 %v3654_v3, %v7286_v51  ;;  %v3655_v56 = vmax.f32 %v3653_v9, %v7278_v40 }
 0x982   : > { %v7329_v48 = vpop.f32.mrf.mxu1  ;;  %v3690_v21 = vmax.f32 %v3688_v14, %v7280_v18  ;;  %v3697_v14 = vmax.f32 %v3695_v54, %v7307_v38  ;;  %v3658_v10 = vmax.f32 %v3656_v2, %v7295_v42 }
 0x983   : > { %8003 = vst [vmem:[#allocation35_spill] sm:$0xff] %v7329_v48  ;;  %v7345_v60 = vpop.f32.mrf.mxu0 }
 0x984   : > { %v3692_v19 = vmax.f32 %v3690_v21, %v7288_v16  ;;  %v3699_v21 = vmax.f32 %v3697_v14, %v7315_v25  ;;  %v3660_v54 = vmax.f32 %v3658_v10, %v7305_v27 }
 0x986   : > { %v3694_v36 = vmax.f32 %v3692_v19, %v7297_v24  ;;  %v3701_v32 = vmax.f32 %v3699_v21, %v7323_v11  ;;  %v3657_v19 = vmax.f32 %v3655_v56, %v7290_v12  ;;  %v3662_v14 = vmax.f32 %v3660_v54, %v7313_v30  ;;  %v8008_v24 = vld [vmem:[#allocation61_spill] sm:$0xff] }
 0x988   : > { %v3696_v6 = vmax.f32 %v3694_v36, %v7303_v44  ;;  %v3703_v3 = vmax.f32 %v3701_v32, %v7329_v48  ;;  %v3659_v36 = vmax.f32 %v3657_v19, %v7299_v31  ;;  %v3664_v56 = vmax.f32 %v3662_v14, %v7321_v26  ;;  %v8009_v14 = vld [vmem:[#allocation59_spill] sm:$0xff] }
 0x98a   : > { %v7333_v53 = vpop.f32.mrf.mxu1  ;;  %v3698_v63 = vmax.f32 %v3696_v6, %v7311_v17  ;;  %v3661_v21 = vmax.f32 %v3659_v36, %v7309_v45  ;;  %v3666_v19 = vmax.f32 %v3664_v56, %v7331_v52 }
 0x98b   : > { %8004 = vst [vmem:[#allocation36_spill] sm:$0xff] %v7333_v53  ;;  %v7367_v39 = vpop.f32.mrf.mxu0 }
 0x98c   : > { %v3700_v0 = vmax.f32 %v3698_v63, %v7319_v41  ;;  %v3663_v32 = vmax.f32 %v3661_v21, %v7317_v28  ;;  %v3668_v38 = vmax.f32 %v3666_v19, %v8008_v24 }
 0x98e   : > { %v3702_v9 = vmax.f32 %v3700_v0, %v7325_v57 }
 0x990   : > { %v3704_v10 = vmax.f32 %v3702_v9, %v7333_v53 }
 0x992   : > { %v7337_v7 = vpop.f32.mrf.mxu1 }
 0x993   : > { %8006 = vst [vmem:[#allocation60_spill] sm:$0xff] %v7337_v7  ;;  %v7391_v4 = vpop.f32.mrf.mxu0  ;;  %v3705_v2 = vmax.f32 %v3703_v3, %v7337_v7  ;;  %v3665_v3 = vmax.f32 %v3663_v32, %v7327_v46 }
 0x995   : > { %v3667_v9 = vmax.f32 %v3665_v3, %v8009_v14 }
 0x997   : > { %v3669_v21 = vmax.f32 %v3667_v9, %v7345_v60 }
 0x99a   : > { %v7341_v59 = vpop.f32.mrf.mxu1 }
 0x99b   : > { %v3706_v54 = vmax.f32 %v3704_v10, %v7341_v59  ;;  %v7414_v44 = vpop.f32.mrf.mxu0  ;;  %v3671_v10 = vmax.f32 %v3669_v21, %v7391_v4 }
 0x9a2   : > { %v7352_v58 = vpop.f32.mrf.mxu1 }
 0x9a3   : > { %v3707_v63 = vmax.f32 %v3705_v2, %v7352_v58  ;;  %v3670_v2 = vmax.f32 %v3668_v38, %v7367_v39 }
 0x9a5   : > { %v3672_v56 = vmax.f32 %v3670_v2, %v7414_v44 }
 0x9a7   : > { %v3673_v17 = vmax.f32 %v3671_v10, %v3672_v56 }
 0x9a9   : > { %v3674_v11 = vrot.slane %v3673_v17, 4 }
 0x9aa   : > { %v7377_v50 = vpop.f32.mrf.mxu1 }
 0x9ab   : > { %v3708_v36 = vmax.f32 %v3706_v54, %v7377_v50  ;;  %v3675_v41 = vmax.f32 %v3673_v17, %v3674_v11 }
 0x9ad   : > { %v3676_v48 = vrot.slane %v3675_v41, 2 }
 0x9af   : > { %v3677_v7 = vmax.f32 %v3675_v41, %v3676_v48 }
 0x9b1   : > { %v3678_v53 = vrot.slane %v3677_v7, 1 }
 0x9b2   : > { %v7401_v6 = vpop.f32.mrf.mxu1 }
 0x9b3   : > { %v3709_v0 = vmax.f32 %v3707_v63, %v7401_v6 }
 0x9b5   : > { %v3710_v25 = vmax.f32 %v3708_v36, %v3709_v0  ;;  %v3679_v0 = vmax.f32 %v3677_v7, %v3678_v53 }
 0x9b7   : > { %v3711_v63 = vrot.slane %v3710_v25, 4 }
 0x9b9   : > { %v3712_v32 = vmax.f32 %v3710_v25, %v3711_v63 }
 0x9bb   : > { %v3713_v19 = vrot.slane %v3712_v32, 2 }
 0x9bd   : > { %v3714_v54 = vmax.f32 %v3712_v32, %v3713_v19 }
 0x9bf   : > { %v3715_v57 = vrot.slane %v3714_v54, 1 }
 0x9c1   : > { %v3716_v3 = vmax.f32 %v3714_v54, %v3715_v57 }
 0x9c3   : > { %v3719_v38 = vrot.slane %v3716_v3, 4 }
 0x9c5   : > { %v3720_v36 = vsel %vm373_vm0, %v3679_v0, %v3719_v38 }
 0x9c6   : > { %v7422_v9 = vrot.slane %v3720_v36, 5 }
 0x9c8   : > { %v3728_v2 = vperm.slane %v7422_v9, 3 }
 0x9ca   : > { %v7425_v21 = vperm.slane %v3728_v2, 3 }
 0x9cc   : > { %v3762_v25 = vsub.f32 %v7278_v40, %v7425_v21  ;;  %v3764_v17 = vsub.f32 %v7286_v51, %v7425_v21  ;;  %v3758_v41 = vsub.f32 %v7267_v5, %v7425_v21  ;;  %v3760_v7 = vsub.f32 %v7274_v20, %v7425_v21 }
 0x9cd   : > { %v3754_v48 = vsub.f32 %v7253_v1, %v7425_v21  ;;  %v3756_v56 = vsub.f32 %v7259_v55, %v7425_v21  ;;  %v3729_v40 = vperm.slane %v7422_v9, 7  ;;  %v3750_v5 = vsub.f32 %v7237_v8, %v7425_v21 }
 0x9ce   : > { %v3854_v11 = vmul.f32 1.442695, %v3762_v25  ;;  %v3858_v57 = vmul.f32 1.442695, %v3764_v17  ;;  %v3846_v53 = vmul.f32 1.442695, %v3758_v41  ;;  %v3752_v20 = vsub.f32 %v7245_v47, %v7425_v21 }
 0x9cf   : > { %v3850_v10 = vmul.f32 1.442695, %v3760_v7  ;;  %v3838_v51 = vmul.f32 1.442695, %v3754_v48  ;;  %v3842_v63 = vmul.f32 1.442695, %v3756_v56  ;;  %v3746_v55 = vsub.f32 %v7225_v61, %v7425_v21 }
 0x9d0   : > { %5208 = vpow2.f32 %v3854_v11  ;;  %v7444_v32 = vperm.slane %v3729_v40, 3  ;;  %v3830_v19 = vmul.f32 1.442695, %v3750_v5  ;;  %v3748_v3 = vsub.f32 %v7233_v23, %v7425_v21 }
 0x9d1   : > { %5210 = vpow2.f32 %v3858_v57  ;;  %v3834_v8 = vmul.f32 1.442695, %v3752_v20  ;;  %v3742_v2 = vsub.f32 %v7213_v37, %v7425_v21  ;;  %v3822_v25 = vmul.f32 1.442695, %v3746_v55 }
 0x9d2   : > { %5212 = vpow2.f32 %v3846_v53  ;;  %v3797_v47 = vsub.f32 %v7401_v6, %v7444_v32  ;;  %v3744_v61 = vsub.f32 %v7221_v43, %v7425_v21  ;;  %v3826_v17 = vmul.f32 1.442695, %v3748_v3 }
 0x9d3   : > { %5214 = vpow2.f32 %v3850_v10  ;;  %v3734_v41 = vsub.f32 %v7185_v22, %v7425_v21  ;;  %v3736_v6 = vsub.f32 %v7192_v49, %v7425_v21  ;;  %v3738_v37 = vsub.f32 %v7196_v33, %v7425_v21 }
 0x9d4   : > { %5216 = vpow2.f32 %v3838_v51  ;;  %v3924_v57 = vmul.f32 1.442695, %v3797_v47  ;;  %v3814_v48 = vmul.f32 1.442695, %v3742_v2  ;;  %v3740_v43 = vsub.f32 %v7203_v13, %v7425_v21 }
 0x9d5   : > { %5218 = vpow2.f32 %v3842_v63  ;;  %v3818_v53 = vmul.f32 1.442695, %v3744_v61  ;;  %v3755_v22 = vsub.f32 %v7269_v29, %v7444_v32  ;;  %v3798_v10 = vmul.f32 1.442695, %v3734_v41 }
 0x9d6   : > { %v5209_v1 = vpop.eup %5208  ;;  %5220 = vpow2.f32 %v3830_v19  ;;  %v3759_v49 = vsub.f32 %v7280_v18, %v7444_v32  ;;  %v3802_v33 = vmul.f32 1.442695, %v3736_v6  ;;  %v3763_v51 = vsub.f32 %v7288_v16, %v7444_v32 }
 0x9d7   : > { %v5211_v54 = vpop.eup %5210  ;;  %5222 = vpow2.f32 %v3834_v8  ;;  %v3806_v20 = vmul.f32 1.442695, %v3738_v37  ;;  %v3765_v13 = vsub.f32 %v7293_v35, %v7444_v32  ;;  %v3810_v63 = vmul.f32 1.442695, %v3740_v43 }
 0x9d8   : > { %v5213_v38 = vpop.eup %5212  ;;  %v3940_v0 = vpack.c.bf16 %v5211_v54, %v5209_v1  ;;  %5224 = vpow2.f32 %v3822_v25  ;;  %v3791_v1 = vsub.f32 %v7341_v59, %v7444_v32  ;;  %v3840_v55 = vmul.f32 1.442695, %v3755_v22 }
 0x9d9   : > { %v5215_v36 = vpop.eup %5214  ;;  %5226 = vpow2.f32 %v3826_v17  ;;  %v3761_v54 = vsub.f32 %v7284_v34, %v7444_v32  ;;  %v3848_v16 = vmul.f32 1.442695, %v3759_v49  ;;  %v3793_v3 = vsub.f32 %v7352_v58, %v7444_v32 }
 0x9da   : > { %3978 = vmatpush.bf16.msra.mxu2 %v3940_v0  ;;  %v5217_v23 = vpop.eup %5216  ;;  %v3938_v7 = vpack.c.bf16 %v5215_v36, %v5213_v38  ;;  %5228 = vpow2.f32 %v3924_v57  ;;  %v3856_v35 = vmul.f32 1.442695, %v3763_v51  ;;  %v3794_v59 = vsub.f32 %v7391_v4, %v7425_v21 }
 0x9db   : > { %v5219_v11 = vpop.eup %5218  ;;  %5230 = vpow2.f32 %v3814_v48  ;;  %v3860_v38 = vmul.f32 1.442695, %v3765_v13  ;;  %v3795_v36 = vsub.f32 %v7377_v50, %v7444_v32  ;;  %v3912_v34 = vmul.f32 1.442695, %v3791_v1 }
 0x9dc   : > { %v5221_v56 = vpop.eup %5220  ;;  %v3936_v40 = vpack.c.bf16 %v5219_v11, %v5217_v23  ;;  %5232 = vpow2.f32 %v3818_v53  ;;  %v3796_v58 = vsub.f32 %v7414_v44, %v7425_v21  ;;  %v3852_v25 = vmul.f32 1.442695, %v3761_v54  ;;  %v8013_v54 = vld [vmem:[#allocation42_spill] sm:$0xff] }
 0x9dd   : > { %v5223_v5 = vpop.eup %5222  ;;  %5234 = vpow2.f32 %v3798_v10  ;;  %v3790_v17 = vsub.f32 %v7345_v60, %v7425_v21  ;;  %v3916_v4 = vmul.f32 1.442695, %v3793_v3  ;;  %v3792_v50 = vsub.f32 %v7367_v39, %v7425_v21 }
 0x9de   : > { %3979 = vmatpush.bf16.msra.mxu2 %v3938_v7  ;;  %v5225_v29 = vpop.eup %5224  ;;  %v3934_v19 = vpack.c.bf16 %v5223_v5, %v5221_v56  ;;  %5236 = vpow2.f32 %v3802_v33  ;;  %v3918_v41 = vmul.f32 1.442695, %v3794_v59  ;;  %v3757_v11 = vsub.f32 %v7276_v15, %v7444_v32 }
 0x9df   : > { %v5227_v18 = vpop.eup %5226  ;;  %5238 = vpow2.f32 %v3806_v20  ;;  %v3920_v44 = vmul.f32 1.442695, %v3795_v36  ;;  %v3751_v60 = vsub.f32 %v7257_v62, %v7444_v32  ;;  %v3922_v37 = vmul.f32 1.442695, %v3796_v58  ;;  %v8010_v62 = vld [vmem:[#allocation43_spill] sm:$0xff] }
 0x9e0   : > { %v7478_v8 = vpop.eup %5228  ;;  %5240 = vpow2.f32 %v3810_v63  ;;  %v3932_v47 = vpack.c.bf16 %v5227_v18, %v5225_v29  ;;  %v3786_v39 = vsub.f32 %v8009_v14, %v7425_v21  ;;  %v3910_v43 = vmul.f32 1.442695, %v3790_v17  ;;  %v8011_v14 = vld [vmem:[#allocation57_spill] sm:$0xff]  ;;  %v8012_v29 = vld [vmem:[#allocation20_spill] sm:$0xff]  ;;  %v8014_v17 = vld [vmem:[#allocation18_spill] sm:$0xff] }
 0x9e1   : > { %v5231_v0 = vpop.eup %5230  ;;  %5242 = vpow2.f32 %v3840_v55  ;;  %v3788_v15 = vsub.f32 %v8008_v24, %v7425_v21  ;;  %v3914_v56 = vmul.f32 1.442695, %v3792_v50  ;;  %v3753_v10 = vsub.f32 %v8010_v62, %v7444_v32 }
 0x9e2   : > { %3980 = vmatpush.bf16.msra.mxu2 %v3936_v40  ;;  %v5233_v2 = vpop.eup %5232  ;;  %5244 = vpow2.f32 %v3848_v16  ;;  %v3844_v40 = vmul.f32 1.442695, %v3757_v11  ;;  %v3747_v33 = vsub.f32 %v8011_v14, %v7444_v32  ;;  %v3832_v51 = vmul.f32 1.442695, %v3751_v60 }
 0x9e3   : > { %v5235_v61 = vpop.eup %5234  ;;  %5246 = vpow2.f32 %v3856_v35  ;;  %v3930_v57 = vpack.c.bf16 %v5233_v2, %v5231_v0  ;;  %v3782_v24 = vsub.f32 %v7327_v46, %v7425_v21  ;;  %v3902_v13 = vmul.f32 1.442695, %v3786_v39 }
 0x9e4   : > { %v5237_v23 = vpop.eup %5236  ;;  %5248 = vpow2.f32 %v3860_v38  ;;  %v3743_v1 = vsub.f32 %v8012_v29, %v7444_v32  ;;  %v3784_v55 = vsub.f32 %v7331_v52, %v7425_v21  ;;  %v3749_v16 = vsub.f32 %v8013_v54, %v7444_v32  ;;  %v8019_v29 = vld [vmem:[#allocation16_spill] sm:$0xff] }
 0x9e5   : > { %v5239_v7 = vpop.eup %5238  ;;  %5250 = vpow2.f32 %v3912_v34  ;;  %v3836_v3 = vmul.f32 1.442695, %v3753_v10  ;;  %v3926_v46 = vpack.c.bf16 %v5237_v23, %v5235_v61  ;;  %v3824_v59 = vmul.f32 1.442695, %v3747_v33 }
 0x9e6   : > { %3981 = vmatpush.bf16.msra.mxu2 %v3934_v19  ;;  %v5241_v6 = vpop.eup %5240  ;;  %5252 = vpow2.f32 %v3852_v25  ;;  %v3906_v19 = vmul.f32 1.442695, %v3788_v15  ;;  %v3778_v52 = vsub.f32 %v7317_v28, %v7425_v21  ;;  %v3894_v34 = vmul.f32 1.442695, %v3782_v24 }
 0x9e7   : > { %v7494_v48 = vpop.eup %5242  ;;  %5254 = vpow2.f32 %v3916_v4  ;;  %v3928_v5 = vpack.c.bf16 %v5241_v6, %v5239_v7  ;;  %v3780_v2 = vsub.f32 %v7321_v26, %v7425_v21  ;;  %v3898_v58 = vmul.f32 1.442695, %v3784_v55  ;;  %v8016_v26 = vld [vmem:[#allocation9_spill] sm:$0xff] }
 0x9e8   : > { %v7498_v53 = vpop.eup %5244  ;;  %5256 = vpow2.f32 %v3918_v41  ;;  %v3745_v4 = vsub.f32 %v8014_v17, %v7444_v32  ;;  %v3828_v23 = vmul.f32 1.442695, %v3749_v16  ;;  %v8015_v41 = vld [vmem:[#allocation33_spill] sm:$0xff]  ;;  %v3816_v11 = vmul.f32 1.442695, %v3743_v1 }
 0x9e9   : > { %v5247_v22 = vpop.eup %5246  ;;  %5258 = vpow2.f32 %v3920_v44  ;;  %v3739_v7 = vsub.f32 %v8015_v41, %v7444_v32  ;;  %v3774_v6 = vsub.f32 %v7309_v45, %v7425_v21  ;;  %v3886_v60 = vmul.f32 1.442695, %v3778_v52  ;;  %v8018_v45 = vld [vmem:[#allocation19_spill] sm:$0xff] }
 0x9ea   : > { %3982 = vmatpush.bf16.msra.mxu2 %v3932_v47  ;;  %v5249_v49 = vpop.eup %5248  ;;  %5260 = vpow2.f32 %v3922_v37  ;;  %v3776_v39 = vsub.f32 %v7313_v30, %v7425_v21  ;;  %v3820_v62 = vmul.f32 1.442695, %v3745_v4  ;;  %v3770_v30 = vsub.f32 %v7299_v31, %v7425_v21 }
 0x9eb   : > { %v7506_v20 = vpop.eup %5250  ;;  %5262 = vpow2.f32 %v3910_v43  ;;  %v3941_v38 = vpack.c.bf16 %v5249_v49, %v5247_v22  ;;  %v3890_v43 = vmul.f32 1.442695, %v3780_v2  ;;  %v3878_v33 = vmul.f32 1.442695, %v3774_v6 }
 0x9ec   : > { %v5253_v63 = vpop.eup %5252  ;;  %5264 = vpow2.f32 %v3914_v56  ;;  %v8017_v56 = vld [vmem:[#allocation34_spill] sm:$0xff]  ;;  %v3772_v24 = vsub.f32 %v7305_v27, %v7425_v21  ;;  %v3737_v1 = vsub.f32 %v8019_v29, %v7444_v32  ;;  %v8027_v29 = vld [vmem:[#allocation48_spill] sm:$0xff] }
 0x9ed   : > { %v7514_v18 = vpop.eup %5254  ;;  %5266 = vpow2.f32 %v3844_v40  ;;  %v3939_v44 = vpack.c.bf16 %v5253_v63, %v7498_v53  ;;  %v3741_v22 = vsub.f32 %v8017_v56, %v7444_v32  ;;  %v3735_v40 = vsub.f32 %v8018_v45, %v7444_v32 }
 0x9ee   : > { %3983 = vmatpush.bf16.msra.mxu2 %v3930_v57  ;;  %v5257_v35 = vpop.eup %5256  ;;  %5268 = vpow2.f32 %v3832_v51  ;;  %v3955_v0 = vpack.c.bf16 %v7514_v18, %v7506_v20  ;;  %v3804_v52 = vmul.f32 1.442695, %v3737_v1  ;;  %v3775_v1 = vsub.f32 %v8027_v29, %v7444_v32 }
 0x9ef   : > { %v7520_v36 = vpop.eup %5258  ;;  %5270 = vpow2.f32 %v3902_v13  ;;  %v3882_v13 = vmul.f32 1.442695, %v3776_v39  ;;  %v3812_v55 = vmul.f32 1.442695, %v3741_v22  ;;  %v3800_v54 = vmul.f32 1.442695, %v3735_v40 }
 0x9f0   : > { %v5261_v47 = vpop.eup %5260  ;;  %5272 = vpow2.f32 %v3906_v19  ;;  %v3957_v25 = vpack.c.bf16 %v7478_v8, %v7520_v36  ;;  %v8032_v8 = vld [vmem:[#allocation47_spill] sm:$0xff] }
 0x9f1   : > { %v5263_v61 = vpop.eup %5262  ;;  %5274 = vpow2.f32 %v3836_v3  ;;  %v3956_v28 = vpack.c.bf16 %v5261_v47, %v5257_v35  ;;  %v3766_v3 = vsub.f32 %v7290_v12, %v7425_v21  ;;  %v3768_v35 = vsub.f32 %v7295_v42, %v7425_v21 }
 0x9f2   : > { %3984 = vmatpush.bf16.msra.mxu2 %v3928_v5  ;;  %v5265_v50 = vpop.eup %5264  ;;  %5276 = vpow2.f32 %v3824_v59  ;;  %v3808_v5 = vmul.f32 1.442695, %v3739_v7  ;;  %v3874_v59 = vmul.f32 1.442695, %v3772_v24  ;;  %v8021_v7 = vld [vmem:[#allocation36_spill] sm:$0xff]  ;;  %v3773_v36 = vsub.f32 %v8032_v8, %v7444_v32 }
 0x9f3   : > { %v5267_v57 = vpop.eup %5266  ;;  %5278 = vpow2.f32 %v3894_v34  ;;  %4001 = vmatpush.bf16.msra.mxu3 %v3956_v28  ;;  %v3954_v53 = vpack.c.bf16 %v5265_v50, %v5263_v61  ;;  %v3862_v61 = vmul.f32 1.442695, %v3766_v3  ;;  %v3866_v17 = vmul.f32 1.442695, %v3768_v35 }
 0x9f4   : > { %v5269_v37 = vpop.eup %5268  ;;  %5280 = vpow2.f32 %v3898_v58  ;;  %v3937_v49 = vpack.c.bf16 %v5267_v57, %v7494_v48  ;;  %v8022_v57 = vld [vmem:[#allocation60_spill] sm:$0xff]  ;;  %v8030_v3 = vmov 1065369472  }
 0x9f5   : > { %v5271_v15 = vpop.eup %5270  ;;  %5282 = vpow2.f32 %v3828_v23  ;;  %v8020_v23 = vld [vmem:[#allocation40_spill] sm:$0xff]  ;;  %v3789_v6 = vsub.f32 %v8022_v57, %v7444_v32 }
 0x9f6   : > { %3985 = vmatpush.bf16.msra.mxu2 %v3926_v46  ;;  %v5273_v10 = vpop.eup %5272  ;;  %5284 = vpow2.f32 %v3816_v11  ;;  %v3870_v46 = vmul.f32 1.442695, %v3770_v30  ;;  %v3787_v11 = vsub.f32 %v8021_v7, %v7444_v32  ;;  %v8035_v7 = vld [vmem:[#allocation41_spill] sm:$0xff] }
 0x9f7   : > { %v5275_v14 = vpop.eup %5274  ;;  %5286 = vpow2.f32 %v3886_v60  ;;  %4002 = vmatpush.bf16.msra.mxu3 %v3954_v53  ;;  %v3952_v48 = vpack.c.bf16 %v5273_v10, %v5271_v15  ;;  %v8023_v15 = vld [vmem:[#allocation21_spill] sm:$0xff]  ;;  %v8024_v53 = vld [vmem:[#allocation35_spill] sm:$0xff]  ;;  %v3908_v45 = vmul.f32 1.442695, %v3789_v6 }
 0x9f8   : > { %v5277_v51 = vpop.eup %5276  ;;  %5288 = vpow2.f32 %v3890_v43  ;;  %v3935_v31 = vpack.c.bf16 %v5275_v14, %v5269_v37  ;;  %v3783_v56 = vsub.f32 %v8023_v15, %v7444_v32  ;;  %v3904_v22 = vmul.f32 1.442695, %v3787_v11  ;;  %v8025_v14 = vld [vmem:[#allocation50_spill] sm:$0xff] }
 0x9f9   : > { %3986 = vmatmul.bf16.vlgmr.msra.gmra.mxu2 %v8016_v26  ;;  %v5279_v63 = vpop.eup %5278  ;;  %5290 = vpow2.f32 %v3820_v62  ;;  %v3785_v10 = vsub.f32 %v8024_v53, %v7444_v32  ;;  %v3779_v30 = vsub.f32 %v8025_v14, %v7444_v32 }
 0x9fa   : > { %4024 = vmatpush.bf16.msrb.mxu2 %v3941_v38  ;;  %v5281_v19 = vpop.eup %5280  ;;  %5292 = vpow2.f32 %v3808_v5 }
 0x9fb   : > { %v5283_v16 = vpop.eup %5282  ;;  %5294 = vpow2.f32 %v3878_v33  ;;  %4003 = vmatpush.bf16.msra.mxu3 %v3952_v48  ;;  %v3950_v34 = vpack.c.bf16 %v5281_v19, %v5279_v63  ;;  %v3896_v33 = vmul.f32 1.442695, %v3783_v56  ;;  %v8028_v48 = vld [vmem:[#allocation49_spill] sm:$0xff] }
 0x9fc   : > { %v5285_v27 = vpop.eup %5284  ;;  %5296 = vpow2.f32 %v3882_v13  ;;  %v3933_v2 = vpack.c.bf16 %v5283_v16, %v5277_v51  ;;  %v8026_v51 = vld [vmem:[#allocation51_spill] sm:$0xff]  ;;  %v3900_v13 = vmul.f32 1.442695, %v3785_v10  ;;  %v3777_v19 = vsub.f32 %v8028_v48, %v7444_v32  ;;  %v8029_v16 = vld [vmem:[#allocation10_spill] sm:$0xff] }
 0x9fd   : > { %v5287_v38 = vpop.eup %5286  ;;  %5298 = vpow2.f32 %v3812_v55  ;;  %v3781_v24 = vsub.f32 %v8026_v51, %v7444_v32  ;;  %v3888_v55 = vmul.f32 1.442695, %v3779_v30 }
 0x9fe   : > { %4025 = vmatpush.bf16.msrb.mxu2 %v3939_v44  ;;  %v5289_v47 = vpop.eup %5288  ;;  %5300 = vpow2.f32 %v3800_v54 }
 0x9ff   : > { %v5291_v58 = vpop.eup %5290  ;;  %5302 = vpow2.f32 %v3870_v46  ;;  %4004 = vmatpush.bf16.msra.mxu3 %v3950_v34  ;;  %v3948_v42 = vpack.c.bf16 %v5289_v47, %v5287_v38  ;;  %v3892_v54 = vmul.f32 1.442695, %v3781_v24  ;;  %v8033_v47 = vld [vmem:[#allocation44_spill] sm:$0xff] }
 0xa00   : > { %v5293_v12 = vpop.eup %5292  ;;  %5304 = vpow2.f32 %v3874_v59  ;;  %v3931_v28 = vpack.c.bf16 %v5291_v58, %v5285_v27  ;;  %v8031_v27 = vld [vmem:[#allocation46_spill] sm:$0xff]  ;;  %v3880_v59 = vmul.f32 1.442695, %v3775_v1 }
 0xa01   : > { %v5295_v4 = vpop.eup %5294  ;;  %5306 = vpow2.f32 %v3804_v52  ;;  %v3771_v35 = vsub.f32 %v8031_v27, %v7444_v32 }
 0xa02   : > { %4026 = vmatpush.bf16.msrb.mxu2 %v3937_v49  ;;  %v5297_v21 = vpop.eup %5296  ;;  %5308 = vpow2.f32 %v3862_v61  ;;  %v8034_v61 = vld [vmem:[#allocation45_spill] sm:$0xff] }
 0xa03   : > { %v5299_v50 = vpop.eup %5298  ;;  %4005 = vmatpush.bf16.msra.mxu3 %v3948_v42  ;;  %5310 = vpow2.f32 %v3866_v17  ;;  %v3946_v60 = vpack.c.bf16 %v5297_v21, %v5295_v4  ;;  %v3872_v58 = vmul.f32 1.442695, %v3771_v35  ;;  %v3876_v17 = vmul.f32 1.442695, %v3773_v36 }
 0xa04   : > { %v5301_v41 = vpop.eup %5300  ;;  %v3929_v39 = vpack.c.bf16 %v5299_v50, %v5293_v12  ;;  %5312 = vpow2.f32 %v3904_v22  ;;  %v3769_v12 = vsub.f32 %v8034_v61, %v7444_v32 }
 0xa05   : > { %v5303_v44 = vpop.eup %5302  ;;  %5314 = vpow2.f32 %v3908_v45 }
 0xa06   : > { %4027 = vmatpush.bf16.msrb.mxu2 %v3935_v31  ;;  %v5305_v37 = vpop.eup %5304  ;;  %5316 = vpow2.f32 %v3896_v33  ;;  %v3868_v42 = vmul.f32 1.442695, %v3769_v12 }
 0xa07   : > { %v5307_v43 = vpop.eup %5306  ;;  %4006 = vmatpush.bf16.msra.mxu3 %v3946_v60  ;;  %v3944_v40 = vpack.c.bf16 %v5305_v37, %v5303_v44  ;;  %5318 = vpow2.f32 %v3900_v13  ;;  %v3724_v37 = vsub.f32 -inf, %v7422_v9 }
 0xa08   : > { %v5309_v62 = vpop.eup %5308  ;;  %v3927_v49 = vpack.c.bf16 %v5307_v43, %v5301_v41  ;;  %5320 = vpow2.f32 %v3888_v55 }
 0xa09   : > { %3991 = vmatmul.bf16.gmra.mxu2 %v8020_v23  ;;  %v5311_v5 = vpop.eup %5310  ;;  %5322 = vpow2.f32 %v3892_v54  ;;  %v3725_v43 = vmul.f32 1.442695, %v3724_v37 }
 0xa0a   : > { %4028 = vmatpush.bf16.msrb.mxu2 %v3933_v2  ;;  %v3942_v63 = vpack.c.bf16 %v5311_v5, %v5309_v62  ;;  %v5313_v31 = vpop.eup %5312  ;;  %v3767_v2 = vsub.f32 %v8033_v47, %v7444_v32  ;;  %5324 = vpow2.f32 %v3880_v59 }
 0xa0b   : > { %4007 = vmatpush.bf16.msra.mxu3 %v3944_v40  ;;  %v5315_v46 = vpop.eup %5314 }
 0xa0c   : > { %v5317_v38 = vpop.eup %5316  ;;  %v3953_v52 = vpack.c.bf16 %v5315_v46, %v5313_v31  ;;  %v3864_v4 = vmul.f32 1.442695, %v3767_v2 }
 0xa0d   : > { %v5319_v34 = vpop.eup %5318 }
 0xa0e   : > { %4029 = vmatpush.bf16.msrb.mxu2 %v3931_v28  ;;  %v5321_v20 = vpop.eup %5320  ;;  %v3951_v18 = vpack.c.bf16 %v5319_v34, %v5317_v38 }
 0xa0f   : > { %4008 = vmatpush.bf16.msra.mxu3 %v3942_v63 }
 0xa12   : > { %4030 = vmatpush.bf16.msrb.mxu2 %v3929_v39  ;;  %4009 = vmatmul.bf16.vlgmr.msra.gmra.mxu3 %v8029_v16 }
 0xa13   : > { %4047 = vmatpush.bf16.msrb.mxu3 %v3957_v25  ;;  %v3884_v25 = vmul.f32 1.442695, %v3777_v19 }
 0xa15   : > { %5326 = vpow2.f32 %v3884_v25 }
 0xa16   : > { %4031 = vmatpush.bf16.msrb.mxu2 %v3927_v49  ;;  %5328 = vpow2.f32 %v3872_v58 }
 0xa17   : > { %4048 = vmatpush.bf16.msrb.mxu3 %v3955_v0  ;;  %v5323_v0 = vpop.eup %5322  ;;  %5330 = vpow2.f32 %v3876_v17 }
 0xa18   : > { %v5325_v21 = vpop.eup %5324  ;;  %v3949_v28 = vpack.c.bf16 %v5323_v0, %v5321_v20  ;;  %5332 = vpow2.f32 %v3864_v4 }
 0xa19   : > { %3996 = vmatmul.bf16.gmra.mxu2 %v8030_v3  ;;  %5334 = vpow2.f32 %v3868_v42 }
 0xa1a   : > { %5336 = vpow2.f32 %v3725_v43 }
 0xa1b   : > { %4049 = vmatpush.bf16.msrb.mxu3 %v3953_v52  ;;  %v5327_v50 = vpop.eup %5326 }
 0xa1c   : > { %v5329_v41 = vpop.eup %5328  ;;  %v3947_v32 = vpack.c.bf16 %v5327_v50, %v5325_v21 }
 0xa1d   : > { %v5331_v11 = vpop.eup %5330 }
 0xa1e   : > { %v5333_v44 = vpop.eup %5332  ;;  %v3945_v57 = vpack.c.bf16 %v5331_v11, %v5329_v41  ;;  %v8036_v41 = vld [vmem:[#allocation52_spill] sm:$0xff] }
 0xa1f   : > { %4050 = vmatpush.bf16.msrb.mxu3 %v3951_v18  ;;  %v5335_v6 = vpop.eup %5334 }
 0xa20   : > { %v3943_v60 = vpack.c.bf16 %v5335_v6, %v5333_v44  ;;  %v5337_v56 = vpop.eup %5336 }
 0xa21   : > { %v4079_v62 = vperm.slane %v5337_v56, 3  ;;  %v4109_v0 = vmul.f32 0.0, %v5337_v56 }
 0xa22   : > { %4014 = vmatmul.bf16.gmra.mxu3 %v8035_v7 }
 0xa23   : > { %4051 = vmatpush.bf16.msrb.mxu3 %v3949_v28  ;;  %v4083_v53 = vperm.slane %v4079_v62, 3 }
 0xa25   : > { %v4085_v40 = vmul.f32 0.0, %v4083_v53 }
 0xa27   : > { %4052 = vmatpush.bf16.msrb.mxu3 %v3947_v32  ;;  %v8037_v32 = vld [vmem:[#allocation32_spill] sm:$0xff] }
 0xa29   : > { %4032 = vmatmul.bf16.vlgmr.msrb.gmra.mxu2 %v8016_v26 }
 0xa2b   : > { %4053 = vmatpush.bf16.msrb.mxu3 %v3945_v57 }
 0xa2f   : > { %4054 = vmatpush.bf16.msrb.mxu3 %v3943_v60 }
 0xa32   : > { %4019 = vmatmul.bf16.gmra.mxu3 %v8030_v3 }
 0xa39   : > { %4037 = vmatmul.bf16.gmra.mxu2 %v8020_v23 }
 0xa42   : > { %4055 = vmatmul.bf16.vlgmr.msrb.gmra.mxu3 %v8029_v16  ;;  %v4080_v16 = vperm.slane %v5337_v56, 7 }
 0xa49   : > { %4042 = vmatmul.bf16.gmra.mxu2 %v8030_v3 }
 0xa52   : > { %4060 = vmatmul.bf16.gmra.mxu3 %v8035_v7 }
 0xa62   : > { %4065 = vmatmul.bf16.gmra.mxu3 %v8030_v3  ;;  %v4084_v3 = vperm.slane %v4080_v16, 3 }
 0xa64   : > { %v4086_v59 = vmul.f32 0.0, %v4084_v3  ;;  %v8038_v3 = vld [vmem:[#allocation11_spill] sm:$0xff] }
 0xa7c   : > { %v3987_v26 = vpop.f32.mrf.mxu2 }
 0xa84   : > { %v3989_v39 = vpop.f32.mrf.mxu2 }
 0xa8c   : > { %v3992_v15 = vpop.f32.mrf.mxu2 }
 0xa94   : > { %v3994_v22 = vpop.f32.mrf.mxu2 }
 0xa95   : > { %v4010_v23 = vpop.f32.mrf.mxu3 }
 0xa96   : > { %v4011_v45 = vadd.f32 %v4010_v23, %v3987_v26 }
 0xa98   : > { %v7595_v5 = vadd.f32 %v4085_v40, %v4011_v45 }
 0xa9c   : > { %v3997_v10 = vpop.f32.mrf.mxu2 }
 0xa9d   : > { %v4012_v49 = vpop.f32.mrf.mxu3 }
 0xa9e   : > { %v4013_v30 = vadd.f32 %v4012_v49, %v3989_v39 }
 0xaa0   : > { %v7597_v33 = vadd.f32 %v4085_v40, %v4013_v30 }
 0xaa4   : > { %v3999_v14 = vpop.f32.mrf.mxu2 }
 0xaa5   : > { %v4015_v9 = vpop.f32.mrf.mxu3 }
 0xaa6   : > { %v4016_v24 = vadd.f32 %v4015_v9, %v3992_v15 }
 0xaa8   : > { %v4097_v13 = vadd.f32 %v4085_v40, %v4016_v24 }
 0xaac   : > { %v4033_v51 = vpop.f32.mrf.mxu2 }
 0xaad   : > { %v4017_v63 = vpop.f32.mrf.mxu3 }
 0xaae   : > { %v4018_v1 = vadd.f32 %v4017_v63, %v3994_v22 }
 0xab0   : > { %v4099_v55 = vadd.f32 %v4085_v40, %v4018_v1 }
 0xab4   : > { %v4035_v29 = vpop.f32.mrf.mxu2 }
 0xab5   : > { %v4020_v48 = vpop.f32.mrf.mxu3 }
 0xab6   : > { %v4021_v17 = vadd.f32 %v4020_v48, %v3997_v10 }
 0xabc   : > { %v4038_v19 = vpop.f32.mrf.mxu2 }
 0xabd   : > { %v4022_v54 = vpop.f32.mrf.mxu3 }
 0xac4   : > { %v4040_v31 = vpop.f32.mrf.mxu2 }
 0xac5   : > { %v4056_v46 = vpop.f32.mrf.mxu3 }
 0xac6   : > { %v4057_v35 = vadd.f32 %v4056_v46, %v4033_v51 }
 0xac8   : > { %v4094_v8 = vadd.f32 %v4086_v59, %v4057_v35 }
 0xacc   : > { %v4043_v27 = vpop.f32.mrf.mxu2 }
 0xacd   : > { %v4058_v36 = vpop.f32.mrf.mxu3 }
 0xace   : > { %v4059_v38 = vadd.f32 %v4058_v36, %v4035_v29 }
 0xad0   : > { %v4096_v52 = vadd.f32 %v4086_v59, %v4059_v38 }
 0xad4   : > { %v4045_v25 = vpop.f32.mrf.mxu2 }
 0xad5   : > { %v4061_v34 = vpop.f32.mrf.mxu3  ;;  %v8040_v25 = vld [vmem:[#allocation15_spill] sm:$0xff] }
 0xad6   : > { %v4062_v47 = vadd.f32 %v4061_v34, %v4038_v19  ;;  %v8043_v34 = vld [vmem:[#allocation56_spill] sm:$0xff] }
 0xad8   : > { %v4098_v2 = vadd.f32 %v4086_v59, %v4062_v47 }
 0xadd   : > { %v4063_v58 = vpop.f32.mrf.mxu3 }
 0xade   : > { %v4064_v6 = vadd.f32 %v4063_v58, %v4040_v31  ;;  %v8044_v58 = vld [vmem:[#allocation54_spill] sm:$0xff] }
 0xae0   : > { %v4100_v26 = vadd.f32 %v4086_v59, %v4064_v6 }
 0xae5   : > { %v4066_v61 = vpop.f32.mrf.mxu3 }
 0xae6   : > { %v4067_v12 = vadd.f32 %v4066_v61, %v4043_v27  ;;  %v8039_v27 = vld [vmem:[#allocation12_spill] sm:$0xff] }
 0xae8   : > { %v4112_v20 = vrot.slane %v4067_v12, 4  ;;  %v8045_v12 = vld [vmem:[#allocation14_spill] sm:$0xff] }
 0xaea   : > { %v4113_v18 = vsel %vm373_vm0, %v4021_v17, %v4112_v20  ;;  %v8046_v20 = vld [vmem:[#allocation31_spill] sm:$0xff] }
 0xaeb   : > { %v4114_v4 = vrot.slane %v4113_v18, 5 }
 0xaed   : > { %v4116_v42 = vadd.f32 %v4114_v4, %v4109_v0  ;;  %v4068_v21 = vpop.f32.mrf.mxu3  ;;  %v5421_v0 = vmov 0  }
 0xaee   : > { %4816 = vset.pattern.permute.xlu1 %v5421_v0  ;;  %4817 = vset.pattern.permute.xlu0 %v5421_v0 }
 0xaef   : > { %v4148_v28 = vperm.slane %v4116_v42, 3  ;;  %v4149_v50 = vperm.slane %v4116_v42, 7  ;;  %v8047_v42 = vld [vmem:[#allocation17_spill] sm:$0xff] }
 0xaf1   : > { %v4156_v7 = vsel %vm4123_vm5, %v8036_v41, %v4148_v28  ;;  %v4157_v11 = vsel %vm4123_vm5, %v8037_v32, %v4149_v50  ;;  %v8048_v28 = vld [vmem:[#allocation29_spill] sm:$0xff]  ;;  %v8049_v41 = vld [vmem:[#allocation38_spill] sm:$0xff] }
 0xaf2   : > { %v4160_v44 = vrot.slane %v4157_v11, 4  ;;  %v8050_v11 = vld [vmem:[#allocation55_spill] sm:$0xff] }
 0xaf4   : > { %v4161_v57 = vsel %vm373_vm0, %v4156_v7, %v4160_v44 }
 0xaf5   : > { %5338 = vrcp.f32 %v4161_v57  ;;  %v8051_v57 = vld [vmem:[#allocation53_spill] sm:$0xff] }
 0xafb   : > { %v5339_v60 = vpop.eup %5338 }
 0xafc   : > { %v4244_v37 = vperm.slane %v5339_v60, 3  ;;  %v4245_v39 = vperm.slane %v5339_v60, 7  ;;  %v4222_v43 = vperm.slane %v5339_v60, 2  ;;  %v4223_v15 = vperm.slane %v5339_v60, 6 }
 0xafd   : > { %v4200_v56 = vperm.slane %v5339_v60, 1  ;;  %v4201_v22 = vperm.slane %v5339_v60, 5  ;;  %v4178_v62 = vperm.slane %v5339_v60, 0  ;;  %v4179_v53 = vperm.slane %v5339_v60, 4  ;;  %v8052_v60 = vld [vmem:[#allocation39_spill] sm:$0xff] }
 0xafe   : > { %v4248_v23 = vperm.slane %v4244_v37, 3  ;;  %v4249_v10 = vperm.slane %v4245_v39, 3  ;;  %v4226_v45 = vperm.slane %v4222_v43, 2  ;;  %v4227_v40 = vperm.slane %v4223_v15, 2  ;;  %v8053_v43 = vld [vmem:[#allocation37_spill] sm:$0xff] }
 0xaff   : > { %v4204_v49 = vperm.slane %v4200_v56, 1  ;;  %v4205_v14 = vperm.slane %v4201_v22, 1  ;;  %v4182_v30 = vperm.slane %v4178_v62, 0  ;;  %v4183_v9 = vperm.slane %v4179_v53, 0  ;;  %v8054_v22 = vld [vmem:[#allocation26_spill] sm:$0xff]  ;;  %v8055_v53 = vld [vmem:[#allocation27_spill] sm:$0xff] }
 0xb00   : > { %v4254_v51 = vmul.f32 %v4248_v23, %v4097_v13  ;;  %v4256_v24 = vmul.f32 %v4248_v23, %v4099_v55  ;;  %v4255_v63 = vmul.f32 %v4249_v10, %v4098_v2  ;;  %v4257_v29 = vmul.f32 %v4249_v10, %v4100_v26  ;;  %v8041_v13 = vld [vmem:[#allocation13_spill] sm:$0xff] }
 0xb01   : > { %v4250_v1 = vmul.f32 %v4248_v23, %v7595_v5  ;;  %v4252_v48 = vmul.f32 %v4248_v23, %v7597_v33  ;;  %v4251_v19 = vmul.f32 %v4249_v10, %v4094_v8  ;;  %v4253_v54 = vmul.f32 %v4249_v10, %v4096_v52  ;;  %v4275_v5 = vld [vmem:[%s7677_s4] sm:$0xf] }
 0xb02   : > { %v4272_v31 = vpack.c.bf16 %v4256_v24, %v4254_v51  ;;  %v4273_v16 = vpack.c.bf16 %v4257_v29, %v4255_v63  ;;  %v4232_v46 = vmul.f32 %v4226_v45, %v8038_v3  ;;  %v4234_v35 = vmul.f32 %v4226_v45, %v8039_v27  ;;  %v8042_v8 = vld [vmem:[#allocation58_spill] sm:$0xff]  ;;  %4278 = vperm.xlu1 %4816, %v4275_v5   ;;  %v8057_v51 = vld [vmem:[#allocation23_spill] sm:$0xff] }
 0xb03   : > { %v4270_v59 = vpack.c.bf16 %v4252_v48, %v4250_v1  ;;  %v4271_v36 = vpack.c.bf16 %v4253_v54, %v4251_v19  ;;  %v4233_v38 = vmul.f32 %v4227_v40, %v8040_v25  ;;  %v4235_v55 = vmul.f32 %v4227_v40, %v8041_v13  ;;  %v8056_v10 = vld [vmem:[#allocation22_spill] sm:$0xff]  ;;  %v8060_v19 = vld [vmem:[#allocation24_spill] sm:$0xff] }
 0xb04   : > { %4281 = vmatpush.bf16.msra.mxu2 %v4272_v31  ;;  %4294 = vmatpush.bf16.msra.mxu3 %v4273_v16  ;;  %v4268_v33 = vpack.c.bf16 %v4234_v35, %v4232_v46  ;;  %v4228_v52 = vmul.f32 %v4226_v45, %v8042_v8  ;;  %v4230_v47 = vmul.f32 %v4226_v45, %v8043_v34  ;;  %v8059_v29 = vld [vmem:[#allocation30_spill] sm:$0xff]  ;;  %v8061_v31 = vld [vmem:[#allocation25_spill] sm:$0xff] }
 0xb05   : > { %v4269_v2 = vpack.c.bf16 %v4235_v55, %v4233_v38  ;;  %v4229_v61 = vmul.f32 %v4227_v40, %v8044_v58  ;;  %v4231_v17 = vmul.f32 %v4227_v40, %v8045_v12  ;;  %v4210_v18 = vmul.f32 %v4204_v49, %v8046_v20 }
 0xb06   : > { %v4266_v4 = vpack.c.bf16 %v4230_v47, %v4228_v52  ;;  %v4212_v21 = vmul.f32 %v4204_v49, %v8047_v42  ;;  %v4211_v50 = vmul.f32 %v4205_v14, %v8048_v28  ;;  %v4213_v7 = vmul.f32 %v4205_v14, %v8049_v41 }
 0xb07   : > { %v4267_v32 = vpack.c.bf16 %v4231_v17, %v4229_v61  ;;  %v4206_v44 = vmul.f32 %v4204_v49, %v8050_v11  ;;  %v4208_v6 = vmul.f32 %v4204_v49, %v8051_v57  ;;  %v4207_v26 = vmul.f32 %v4205_v14, %v8052_v60  ;;  %v8058_v49 = vld [vmem:[#allocation28_spill] sm:$0xff] }
 0xb08   : > { %4282 = vmatpush.bf16.msra.mxu2 %v4270_v59  ;;  %4295 = vmatpush.bf16.msra.mxu3 %v4271_v36  ;;  %v4264_v37 = vpack.c.bf16 %v4212_v21, %v4210_v18  ;;  %v4265_v39 = vpack.c.bf16 %v4213_v7, %v4211_v50  ;;  %v4209_v15 = vmul.f32 %v4205_v14, %v8053_v43 }
 0xb09   : > { %v4262_v56 = vpack.c.bf16 %v4208_v6, %v4206_v44  ;;  %v4188_v62 = vmul.f32 %v4182_v30, %v8054_v22  ;;  %v4190_v23 = vmul.f32 %v4182_v30, %v8055_v53  ;;  %v4189_v45 = vmul.f32 %v4183_v9, %v8056_v10 }
 0xb0a   : > { %v4263_v40 = vpack.c.bf16 %v4209_v15, %v4207_v26  ;;  %v4191_v24 = vmul.f32 %v4183_v9, %v8057_v51  ;;  %v4184_v63 = vmul.f32 %v4182_v30, %v8058_v49  ;;  %v4186_v1 = vmul.f32 %v4182_v30, %v8059_v29  ;;  %v4274_v30 = vld [vmem:[%s7676_s3] sm:$0x3] }
 0xb0b   : > { %v4260_v48 = vpack.c.bf16 %v4190_v23, %v4188_v62  ;;  %v4185_v54 = vmul.f32 %v4183_v9, %v8060_v19  ;;  %v4187_v16 = vmul.f32 %v4183_v9, %v8061_v31 }
 0xb0c   : > { %4283 = vmatpush.bf16.msra.mxu2 %v4268_v33  ;;  %4296 = vmatpush.bf16.msra.mxu3 %v4269_v2  ;;  %v4261_v14 = vpack.c.bf16 %v4191_v24, %v4189_v45  ;;  %v4258_v3 = vpack.c.bf16 %v4186_v1, %v4184_v63 }
 0xb0d   : > { %v4259_v46 = vpack.c.bf16 %v4187_v16, %v4185_v54 }
 0xb10   : > { %4284 = vmatpush.bf16.msra.mxu2 %v4266_v4  ;;  %4297 = vmatpush.bf16.msra.mxu3 %v4267_v32 }
 0xb14   : > { %4285 = vmatpush.bf16.msra.mxu2 %v4264_v37  ;;  %4298 = vmatpush.bf16.msra.mxu3 %v4265_v39 }
 0xb18   : > { %4286 = vmatpush.bf16.msra.mxu2 %v4262_v56  ;;  %4299 = vmatpush.bf16.msra.mxu3 %v4263_v40 }
 0xb1c   : > { %4287 = vmatpush.bf16.msra.mxu2 %v4260_v48  ;;  %4300 = vmatpush.bf16.msra.mxu3 %v4261_v14 }
 0xb20   : > { %4288 = vmatpush.bf16.msra.mxu2 %v4258_v3  ;;  %4301 = vmatpush.bf16.msra.mxu3 %v4259_v46 }
 0xb23   : > { %4289 = vmatmul.bf16.vlgmr.msra.gmra.mxu2 %v4274_v30  ;;  %4302 = vmatmul.bf16.vlgmr.msra.gmra.mxu3 %v4274_v30 }
 0xb74   : > { %v4279_v9 = vpop.permute.xlu1 %4278 }
 0xba6   : > { %v4290_v27 = vpop.f32.mrf.mxu2  ;;  %v4303_v35 = vpop.f32.mrf.mxu3 }
 0xba7   : > { %v4304_v59 = vadd.f32 %v4303_v35, %v4279_v9  ;;  %v4291_v36 = vadd.f32 %v4290_v27, %v4279_v9 }
 0xba9   : > { %v4309_v25 = vrot.slane %v4304_v59, 4 }
 0xbab   : > { %v4310_v38 = vsel %vm373_vm0, %v4291_v36, %v4309_v25 }
 0xbac   : > { %4312 = vst [vmem:[%s275_s16] sm:$0xff] %v4310_v38 }
 0xbad   : > { %5367 = shalt.err (!%p5364_p5)
}
 0xbae   : > { %4759 = dma.vmem_to_hbm [thread:$0]  (%p5492_p4), %s4330_s17, 128, %s4332_s24, %s4314_s21   ;;  %v4292_v13 = vpop.f32.mrf.mxu2  ;;  %v4305_v55 = vpop.f32.mrf.mxu3 }
 0xbaf PF: > { %p4765_p6 = scmp.ge.s32.totalorder %s5418_s23, 2  ;;  %s4343_s10 = sand.u32 1, %s5398_s18  }
 0xbb0   : > { %s4344_s12 = scalar_lea.sflag [#allocation7], %s4343_s10 }
 0xbb1   : > { %p4762_p7 = pnand %p4765_p6, %p5499_p8 }
 0xbb3   : > { %p4763_p9 = pneg %p4762_p7 }
 0xbb5   : > { %5393 = dma.done.wait (%p4763_p9), %s4344_s12, 128  }
 0xbb6   : > { %5395 = vsyncadd (%p4763_p9), %s4344_s12, 4294967168  ;;  %s18_s23 = sadd.s32 1, %s5418_s23   ;;  %s8062_s18 = smov %s5402_s19 }
 0xbb7   : > { %p15_p10 = scmp.ge.s32.totalorder %s18_s23, 4   ;;  %s8063_s19 = smov %s5406_s20 }
 0xbb8   : > { %s8064_s20 = smov %s5505_s6  ;;  %s8065_s21 = smov %s5414_s22 }
 0xbb9   : > { %s8066_s22 = smov %s8068_s26  ;;  %17 = sbr.rel (!%p15_p10) target bundleno = 4 (0x4), region = 86 }
 0xbbe   :  { %4350 = vsyncpa [#allocation7], 1 }
 0xbbf   :  { %4352 = vsyncpa [#allocation7 + $0x1], 1 }

</bundles_post_ra>
